<compile_context>
chip_gen: v7x
topology: tpu7x:2x2x1
jax: 0.10.0
libtpu: 0.0.40
codegen_flags: <defaults>
</compile_context>

<pallas_src>
import jax
import jax.numpy as jnp
from jax.experimental import pallas as pl
from jax.experimental.pallas import tpu as pltpu

# EfficientFormer_width['S2'] = [32, 64, 144, 288] -> last stage width
NUM_FEATURES = 288
H1 = 1024
H2 = 512
GROUPS = (9, 10, 5, 2, 9, 3, 2)          # per-block output widths, sum = 40
NUM_BLOCKS = len(GROUPS)

PADDED_OUT = 16                           # per-block logits padded to 16 lanes
BLOCKS_PER_STEP = 2                       # head blocks handled per grid step
PADDED_BLOCKS = 8                         # 7 real + 1 zero dummy block
GRID_STEPS = PADDED_BLOCKS // BLOCKS_PER_STEP
OUT_LANES = 128                           # per-step output block (lane-dense)
AFF_W = H1 + H2 + PADDED_OUT              # packed scale/bias width = 1552

# Column gather index: real block j lives at grid step j//2, sub-slot j%2.
_COLS = []
for _j, _g in enumerate(GROUPS):
    _base = (_j // BLOCKS_PER_STEP) * OUT_LANES + (_j % BLOCKS_PER_STEP) * PADDED_OUT
    _COLS.extend(range(_base, _base + _g))
COL_INDEX = tuple(_COLS)


def head_kernel(x_ref, w1_ref, w2_ref, w3_ref, aff_ref, o_ref):
    x = x_ref[...]                                     # (B, 288) bf16 (pre-cast)
    B = x.shape[0]
    outs = []
    for g in range(BLOCKS_PER_STEP):                   # static, unrolled
        s1 = aff_ref[g, 0:1, 0:H1]                     # (1, 1024) f32 dequant scale
        b1 = aff_ref[g, 1:2, 0:H1]                     # (1, 1024) f32 bias
        s2 = aff_ref[g, 0:1, H1:H1 + H2]
        b2 = aff_ref[g, 1:2, H1:H1 + H2]
        s3 = aff_ref[g, 0:1, H1 + H2:AFF_W]
        b3 = aff_ref[g, 1:2, H1 + H2:AFF_W]

        # int8 weights -> bf16 (exact), MXU bf16 x bf16 with f32 accumulation,
        # per-output-channel dequant applied to the (B, H) result on the VPU.
        h1 = jnp.dot(x, w1_ref[g].astype(jnp.bfloat16),
                     preferred_element_type=jnp.float32)
        h1 = jnp.maximum(h1 * s1 + b1, 0.0)            # (B, 1024) f32
        h2 = jnp.dot(h1.astype(jnp.bfloat16), w2_ref[g].astype(jnp.bfloat16),
                     preferred_element_type=jnp.float32)
        h2 = jnp.maximum(h2 * s2 + b2, 0.0)            # (B, 512) f32
        logits = jnp.dot(h2.astype(jnp.bfloat16), w3_ref[g].astype(jnp.bfloat16),
                         preferred_element_type=jnp.float32)
        logits = logits * s3 + b3                      # (B, 16) f32
        outs.append(jax.nn.sigmoid(logits))            # final Sigmoid

    # Single lane-dense (B, 128) store per step; unused lanes zeroed.
    tail = jnp.zeros((B, OUT_LANES - BLOCKS_PER_STEP * PADDED_OUT), jnp.float32)
    o_ref[...] = jnp.concatenate(outs + [tail], axis=1)


@jax.jit
def head_forward(x, w1q, w2q, w3q, affine):
    """x: [B, 288] f32 -> [B, sum(GROUPS)] f32 (sigmoid-activated)."""
    B = x.shape[0]
    xb = x.astype(jnp.bfloat16)          # cast once, not per grid step
    padded = pl.pallas_call(
        head_kernel,
        out_shape=jax.ShapeDtypeStruct((B, GRID_STEPS * OUT_LANES), jnp.float32),
        grid=(GRID_STEPS,),
        in_specs=[
            pl.BlockSpec((B, NUM_FEATURES), lambda i: (0, 0)),                 # x (shared)
            pl.BlockSpec((BLOCKS_PER_STEP, NUM_FEATURES, H1), lambda i: (i, 0, 0)),  # W1 int8
            pl.BlockSpec((BLOCKS_PER_STEP, H1, H2), lambda i: (i, 0, 0)),            # W2 int8
            pl.BlockSpec((BLOCKS_PER_STEP, H2, PADDED_OUT), lambda i: (i, 0, 0)),    # W3 int8
            pl.BlockSpec((BLOCKS_PER_STEP, 2, AFF_W), lambda i: (i, 0, 0)),    # scales+biases
        ],
        out_specs=pl.BlockSpec((B, OUT_LANES), lambda i: (0, i)),
        compiler_params=pltpu.CompilerParams(
            dimension_semantics=("parallel",),
        ),
    )(xb, w1q, w2q, w3q, affine)

    # Single 40-column gather un-padding (no transpose/reshape epilogue).
    cols = jnp.array(COL_INDEX, dtype=jnp.int32)
    return jnp.take(padded, cols, axis=1)


def init_params(key):
    """PyTorch-Linear-style init + per-output-channel int8 weight quantization.

    Weights streamed as int8 (HBM-bandwidth bound workload); scales/biases f32.
    NOTE: int8 quantization drifts from the f32 PyTorch numerics; the self-test
    reference below uses identical quantized math.
    """
    def linear(k, fan_in, fan_out):
        kw, kb = jax.random.split(k)
        bound = 1.0 / jnp.sqrt(fan_in)
        w = jax.random.uniform(kw, (fan_in, fan_out), jnp.float32, -bound, bound)
        b = jax.random.uniform(kb, (fan_out,), jnp.float32, -bound, bound)
        return w, b

    def quant(w):  # per-output-channel symmetric int8
        s = jnp.max(jnp.abs(w), axis=0) / 127.0
        s = jnp.where(s == 0.0, 1.0, s)
        q = jnp.clip(jnp.round(w / s), -127, 127).astype(jnp.int8)
        return q, s.astype(jnp.float32)

    w1q, w2q, w3q, aff = [], [], [], []
    keys = jax.random.split(key, NUM_BLOCKS * 3).reshape(NUM_BLOCKS, 3, 2)
    for j, g in enumerate(GROUPS):
        w1, b1 = linear(keys[j, 0], NUM_FEATURES, H1)
        w2, b2 = linear(keys[j, 1], H1, H2)
        w3, b3 = linear(keys[j, 2], H2, g)
        # zero-pad last linear to PADDED_OUT lanes (padded cols gathered away)
        w3p = jnp.zeros((H2, PADDED_OUT), jnp.float32).at[:, :g].set(w3)
        b3p = jnp.zeros((PADDED_OUT,), jnp.float32).at[:g].set(b3)
        q1, s1 = quant(w1)
        q2, s2 = quant(w2)
        q3, s3 = quant(w3p)
        w1q.append(q1); w2q.append(q2); w3q.append(q3)
        scales = jnp.concatenate([s1, s2, s3])              # (1552,)
        biases = jnp.concatenate([b1, b2, b3p])             # (1552,)
        aff.append(jnp.stack([scales, biases]))             # (2, 1552)

    # Pad to 8 blocks with a zero dummy block (even 2-blocks-per-step grid).
    n_pad = PADDED_BLOCKS - NUM_BLOCKS
    w1q += [jnp.zeros((NUM_FEATURES, H1), jnp.int8)] * n_pad
    w2q += [jnp.zeros((H1, H2), jnp.int8)] * n_pad
    w3q += [jnp.zeros((H2, PADDED_OUT), jnp.int8)] * n_pad
    dummy_aff = jnp.stack([jnp.ones((AFF_W,), jnp.float32),
                           jnp.zeros((AFF_W,), jnp.float32)])
    aff += [dummy_aff] * n_pad

    return (jnp.stack(w1q), jnp.stack(w2q), jnp.stack(w3q), jnp.stack(aff))


def reference_forward(x, w1q, w2q, w3q, affine):
    """Plain-JAX reference with identical (int8-weight, bf16-MXU, f32-acc) math."""
    xb = x.astype(jnp.bfloat16)
    outs = []
    for j, g in enumerate(GROUPS):
        s1 = affine[j, 0, 0:H1];            b1 = affine[j, 1, 0:H1]
        s2 = affine[j, 0, H1:H1 + H2];      b2 = affine[j, 1, H1:H1 + H2]
        s3 = affine[j, 0, H1 + H2:AFF_W];   b3 = affine[j, 1, H1 + H2:AFF_W]
        h1 = jnp.dot(xb, w1q[j].astype(jnp.bfloat16),
                     preferred_element_type=jnp.float32)
        h1 = jnp.maximum(h1 * s1 + b1, 0.0)
        h2 = jnp.dot(h1.astype(jnp.bfloat16), w2q[j].astype(jnp.bfloat16),
                     preferred_element_type=jnp.float32)
        h2 = jnp.maximum(h2 * s2 + b2, 0.0)
        logits = jnp.dot(h2.astype(jnp.bfloat16), w3q[j].astype(jnp.bfloat16),
                         preferred_element_type=jnp.float32)
        logits = logits * s3 + b3
        outs.append(jax.nn.sigmoid(logits)[:, :g])
    return jnp.concatenate(outs, axis=1)


if __name__ == "__main__":
    key = jax.random.PRNGKey(0)
    k_x, k_p = jax.random.split(key)

    B = 8
    x = jax.random.normal(k_x, (B, NUM_FEATURES), jnp.float32)
    params = init_params(k_p)

    out = head_forward(x, *params)
    out = jax.block_until_ready(out)

    assert out.shape == (B, sum(GROUPS)), out.shape

    ref = reference_forward(x, *params)
    assert jnp.allclose(out, ref, atol=1e-3, rtol=1e-3), (
        float(jnp.max(jnp.abs(out - ref))))

    print("KERNEL_OK")
</pallas_src>

<mosaic_0001>
module attributes {stable_mosaic.version = 11 : i64} {
  func.func @head_kernel(%arg0: i32, %arg1: memref<8x288xbf16, #tpu.memory_space<vmem>>, %arg2: memref<2x288x1024xi8, #tpu.memory_space<vmem>>, %arg3: memref<2x1024x512xi8, #tpu.memory_space<vmem>>, %arg4: memref<2x512x16xi8, #tpu.memory_space<vmem>>, %arg5: memref<2x2x1552xf32, #tpu.memory_space<vmem>>, %arg6: memref<8x128xf32, #tpu.memory_space<vmem>>) attributes {dimension_semantics = [#tpu.dimension_semantics<parallel>], iteration_bounds = array<i64: 4>, scalar_prefetch = 0 : i64, scratch_operands = 0 : i64, tpu.core_type = #tpu.core_type<tc>, window_params = [{pipeline_mode = #tpu.pipeline_mode<synchronous>, transform_indices = @transform_0, window_bounds = array<i64: 8, 288>}, {transform_indices = @transform_1, window_bounds = array<i64: 2, 288, 1024>}, {transform_indices = @transform_2, window_bounds = array<i64: 2, 1024, 512>}, {transform_indices = @transform_3, window_bounds = array<i64: 2, 512, 16>}, {transform_indices = @transform_4, window_bounds = array<i64: 2, 2, 1552>}, {transform_indices = @transform_5, window_bounds = array<i64: 8, 128>}]} {
    %c0 = arith.constant 0 : index
    %c0_0 = arith.constant 0 : index
    %0 = vector.load %arg1[%c0, %c0_0] : memref<8x288xbf16, #tpu.memory_space<vmem>>, vector<8x288xbf16>
    %c0_1 = arith.constant 0 : index
    %c0_2 = arith.constant 0 : index
    %c0_3 = arith.constant 0 : index
    %1 = vector.load %arg5[%c0_1, %c0_2, %c0_3] : memref<2x2x1552xf32, #tpu.memory_space<vmem>>, vector<1x1x1024xf32>
    %2 = vector.shape_cast %1 : vector<1x1x1024xf32> to vector<1x1024xf32>
    %c0_4 = arith.constant 0 : index
    %c1 = arith.constant 1 : index
    %c0_5 = arith.constant 0 : index
    %3 = vector.load %arg5[%c0_4, %c1, %c0_5] : memref<2x2x1552xf32, #tpu.memory_space<vmem>>, vector<1x1x1024xf32>
    %4 = vector.shape_cast %3 : vector<1x1x1024xf32> to vector<1x1024xf32>
    %c0_6 = arith.constant 0 : index
    %c0_7 = arith.constant 0 : index
    %c1024 = arith.constant 1024 : index
    %5 = vector.load %arg5[%c0_6, %c0_7, %c1024] : memref<2x2x1552xf32, #tpu.memory_space<vmem>>, vector<1x1x512xf32>
    %6 = vector.shape_cast %5 : vector<1x1x512xf32> to vector<1x512xf32>
    %c0_8 = arith.constant 0 : index
    %c1_9 = arith.constant 1 : index
    %c1024_10 = arith.constant 1024 : index
    %7 = vector.load %arg5[%c0_8, %c1_9, %c1024_10] : memref<2x2x1552xf32, #tpu.memory_space<vmem>>, vector<1x1x512xf32>
    %8 = vector.shape_cast %7 : vector<1x1x512xf32> to vector<1x512xf32>
    %c0_11 = arith.constant 0 : index
    %c0_12 = arith.constant 0 : index
    %c1536 = arith.constant 1536 : index
    %9 = vector.load %arg5[%c0_11, %c0_12, %c1536] : memref<2x2x1552xf32, #tpu.memory_space<vmem>>, vector<1x1x16xf32>
    %10 = vector.shape_cast %9 : vector<1x1x16xf32> to vector<1x16xf32>
    %c0_13 = arith.constant 0 : index
    %c1_14 = arith.constant 1 : index
    %c1536_15 = arith.constant 1536 : index
    %11 = vector.load %arg5[%c0_13, %c1_14, %c1536_15] : memref<2x2x1552xf32, #tpu.memory_space<vmem>>, vector<1x1x16xf32>
    %12 = vector.shape_cast %11 : vector<1x1x16xf32> to vector<1x16xf32>
    %c0_16 = arith.constant 0 : index
    %c0_17 = arith.constant 0 : index
    %c0_18 = arith.constant 0 : index
    %13 = vector.load %arg2[%c0_16, %c0_17, %c0_18] : memref<2x288x1024xi8, #tpu.memory_space<vmem>>, vector<1x288x1024xi8>
    %14 = vector.shape_cast %13 : vector<1x288x1024xi8> to vector<288x1024xi8>
    %15 = arith.sitofp %14 : vector<288x1024xi8> to vector<288x1024xbf16>
    %cst = arith.constant dense<0.000000e+00> : vector<8x1024xf32>
    %16 = tpu.matmul %0, %15, %cst {dimension_numbers = #tpu.dot_dimension_numbers<[1], [0], [0], [1], [0, 0, 1, 1], [], []>} : vector<8x288xbf16>, vector<288x1024xbf16>, vector<8x1024xf32> -> vector<8x1024xf32>
    %17 = vector.broadcast %2 : vector<1x1024xf32> to vector<8x1024xf32>
    %18 = arith.mulf %16, %17 : vector<8x1024xf32>
    %19 = vector.broadcast %4 : vector<1x1024xf32> to vector<8x1024xf32>
    %20 = arith.addf %18, %19 : vector<8x1024xf32>
    %cst_19 = arith.constant 0.000000e+00 : f32
    %21 = vector.broadcast %cst_19 : f32 to vector<8x1024xf32>
    %22 = arith.maximumf %20, %21 : vector<8x1024xf32>
    %23 = arith.truncf %22 : vector<8x1024xf32> to vector<8x1024xbf16>
    %c0_20 = arith.constant 0 : index
    %c0_21 = arith.constant 0 : index
    %c0_22 = arith.constant 0 : index
    %24 = vector.load %arg3[%c0_20, %c0_21, %c0_22] : memref<2x1024x512xi8, #tpu.memory_space<vmem>>, vector<1x1024x512xi8>
    %25 = vector.shape_cast %24 : vector<1x1024x512xi8> to vector<1024x512xi8>
    %26 = arith.sitofp %25 : vector<1024x512xi8> to vector<1024x512xbf16>
    %cst_23 = arith.constant dense<0.000000e+00> : vector<8x512xf32>
    %27 = tpu.matmul %23, %26, %cst_23 {dimension_numbers = #tpu.dot_dimension_numbers<[1], [0], [0], [1], [0, 0, 1, 1], [], []>} : vector<8x1024xbf16>, vector<1024x512xbf16>, vector<8x512xf32> -> vector<8x512xf32>
    %28 = vector.broadcast %6 : vector<1x512xf32> to vector<8x512xf32>
    %29 = arith.mulf %27, %28 : vector<8x512xf32>
    %30 = vector.broadcast %8 : vector<1x512xf32> to vector<8x512xf32>
    %31 = arith.addf %29, %30 : vector<8x512xf32>
    %cst_24 = arith.constant 0.000000e+00 : f32
    %32 = vector.broadcast %cst_24 : f32 to vector<8x512xf32>
    %33 = arith.maximumf %31, %32 : vector<8x512xf32>
    %34 = arith.truncf %33 : vector<8x512xf32> to vector<8x512xbf16>
    %c0_25 = arith.constant 0 : index
    %c0_26 = arith.constant 0 : index
    %c0_27 = arith.constant 0 : index
    %35 = vector.load %arg4[%c0_25, %c0_26, %c0_27] : memref<2x512x16xi8, #tpu.memory_space<vmem>>, vector<1x512x16xi8>
    %36 = vector.shape_cast %35 : vector<1x512x16xi8> to vector<512x16xi8>
    %37 = arith.sitofp %36 : vector<512x16xi8> to vector<512x16xbf16>
    %cst_28 = arith.constant dense<0.000000e+00> : vector<8x16xf32>
    %38 = tpu.matmul %34, %37, %cst_28 {dimension_numbers = #tpu.dot_dimension_numbers<[1], [0], [0], [1], [0, 0, 1, 1], [], []>} : vector<8x512xbf16>, vector<512x16xbf16>, vector<8x16xf32> -> vector<8x16xf32>
    %39 = vector.broadcast %10 : vector<1x16xf32> to vector<8x16xf32>
    %40 = arith.mulf %38, %39 : vector<8x16xf32>
    %41 = vector.broadcast %12 : vector<1x16xf32> to vector<8x16xf32>
    %42 = arith.addf %40, %41 : vector<8x16xf32>
    %43 = arith.negf %42 : vector<8x16xf32>
    %44 = math.exp %43 : vector<8x16xf32>
    %cst_29 = arith.constant 1.000000e+00 : f32
    %45 = vector.broadcast %cst_29 : f32 to vector<8x16xf32>
    %46 = arith.addf %45, %44 : vector<8x16xf32>
    %47 = arith.divf %45, %46 : vector<8x16xf32>
    %c1_30 = arith.constant 1 : index
    %c0_31 = arith.constant 0 : index
    %c0_32 = arith.constant 0 : index
    %48 = vector.load %arg5[%c1_30, %c0_31, %c0_32] : memref<2x2x1552xf32, #tpu.memory_space<vmem>>, vector<1x1x1024xf32>
    %49 = vector.shape_cast %48 : vector<1x1x1024xf32> to vector<1x1024xf32>
    %c1_33 = arith.constant 1 : index
    %c1_34 = arith.constant 1 : index
    %c0_35 = arith.constant 0 : index
    %50 = vector.load %arg5[%c1_33, %c1_34, %c0_35] : memref<2x2x1552xf32, #tpu.memory_space<vmem>>, vector<1x1x1024xf32>
    %51 = vector.shape_cast %50 : vector<1x1x1024xf32> to vector<1x1024xf32>
    %c1_36 = arith.constant 1 : index
    %c0_37 = arith.constant 0 : index
    %c1024_38 = arith.constant 1024 : index
    %52 = vector.load %arg5[%c1_36, %c0_37, %c1024_38] : memref<2x2x1552xf32, #tpu.memory_space<vmem>>, vector<1x1x512xf32>
    %53 = vector.shape_cast %52 : vector<1x1x512xf32> to vector<1x512xf32>
    %c1_39 = arith.constant 1 : index
    %c1_40 = arith.constant 1 : index
    %c1024_41 = arith.constant 1024 : index
    %54 = vector.load %arg5[%c1_39, %c1_40, %c1024_41] : memref<2x2x1552xf32, #tpu.memory_space<vmem>>, vector<1x1x512xf32>
    %55 = vector.shape_cast %54 : vector<1x1x512xf32> to vector<1x512xf32>
    %c1_42 = arith.constant 1 : index
    %c0_43 = arith.constant 0 : index
    %c1536_44 = arith.constant 1536 : index
    %56 = vector.load %arg5[%c1_42, %c0_43, %c1536_44] : memref<2x2x1552xf32, #tpu.memory_space<vmem>>, vector<1x1x16xf32>
    %57 = vector.shape_cast %56 : vector<1x1x16xf32> to vector<1x16xf32>
    %c1_45 = arith.constant 1 : index
    %c1_46 = arith.constant 1 : index
    %c1536_47 = arith.constant 1536 : index
    %58 = vector.load %arg5[%c1_45, %c1_46, %c1536_47] : memref<2x2x1552xf32, #tpu.memory_space<vmem>>, vector<1x1x16xf32>
    %59 = vector.shape_cast %58 : vector<1x1x16xf32> to vector<1x16xf32>
    %c1_48 = arith.constant 1 : index
    %c0_49 = arith.constant 0 : index
    %c0_50 = arith.constant 0 : index
    %60 = vector.load %arg2[%c1_48, %c0_49, %c0_50] : memref<2x288x1024xi8, #tpu.memory_space<vmem>>, vector<1x288x1024xi8>
    %61 = vector.shape_cast %60 : vector<1x288x1024xi8> to vector<288x1024xi8>
    %62 = arith.sitofp %61 : vector<288x1024xi8> to vector<288x1024xbf16>
    %cst_51 = arith.constant dense<0.000000e+00> : vector<8x1024xf32>
    %63 = tpu.matmul %0, %62, %cst_51 {dimension_numbers = #tpu.dot_dimension_numbers<[1], [0], [0], [1], [0, 0, 1, 1], [], []>} : vector<8x288xbf16>, vector<288x1024xbf16>, vector<8x1024xf32> -> vector<8x1024xf32>
    %64 = vector.broadcast %49 : vector<1x1024xf32> to vector<8x1024xf32>
    %65 = arith.mulf %63, %64 : vector<8x1024xf32>
    %66 = vector.broadcast %51 : vector<1x1024xf32> to vector<8x1024xf32>
    %67 = arith.addf %65, %66 : vector<8x1024xf32>
    %cst_52 = arith.constant 0.000000e+00 : f32
    %68 = vector.broadcast %cst_52 : f32 to vector<8x1024xf32>
    %69 = arith.maximumf %67, %68 : vector<8x1024xf32>
    %70 = arith.truncf %69 : vector<8x1024xf32> to vector<8x1024xbf16>
    %c1_53 = arith.constant 1 : index
    %c0_54 = arith.constant 0 : index
    %c0_55 = arith.constant 0 : index
    %71 = vector.load %arg3[%c1_53, %c0_54, %c0_55] : memref<2x1024x512xi8, #tpu.memory_space<vmem>>, vector<1x1024x512xi8>
    %72 = vector.shape_cast %71 : vector<1x1024x512xi8> to vector<1024x512xi8>
    %73 = arith.sitofp %72 : vector<1024x512xi8> to vector<1024x512xbf16>
    %cst_56 = arith.constant dense<0.000000e+00> : vector<8x512xf32>
    %74 = tpu.matmul %70, %73, %cst_56 {dimension_numbers = #tpu.dot_dimension_numbers<[1], [0], [0], [1], [0, 0, 1, 1], [], []>} : vector<8x1024xbf16>, vector<1024x512xbf16>, vector<8x512xf32> -> vector<8x512xf32>
    %75 = vector.broadcast %53 : vector<1x512xf32> to vector<8x512xf32>
    %76 = arith.mulf %74, %75 : vector<8x512xf32>
    %77 = vector.broadcast %55 : vector<1x512xf32> to vector<8x512xf32>
    %78 = arith.addf %76, %77 : vector<8x512xf32>
    %cst_57 = arith.constant 0.000000e+00 : f32
    %79 = vector.broadcast %cst_57 : f32 to vector<8x512xf32>
    %80 = arith.maximumf %78, %79 : vector<8x512xf32>
    %81 = arith.truncf %80 : vector<8x512xf32> to vector<8x512xbf16>
    %c1_58 = arith.constant 1 : index
    %c0_59 = arith.constant 0 : index
    %c0_60 = arith.constant 0 : index
    %82 = vector.load %arg4[%c1_58, %c0_59, %c0_60] : memref<2x512x16xi8, #tpu.memory_space<vmem>>, vector<1x512x16xi8>
    %83 = vector.shape_cast %82 : vector<1x512x16xi8> to vector<512x16xi8>
    %84 = arith.sitofp %83 : vector<512x16xi8> to vector<512x16xbf16>
    %cst_61 = arith.constant dense<0.000000e+00> : vector<8x16xf32>
    %85 = tpu.matmul %81, %84, %cst_61 {dimension_numbers = #tpu.dot_dimension_numbers<[1], [0], [0], [1], [0, 0, 1, 1], [], []>} : vector<8x512xbf16>, vector<512x16xbf16>, vector<8x16xf32> -> vector<8x16xf32>
    %86 = vector.broadcast %57 : vector<1x16xf32> to vector<8x16xf32>
    %87 = arith.mulf %85, %86 : vector<8x16xf32>
    %88 = vector.broadcast %59 : vector<1x16xf32> to vector<8x16xf32>
    %89 = arith.addf %87, %88 : vector<8x16xf32>
    %90 = arith.negf %89 : vector<8x16xf32>
    %91 = math.exp %90 : vector<8x16xf32>
    %cst_62 = arith.constant 1.000000e+00 : f32
    %92 = vector.broadcast %cst_62 : f32 to vector<8x16xf32>
    %93 = arith.addf %92, %91 : vector<8x16xf32>
    %94 = arith.divf %92, %93 : vector<8x16xf32>
    %cst_63 = arith.constant 0.000000e+00 : f32
    %95 = vector.broadcast %cst_63 : f32 to vector<8x96xf32>
    %96 = tpu.concatenate %47, %94, %95 in 1 : vector<8x16xf32>, vector<8x16xf32>, vector<8x96xf32> -> vector<8x128xf32>
    %c0_64 = arith.constant 0 : index
    %c0_65 = arith.constant 0 : index
    %97 = vector.load %arg6[%c0_64, %c0_65] : memref<8x128xf32, #tpu.memory_space<vmem>>, vector<8x128xf32>
    tpu.vector_store %arg6[%c0_64, %c0_65], %96 {strides = array<i32>} : memref<8x128xf32, #tpu.memory_space<vmem>>, vector<8x128xf32>,
    return
  }
  func.func @transform_0(%arg0: i32) -> (i32, i32) {
    %c0_i32 = arith.constant 0 : i32
    %c0_i32_0 = arith.constant 0 : i32
    %c0_i32_1 = arith.constant 0 : i32
    return %c0_i32, %c0_i32_0 : i32, i32
  }
  func.func @transform_1(%arg0: i32) -> (i32, i32, i32) {
    %c0_i32 = arith.constant 0 : i32
    %c0_i32_0 = arith.constant 0 : i32
    %c0_i32_1 = arith.constant 0 : i32
    return %arg0, %c0_i32, %c0_i32_0 : i32, i32, i32
  }
  func.func @transform_2(%arg0: i32) -> (i32, i32, i32) {
    %c0_i32 = arith.constant 0 : i32
    %c0_i32_0 = arith.constant 0 : i32
    %c0_i32_1 = arith.constant 0 : i32
    return %arg0, %c0_i32, %c0_i32_0 : i32, i32, i32
  }
  func.func @transform_3(%arg0: i32) -> (i32, i32, i32) {
    %c0_i32 = arith.constant 0 : i32
    %c0_i32_0 = arith.constant 0 : i32
    %c0_i32_1 = arith.constant 0 : i32
    return %arg0, %c0_i32, %c0_i32_0 : i32, i32, i32
  }
  func.func @transform_4(%arg0: i32) -> (i32, i32, i32) {
    %c0_i32 = arith.constant 0 : i32
    %c0_i32_0 = arith.constant 0 : i32
    %c0_i32_1 = arith.constant 0 : i32
    return %arg0, %c0_i32, %c0_i32_0 : i32, i32, i32
  }
  func.func @transform_5(%arg0: i32) -> (i32, i32) {
    %c0_i32 = arith.constant 0 : i32
    %c0_i32_0 = arith.constant 0 : i32
    return %c0_i32, %arg0 : i32, i32
  }
}

</mosaic_0001>

<bundles_post_ra>
// kernel: head_forward.1
= control target key start
LH: loop header
LB: loop body
LE: loop exit
PB: predicated region body
PF: predicated region fallthrough
CT: control target
= control target key end

     0   :  { %10 = vsyncpa [#allocation3], 0  ;;  %s5215_s0 = inlined_call_operand.vmem [shape: bf16[8,288], index: 0, kind: input, shape index: {}]   ;;  %s5216_s1 = inlined_call_operand.hbm [shape: s8[8,288,1024], index: 1, kind: input, shape index: {}]   ;;  %s5217_s2 = inlined_call_operand.hbm [shape: s8[8,1024,512], index: 2, kind: input, shape index: {}]   ;;  %s5218_s3 = inlined_call_operand.vmem [shape: s8[8,512,16], index: 3, kind: input, shape index: {}]   ;;  %s5219_s4 = inlined_call_operand.hbm [shape: f32[8,2,1552], index: 4, kind: input, shape index: {}]   ;;  %s5220_s5 = inlined_call_operand.vmem [shape: f32[8,512], index: 5, kind: output, shape index: {}]  }
   0x1   :  { %12 = vsyncpa [#allocation3 + $0x1], 0 }
   0x2   :  { %13 = vsyncpa [#allocation5], 0 }
   0x3   :  { %15 = vsyncpa [#allocation5 + $0x1], 0  ;;  %s4349_s18 = smov 0   ;;  %s4351_s19 = smov 0  }
   0x4   :  { %s4353_s20 = smov 0   ;;  %s4355_s21 = smov 0  }
   0x5 LB: > { %s4368_s22 = sadd.s32 4294967295, %s4306_s21   ;;  %s4371_s23 = sadd.s32 1, %s4306_s21   ;;  %s4306_s21 = sphi %s4355_s21, %s5231_s21   ;;  %s4302_s20 = sphi %s4353_s20, %s5230_s20   ;;  %s4298_s19 = sphi %s4351_s19, %s5229_s19   ;;  %s4294_s18 = sphi %s4349_s18, %s5228_s18  }
   0x6   : > { %s46_s24 = ssub.s32 %s4306_s21, %s4371_s23  ;;  %s49_s25 = sadd.s32 1, %s4302_s20 }
   0x7   : > { %p47_p0 = scmp.eq.s32.totalorder %s46_s24, 0  ;;  %p56_p1 = scmp.ne.s32.totalorder %s4302_s20, %s4298_s19 }
   0x8   : > { %p57_p2 = scmp.eq.s32.totalorder %s4306_s21, 0  ;;  %p62_p3 = scmp.ne.s32.totalorder %s4298_s19, %s4294_s18 }
   0x9   : > { %s4381_s26 = scalar_select %p47_p0, %s4302_s20, %s49_s25  }
   0xa   : > { %p58_p4 = por %p57_p2, %p56_p1  ;;  %p63_p5 = scmp.eq.s32.totalorder %s4368_s22, 0 }
   0xb   : > { %p4121_p6 = scmp.lt.s32.totalorder %s4306_s21, 4  ;;  %s4390_s28 = sand.u32 1, %s4302_s20  }
   0xc   : > { %p4385_p7 = por %p63_p5, %p62_p3  ;;  %s215_s30 = sand.u32 1, %s4306_s21  }
   0xd   : > { %p4392_p8 = pnand %p4121_p6, %p58_p4  ;;  %s3671_s6 = sshll.u32 %s4390_s28, 11 }
   0xe   : > { %s5222_s27 = scalar_select %p4385_p7, 1, 0 }
   0xf   : > { %s3929_s7 = sshll.u32 %s4306_s21, 15  ;;  %s219_s8 = scalar_lea.vmem [#allocation4], %s3671_s6 }
  0x10   : > { %s227_s9 = sshll.u32 %s219_s8, 4  ;;  %s4402_s12 = scalar_lea.hbm %s5217_s2, %s3929_s7  ;;  %s4404_s9 = int_to_ptr.vmem [resolvable:$true] %s227_s9 }
  0x11   : > { %s4406_s13 = scalar_lea.sflag [#allocation5], %s215_s30  ;;  %s4178_s14 = scalar_lea.hbm %s4402_s12, 32768 }
  0x12   : > { %p4179_p9 = scmp.ne.s32.totalorder %s4402_s12, %s4178_s14  ;;  %p4412_p10 = pneg %p4392_p8 }
  0x13   : > { %s4183_s18 = scalar_lea.hbm %s5217_s2, 131072  ;;  %p4184_p13 = scmp.lt.u32.totalorder %s4402_s12, %s5217_s2 }
  0x14   : > { %p4181_p11 = pnand %p4412_p10, %p4179_p9  ;;  %p4185_p0 = scmp.lt.u32.totalorder %s4183_s18, %s4178_s14 }
  0x15   : > { %p4187_p2 = scmp.lt.u32.totalorder %s4178_s14, %s4402_s12 }
  0x16   : > { %p4182_p12 = pneg %p4181_p11  ;;  %p4186_p1 = por %p4185_p0, %p4184_p13 }
  0x18   : > { %p4188_p3 = por %p4187_p2, %p4186_p1 }
  0x1a   : > { %p4189_p4 = pnand %p4188_p3, %p4182_p12 }
  0x1c   : > { %4192 = shalt.err (!%p4189_p4)
}
  0x1d   : > { %s4193_s30 = scalar_lea.vmem %s4404_s9, 32768  ;;  %s4308_s6 = smov [#allocation4]  }
  0x1e   : > { %p4194_p5 = scmp.ne.s32.totalorder %s4404_s9, %s4193_s30  ;;  %s4198_s7 = sshll.u32 %s4308_s6, 4  ;;  %s4199_s7 = int_to_ptr.vmem [resolvable:$false] %s4198_s7 }
  0x1f   : > { %s4200_s8 = scalar_lea.vmem %s4199_s7, 65536  ;;  %p4201_p11 = scmp.lt.s32.totalorder %s4404_s9, %s4199_s7 }
  0x20   : > { %p4196_p6 = pnand %p4194_p5, %p4412_p10  ;;  %p4202_p7 = scmp.lt.s32.totalorder %s4200_s8, %s4193_s30 }
  0x22   : > { %p4197_p9 = pneg %p4196_p6  ;;  %p4203_p13 = por %p4202_p7, %p4201_p11 }
  0x24   : > { %p4204_p0 = pnand %p4203_p13, %p4197_p9 }
  0x26   : > { %4207 = shalt.err (!%p4204_p0)
}
  0x27   : > { %s4309_s10 = smov 512   ;;  %s4310_s11 = smov 32  }
  0x28   : > { %4117 = dma.hbm_to_vmem [thread:$0]  (!%p4392_p8), %s4402_s12, 32768, %s4404_s9, %s4406_s13, %s4309_s10, %s4309_s10, %s4310_s11  }
  0x29   : > { %p3678_p12 = scmp.ge.s32.totalorder %s4306_s21, 1  ;;  %p267_p1 = scmp.lt.s32.totalorder %s4306_s21, 5 }
  0x2a   : > { %s4099_s14 = smul.u32 1152, %s4390_s28  ;;  %s194_s9 = scalar_lea.sflag [#allocation3], %s4390_s28 }
  0x2b   : > { %p4439_p7 = pnand %p3678_p12, %p267_p1  ;;  %s4100_s17 = smul.u32 18432, %s4306_s21 }
  0x2c   : > { %s197_s30 = scalar_lea.vmem [#allocation2], %s4099_s14  ;;  %s4213_s10 = scalar_lea.hbm %s5216_s1, 73728 }
  0x2d   : > { %s5225_s16 = scalar_select %p4439_p7, 1, 0 }
  0x2e   : > { %s4447_s25 = scalar_lea.hbm %s5216_s1, %s4100_s17  ;;  %s205_s6 = sshll.u32 %s197_s30, 4  ;;  %s4449_s6 = int_to_ptr.vmem [resolvable:$true] %s205_s6 }
  0x2f   : > { %s4208_s12 = scalar_lea.hbm %s4447_s25, 18432  ;;  %p4214_p5 = scmp.lt.u32.totalorder %s4447_s25, %s5216_s1 }
  0x30   : > { %p4209_p2 = scmp.ne.s32.totalorder %s4447_s25, %s4208_s12  ;;  %p4215_p6 = scmp.lt.u32.totalorder %s4213_s10, %s4208_s12 }
  0x31   : > { %p4217_p11 = scmp.lt.u32.totalorder %s4208_s12, %s4447_s25 }
  0x32   : > { %p4211_p3 = pnand %p4209_p2, %p4412_p10  ;;  %p4216_p9 = por %p4215_p6, %p4214_p5 }
  0x34   : > { %p4212_p4 = pneg %p4211_p3  ;;  %p4218_p13 = por %p4217_p11, %p4216_p9 }
  0x36   : > { %p4219_p0 = pnand %p4218_p13, %p4212_p4 }
  0x38   : > { %4222 = shalt.err (!%p4219_p0)
}
  0x39   : > { %s4223_s14 = scalar_lea.vmem %s4449_s6, 18432  ;;  %s4311_s18 = smov [#allocation2]  }
  0x3a   : > { %p4224_p12 = scmp.ne.s32.totalorder %s4449_s6, %s4223_s14  ;;  %s4228_s24 = sshll.u32 %s4311_s18, 4  ;;  %s4229_s24 = int_to_ptr.vmem [resolvable:$false] %s4228_s24 }
  0x3b   : > { %s4230_s30 = scalar_lea.vmem %s4229_s24, 36864  ;;  %p4231_p3 = scmp.lt.s32.totalorder %s4449_s6, %s4229_s24 }
  0x3c   : > { %p4226_p1 = pnand %p4224_p12, %p4412_p10  ;;  %p4232_p7 = scmp.lt.s32.totalorder %s4230_s30, %s4223_s14 }
  0x3e   : > { %p4227_p2 = pneg %p4226_p1  ;;  %p4233_p5 = por %p4232_p7, %p4231_p3 }
  0x40   : > { %p4234_p6 = pnand %p4233_p5, %p4227_p2 }
  0x42   : > { %4237 = shalt.err (!%p4234_p6)
}
  0x43   : > { %s4312_s12 = smov 1024   ;;  %s4313_s7 = smov 64  }
  0x44   : > { %4114 = dma.hbm_to_vmem [thread:$0]  (!%p4392_p8), %s4447_s25, 18432, %s4449_s6, %s194_s9, %s4312_s12, %s4312_s12, %s4313_s7  }
  0x45   : > { %s4101_s8 = smul.u32 52, %s4390_s28  ;;  %s4243_s25 = scalar_lea.hbm %s5219_s4, 3328 }
  0x46   : > { %s4102_s10 = smul.u32 832, %s4306_s21 }
  0x47   : > { %s251_s18 = scalar_lea.vmem [#allocation6], %s4101_s8 }
  0x48   : > { %s4480_s14 = scalar_lea.hbm %s5219_s4, %s4102_s10  ;;  %s259_s24 = sshll.u32 %s251_s18, 4  ;;  %s4482_s24 = int_to_ptr.vmem [resolvable:$true] %s259_s24 }
  0x49   : > { %s4238_s30 = scalar_lea.hbm %s4480_s14, 832  ;;  %p4244_p11 = scmp.lt.u32.totalorder %s4480_s14, %s5219_s4 }
  0x4a   : > { %p4239_p7 = scmp.ne.s32.totalorder %s4480_s14, %s4238_s30  ;;  %p4245_p13 = scmp.lt.u32.totalorder %s4243_s25, %s4238_s30 }
  0x4b   : > { %p4247_p12 = scmp.lt.u32.totalorder %s4238_s30, %s4480_s14 }
  0x4c   : > { %p4241_p4 = pnand %p4239_p7, %p4412_p10  ;;  %p4246_p0 = por %p4245_p13, %p4244_p11 }
  0x4e   : > { %p4242_p9 = pneg %p4241_p4  ;;  %p4248_p1 = por %p4247_p12, %p4246_p0 }
  0x50   : > { %p4249_p2 = pnand %p4248_p1, %p4242_p9 }
  0x52   : > { %4252 = shalt.err (!%p4249_p2)
}
  0x53   : > { %s4253_s12 = scalar_lea.vmem %s4482_s24, 832  ;;  %s4314_s7 = smov [#allocation6]  }
  0x54   : > { %p4254_p3 = scmp.ne.s32.totalorder %s4482_s24, %s4253_s12  ;;  %s4258_s8 = sshll.u32 %s4314_s7, 4  ;;  %s4259_s8 = int_to_ptr.vmem [resolvable:$false] %s4258_s8 }
  0x55   : > { %s4260_s10 = scalar_lea.vmem %s4259_s8, 1664  ;;  %p4261_p7 = scmp.lt.s32.totalorder %s4482_s24, %s4259_s8 }
  0x56   : > { %p4256_p5 = pnand %p4254_p3, %p4412_p10  ;;  %p4262_p4 = scmp.lt.s32.totalorder %s4260_s10, %s4253_s12 }
  0x58   : > { %p4257_p6 = pneg %p4256_p5  ;;  %p4263_p11 = por %p4262_p4, %p4261_p7 }
  0x5a   : > { %p4264_p13 = pnand %p4263_p11, %p4257_p6 }
  0x5c   : > { %4267 = shalt.err (!%p4264_p13)
}
  0x5d   : > { %s4315_s11 = smov 416   ;;  %s4316_s17 = smov 26  }
  0x5e   : > { %4120 = dma.hbm_to_vmem [thread:$0]  (!%p4392_p8), %s4480_s14, 832, %s4482_s24, %s4406_s13, %s4315_s11, %s4315_s11, %s4316_s17  }
  0x5f   : > { %p5226_p10 = scmp.ne.s32.totalorder %s5225_s16, 0 }
  0x60   : > { %s4509_s15 = sand.u32 (!%p5226_p10), 1, %s4298_s19   ;;  %p5227_p9 = scmp.ne.s32.totalorder (!%p5226_p10), %s5222_s27, 0 }
  0x61   : > { %271 = sbr.rel (%p5226_p10) target bundleno = 1900 (0x76c), region = 40  ;;  %s274_s30 = scalar_lea.sflag (!%p5226_p10), [#allocation3], %s4509_s15 }
  0x62   : > { %s4103_s18 = smul.u32 (!%p5226_p10), 1152, %s4509_s15 }
  0x64   : > { %s4513_s28 = scalar_lea.vmem (!%p5226_p10), [#allocation2], %s4103_s18 }
  0x68   : > { %4285 = dma.done.wait (%p5227_p9), %s274_s30, 18432  }
  0x69   : > { %4287 = vsyncadd (%p5227_p9), %s274_s30, 4294948864  ;;  %s282_s29 = sand.u32 1, %s4368_s22   ;;  %s3679_s13 = sshll.u32 %s4509_s15, 11 }
  0x6a   : > { %s283_s16 = scalar_lea.sflag [#allocation5], %s282_s29  ;;  %s4521_s14 = scalar_lea.vmem [#allocation4], %s3679_s13 }
  0x6b   : > { %4289 = dma.done.wait (%p5227_p9), %s283_s16, 33600  }
  0x6c   : > { %4291 = vsyncadd (%p5227_p9), %s283_s16, 4294933696  ;;  %v364_v0 = vld [vmem:[%s4513_s28 + $0x8] sm:$0xff]  ;;  %v363_v1 = vld [vmem:[%s4513_s28] sm:$0xff]  ;;  %vm589_vm0 = vcmask 261120   ;;  %s4104_s6 = smul.u32 52, %s4509_s15  ;;  %s3680_s12 = sshll.u32 %s4368_s22, 1 }
  0x6d   : > { %v436_v2 = vunpack.c.l.s8.bf16 %v364_v0  ;;  %v444_v3 = vunpack.c.h.s8.bf16 %v364_v0  ;;  %v435_v4 = vunpack.c.l.s8.bf16 %v363_v1  ;;  %v372_v5 = vld [vmem:[%s4513_s28 + $0x48] sm:$0xff]  ;;  %v443_v6 = vunpack.c.h.s8.bf16 %v363_v1  ;;  %v366_v7 = vld [vmem:[%s4513_s28 + $0x18] sm:$0xff]  ;;  %v371_v9 = vld [vmem:[%s4513_s28 + $0x40] sm:$0xff]  ;;  %p340_p8 = scmp.lt.s32.totalorder %s3680_s12, 7  ;;  %s4318_s18 = smov 16  }
  0x6e   : > { %v452_v8 = vunpack.c.l.s8.bf16 %v372_v5  ;;  %v365_v10 = vld [vmem:[%s4513_s28 + $0x10] sm:$0xff]  ;;  %v438_v11 = vunpack.c.l.s8.bf16 %v366_v7  ;;  %v446_v12 = vunpack.c.h.s8.bf16 %v366_v7  ;;  %v451_v13 = vunpack.c.l.s8.bf16 %v371_v9  ;;  %v374_v15 = vld [vmem:[%s4513_s28 + $0x58] sm:$0xff]  ;;  %v4537_v16 = vld [vmem:[%s5215_s0] sm:$0xff]  ;;  %s4680_s9 = scalar_lea.vmem [#allocation6], %s4104_s6  ;;  %p347_p0 = scmp.lt.s32.totalorder %s4368_s22, 3 }
  0x6f   : > { %593 = vmatprep.subr.bf16.mxu0 %v436_v2  ;;  %v437_v14 = vunpack.c.l.s8.bf16 %v365_v10  ;;  %v460_v17 = vunpack.c.h.s8.bf16 %v372_v5  ;;  %v380_v18 = vld [vmem:[%s4513_s28 + $0x88] sm:$0xff]  ;;  %v445_v19 = vunpack.c.h.s8.bf16 %v365_v10  ;;  %v454_v20 = vunpack.c.l.s8.bf16 %v374_v15  ;;  %v373_v21 = vld [vmem:[%s4513_s28 + $0x50] sm:$0xff]  ;;  %v379_v25 = vld [vmem:[%s4513_s28 + $0x80] sm:$0xff]  ;;  %s5233_s12 = smov (!%p340_p8, %s3680_s12), 7 }
  0x70   : > { %594 = vmatpush1.bf16.msra.mxu0 %v435_v4  ;;  %675 = vmatprep.subr.bf16.mxu1 %v438_v11  ;;  %v4543_v22 = vcombine.high %v4537_v16, %v4537_v16  ;;  %v459_v23 = vunpack.c.h.s8.bf16 %v371_v9  ;;  %v468_v24 = vunpack.c.l.s8.bf16 %v380_v18  ;;  %v453_v26 = vunpack.c.l.s8.bf16 %v373_v21  ;;  %v382_v29 = vld [vmem:[%s4513_s28 + $0x98] sm:$0xff]  ;;  %v388_v31 = vld [vmem:[%s4513_s28 + $0xc8] sm:$0xff]  ;;  %v381_v34 = vld [vmem:[%s4513_s28 + $0x90] sm:$0xff]  ;;  %s3930_s7 = sshll.u32 %s5233_s12, 7  ;;  %s5235_s22 = smov (!%p347_p0, %s4368_s22), 3 }
  0x71   : > { %595 = vmatprep.subr.bf16.mxu0 %v444_v3  ;;  %676 = vmatpush1.bf16.msra.mxu1 %v437_v14  ;;  %v462_v27 = vunpack.c.h.s8.bf16 %v374_v15  ;;  %v467_v28 = vunpack.c.l.s8.bf16 %v379_v25  ;;  %v476_v30 = vunpack.c.h.s8.bf16 %v380_v18  ;;  %v461_v32 = vunpack.c.h.s8.bf16 %v373_v21  ;;  %v387_v37 = vld [vmem:[%s4513_s28 + $0xc0] sm:$0xff]  ;;  %v390_v41 = vld [vmem:[%s4513_s28 + $0xd8] sm:$0xff]  ;;  %v396_v43 = vld [vmem:[%s4513_s28 + $0x108] sm:$0xff]  ;;  %s4852_s11 = scalar_lea.vmem %s5218_s3, %s3930_s7  ;;  %s3683_s30 = sshll.u32 %s5235_s22, 3 }
  0x72   : > { %677 = vmatprep.subr.bf16.mxu1 %v446_v12  ;;  %625 = vmatprep.mubr.bf16.mxu0 %v4543_v22  ;;  %v470_v33 = vunpack.c.l.s8.bf16 %v382_v29  ;;  %v475_v35 = vunpack.c.h.s8.bf16 %v379_v25  ;;  %v484_v36 = vunpack.c.l.s8.bf16 %v388_v31  ;;  %v469_v38 = vunpack.c.l.s8.bf16 %v381_v34  ;;  %v389_v46 = vld [vmem:[%s4513_s28 + $0xd0] sm:$0xff]  ;;  %v395_v49 = vld [vmem:[%s4513_s28 + $0x100] sm:$0xff]  ;;  %v398_v53 = vld [vmem:[%s4513_s28 + $0x118] sm:$0xff]  ;;  %s350_s13 = scalar_lea.vmem %s5220_s5, %s3683_s30 }
  0x73   : > { %707 = vmatprep.mubr.bf16.mxu1 %v4543_v22  ;;  %v478_v39 = vunpack.c.h.s8.bf16 %v382_v29  ;;  %v483_v40 = vunpack.c.l.s8.bf16 %v387_v37  ;;  %v492_v42 = vunpack.c.h.s8.bf16 %v388_v31  ;;  %v477_v44 = vunpack.c.h.s8.bf16 %v381_v34  ;;  %v404_v55 = vld [vmem:[%s4513_s28 + $0x148] sm:$0xff]  ;;  %v397_v58 = vld [vmem:[%s4513_s28 + $0x110] sm:$0xff]  ;;  %v403_v61 = vld [vmem:[%s4513_s28 + $0x140] sm:$0xff] }
  0x74   : > { %596 = vmatpush1.bf16.msra.mxu0 %v443_v6  ;;  %v486_v45 = vunpack.c.l.s8.bf16 %v390_v41  ;;  %v491_v47 = vunpack.c.h.s8.bf16 %v387_v37  ;;  %v500_v48 = vunpack.c.l.s8.bf16 %v396_v43  ;;  %v485_v50 = vunpack.c.l.s8.bf16 %v389_v46  ;;  %v406_v1 = vld [vmem:[%s4513_s28 + $0x158] sm:$0xff]  ;;  %v412_v3 = vld [vmem:[%s4513_s28 + $0x188] sm:$0xff]  ;;  %v405_v6 = vld [vmem:[%s4513_s28 + $0x150] sm:$0xff] }
  0x75   : > { %597 = vmatprep.subr.bf16.mxu0 %v452_v8  ;;  %678 = vmatpush1.bf16.msra.mxu1 %v445_v19  ;;  %v494_v51 = vunpack.c.h.s8.bf16 %v390_v41  ;;  %v499_v52 = vunpack.c.l.s8.bf16 %v395_v49  ;;  %v508_v54 = vunpack.c.h.s8.bf16 %v396_v43  ;;  %v493_v56 = vunpack.c.h.s8.bf16 %v389_v46  ;;  %v411_v9 = vld [vmem:[%s4513_s28 + $0x180] sm:$0xff]  ;;  %v420_v15 = vld [vmem:[%s4513_s28 + $0x1c8] sm:$0xff]  ;;  %v413_v19 = vld [vmem:[%s4513_s28 + $0x190] sm:$0xff] }
  0x76   : > { %679 = vmatprep.subr.bf16.mxu1 %v454_v20  ;;  %v502_v57 = vunpack.c.l.s8.bf16 %v398_v53  ;;  %v507_v59 = vunpack.c.h.s8.bf16 %v395_v49  ;;  %v516_v60 = vunpack.c.l.s8.bf16 %v404_v55  ;;  %v501_v62 = vunpack.c.l.s8.bf16 %v397_v58  ;;  %v428_v29 = vld [vmem:[%s4513_s28 + $0x208] sm:$0xff] }
  0x77   : > { %v510_v63 = vunpack.c.h.s8.bf16 %v398_v53  ;;  %v515_v0 = vunpack.c.l.s8.bf16 %v403_v61  ;;  %v524_v2 = vunpack.c.h.s8.bf16 %v404_v55  ;;  %v509_v4 = vunpack.c.h.s8.bf16 %v397_v58  ;;  %v368_v43 = vld [vmem:[%s4513_s28 + $0x28] sm:$0xff]  ;;  %v369_v58 = vld [vmem:[%s4513_s28 + $0x30] sm:$0xff] }
  0x78   : > { %598 = vmatpush1.bf16.msra.mxu0 %v451_v13  ;;  %v518_v5 = vunpack.c.l.s8.bf16 %v406_v1  ;;  %v523_v7 = vunpack.c.h.s8.bf16 %v403_v61  ;;  %v532_v8 = vunpack.c.l.s8.bf16 %v412_v3  ;;  %v517_v10 = vunpack.c.l.s8.bf16 %v405_v6  ;;  %v414_v13 = vld [vmem:[%s4513_s28 + $0x198] sm:$0xff]  ;;  %v4588_v53 = vld [vmem:[%s5215_s0 + $0x8] ss:$0 sps:$4 sm:$0xff]   ;;  %v375_v61 = vld [vmem:[%s4513_s28 + $0x60] sm:$0xff] }
  0x79   : > { %599 = vmatprep.subr.bf16.mxu0 %v460_v17  ;;  %680 = vmatpush1.bf16.msra.mxu1 %v453_v26  ;;  %v526_v11 = vunpack.c.h.s8.bf16 %v406_v1  ;;  %v531_v12 = vunpack.c.l.s8.bf16 %v411_v9  ;;  %v540_v14 = vunpack.c.h.s8.bf16 %v412_v3  ;;  %v525_v17 = vunpack.c.h.s8.bf16 %v405_v6  ;;  %v378_v1 = vld [vmem:[%s4513_s28 + $0x78] sm:$0xff]  ;;  %v384_v3 = vld [vmem:[%s4513_s28 + $0xa8] sm:$0xff]  ;;  %v377_v6 = vld [vmem:[%s4513_s28 + $0x70] sm:$0xff] }
  0x7a   : > { %681 = vmatprep.subr.bf16.mxu1 %v462_v27  ;;  %v534_v18 = vunpack.c.l.s8.bf16 %v414_v13  ;;  %v539_v20 = vunpack.c.h.s8.bf16 %v411_v9  ;;  %v548_v21 = vunpack.c.l.s8.bf16 %v420_v15  ;;  %v542_v25 = vunpack.c.h.s8.bf16 %v414_v13  ;;  %v422_v27 = vld [vmem:[%s4513_s28 + $0x1d8] sm:$0xff]  ;;  %v383_v9 = vld [vmem:[%s4513_s28 + $0xa0] sm:$0xff] }
  0x7b   : > { %v550_v31 = vunpack.c.l.s8.bf16 %v422_v27  ;;  %v564_v34 = vunpack.c.l.s8.bf16 %v428_v29  ;;  %v4574_v37 = vcombine.low %v4537_v16, %v4537_v16  ;;  %v572_v41 = vunpack.c.h.s8.bf16 %v428_v29  ;;  %v386_v13 = vld [vmem:[%s4513_s28 + $0xb8] sm:$0xff]  ;;  %v400_v29 = vld [vmem:[%s4513_s28 + $0x128] sm:$0xff] }
  0x7c   : > { %600 = vmatpush1.bf16.msra.mxu0 %v459_v23  ;;  %v419_v23 = vld [vmem:[%s4513_s28 + $0x1c0] sm:$0xff]  ;;  %v4317_v46 = vmov 0   ;;  %vm3538_vm1 = vcmask 130048  }
  0x7d   : > { %601 = vmatprep.subr.bf16.mxu0 %v468_v24  ;;  %682 = vmatpush1.bf16.msra.mxu1 %v461_v32  ;;  %v533_v24 = vunpack.c.l.s8.bf16 %v413_v19  ;;  %v547_v26 = vunpack.c.l.s8.bf16 %v419_v23  ;;  %v421_v32 = vld [vmem:[%s4513_s28 + $0x1d0] sm:$0xff] }
  0x7e   : > { %683 = vmatprep.subr.bf16.mxu1 %v470_v33  ;;  %v555_v33 = vunpack.c.h.s8.bf16 %v419_v23  ;;  %v391_v23 = vld [vmem:[%s4513_s28 + $0xe0] sm:$0xff] }
  0x80   : > { %602 = vmatpush1.bf16.msra.mxu0 %v467_v28  ;;  %v556_v28 = vunpack.c.h.s8.bf16 %v420_v15  ;;  %v392_v15 = vld [vmem:[%s4513_s28 + $0xe8] sm:$0xff] }
  0x81   : > { %603 = vmatprep.subr.bf16.mxu0 %v476_v30  ;;  %684 = vmatpush1.bf16.msra.mxu1 %v469_v38  ;;  %v541_v30 = vunpack.c.h.s8.bf16 %v413_v19  ;;  %v558_v38 = vunpack.c.h.s8.bf16 %v422_v27  ;;  %v385_v19 = vld [vmem:[%s4513_s28 + $0xb0] sm:$0xff]  ;;  %v394_v27 = vld [vmem:[%s4513_s28 + $0xf8] sm:$0xff] }
  0x82   : > { %685 = vmatprep.subr.bf16.mxu1 %v478_v39 }
  0x84   : > { %604 = vmatpush1.bf16.msra.mxu0 %v475_v35  ;;  %v427_v35 = vld [vmem:[%s4513_s28 + $0x200] sm:$0xff] }
  0x85   : > { %605 = vmatprep.subr.bf16.mxu0 %v484_v36  ;;  %686 = vmatpush1.bf16.msra.mxu1 %v477_v44  ;;  %v549_v36 = vunpack.c.l.s8.bf16 %v421_v32  ;;  %v563_v39 = vunpack.c.l.s8.bf16 %v427_v35  ;;  %v571_v16 = vunpack.c.h.s8.bf16 %v427_v35  ;;  %v399_v35 = vld [vmem:[%s4513_s28 + $0x120] sm:$0xff] }
  0x86   : > { %687 = vmatprep.subr.bf16.mxu1 %v486_v45  ;;  %v429_v45 = vld [vmem:[%s4513_s28 + $0x210] sm:$0xff] }
  0x88   : > { %606 = vmatpush1.bf16.msra.mxu0 %v483_v40  ;;  %v430_v40 = vld [vmem:[%s4513_s28 + $0x218] sm:$0xff] }
  0x89   : > { %607 = vmatprep.subr.bf16.mxu0 %v492_v42  ;;  %688 = vmatpush1.bf16.msra.mxu1 %v485_v50  ;;  %v557_v42 = vunpack.c.h.s8.bf16 %v421_v32  ;;  %v566_v44 = vunpack.c.l.s8.bf16 %v430_v40  ;;  %v574_v49 = vunpack.c.h.s8.bf16 %v430_v40  ;;  %v370_v50 = vld [vmem:[%s4513_s28 + $0x38] sm:$0xff]  ;;  %v393_v32 = vld [vmem:[%s4513_s28 + $0xf0] sm:$0xff] }
  0x8a   : > { %689 = vmatprep.subr.bf16.mxu1 %v494_v51  ;;  %v367_v51 = vld [vmem:[%s4513_s28 + $0x20] sm:$0xff]  ;;  %v402_v40 = vld [vmem:[%s4513_s28 + $0x138] sm:$0xff] }
  0x8b   : > { %v439_v55 = vunpack.c.l.s8.bf16 %v367_v51 }
  0x8c   : > { %608 = vmatpush1.bf16.msra.mxu0 %v491_v47  ;;  %v440_v47 = vunpack.c.l.s8.bf16 %v368_v43 }
  0x8d   : > { %609 = vmatprep.subr.bf16.mxu0 %v500_v48  ;;  %690 = vmatpush1.bf16.msra.mxu1 %v493_v56  ;;  %v565_v48 = vunpack.c.l.s8.bf16 %v429_v45  ;;  %v448_v56 = vunpack.c.h.s8.bf16 %v368_v43  ;;  %v497_v43 = vunpack.c.h.s8.bf16 %v393_v32 }
  0x8e   : > { %691 = vmatprep.subr.bf16.mxu1 %v502_v57  ;;  %v376_v57 = vld [vmem:[%s4513_s28 + $0x68] sm:$0xff] }
  0x90   : > { %610 = vmatpush1.bf16.msra.mxu0 %v499_v52  ;;  %v573_v52 = vunpack.c.h.s8.bf16 %v429_v45  ;;  %v401_v45 = vld [vmem:[%s4513_s28 + $0x130] sm:$0xff] }
  0x91   : > { %611 = vmatprep.subr.bf16.mxu0 %v508_v54  ;;  %692 = vmatpush1.bf16.msra.mxu1 %v501_v62  ;;  %v442_v54 = vunpack.c.l.s8.bf16 %v370_v50  ;;  %v441_v62 = vunpack.c.l.s8.bf16 %v369_v58 }
  0x92   : > { %693 = vmatprep.subr.bf16.mxu1 %v510_v63  ;;  %v450_v63 = vunpack.c.h.s8.bf16 %v370_v50  ;;  %v514_v50 = vunpack.c.h.s8.bf16 %v402_v40 }
  0x94   : > { %612 = vmatpush1.bf16.msra.mxu0 %v507_v59  ;;  %v447_v59 = vunpack.c.h.s8.bf16 %v367_v51 }
  0x95   : > { %613 = vmatprep.subr.bf16.mxu0 %v516_v60  ;;  %694 = vmatpush1.bf16.msra.mxu1 %v509_v4  ;;  %v456_v60 = vunpack.c.l.s8.bf16 %v376_v57  ;;  %v449_v4 = vunpack.c.h.s8.bf16 %v369_v58  ;;  %v409_v58 = vld [vmem:[%s4513_s28 + $0x170] sm:$0xff] }
  0x96   : > { %695 = vmatprep.subr.bf16.mxu1 %v518_v5  ;;  %v458_v5 = vunpack.c.l.s8.bf16 %v378_v1 }
  0x98   : > { %614 = vmatpush1.bf16.msra.mxu0 %v515_v0  ;;  %v455_v0 = vunpack.c.l.s8.bf16 %v375_v61 }
  0x99   : > { %615 = vmatprep.subr.bf16.mxu0 %v524_v2  ;;  %696 = vmatpush1.bf16.msra.mxu1 %v517_v10  ;;  %v464_v2 = vunpack.c.h.s8.bf16 %v376_v57  ;;  %v457_v10 = vunpack.c.l.s8.bf16 %v377_v6 }
  0x9a   : > { %697 = vmatprep.subr.bf16.mxu1 %v526_v11  ;;  %v466_v11 = vunpack.c.h.s8.bf16 %v378_v1  ;;  %v418_v1 = vld [vmem:[%s4513_s28 + $0x1b8] sm:$0xff] }
  0x9c   : > { %616 = vmatpush1.bf16.msra.mxu0 %v523_v7  ;;  %v463_v7 = vunpack.c.h.s8.bf16 %v375_v61  ;;  %v415_v61 = vld [vmem:[%s4513_s28 + $0x1a0] sm:$0xff] }
  0x9d   : > { %617 = vmatprep.subr.bf16.mxu0 %v532_v8  ;;  %698 = vmatpush1.bf16.msra.mxu1 %v525_v17  ;;  %v472_v8 = vunpack.c.l.s8.bf16 %v384_v3  ;;  %v465_v17 = vunpack.c.h.s8.bf16 %v377_v6  ;;  %v417_v6 = vld [vmem:[%s4513_s28 + $0x1b0] sm:$0xff] }
  0x9e   : > { %699 = vmatprep.subr.bf16.mxu1 %v534_v18  ;;  %v474_v18 = vunpack.c.l.s8.bf16 %v386_v13 }
  0xa0   : > { %618 = vmatpush1.bf16.msra.mxu0 %v531_v12  ;;  %v471_v12 = vunpack.c.l.s8.bf16 %v383_v9 }
  0xa1   : > { %619 = vmatprep.subr.bf16.mxu0 %v540_v14  ;;  %700 = vmatpush1.bf16.msra.mxu1 %v533_v24  ;;  %v480_v14 = vunpack.c.h.s8.bf16 %v384_v3  ;;  %v473_v24 = vunpack.c.l.s8.bf16 %v385_v19  ;;  %v424_v3 = vld [vmem:[%s4513_s28 + $0x1e8] sm:$0xff] }
  0xa2   : > { %701 = vmatprep.subr.bf16.mxu1 %v542_v25  ;;  %v482_v25 = vunpack.c.h.s8.bf16 %v386_v13  ;;  %v426_v13 = vld [vmem:[%s4513_s28 + $0x1f8] sm:$0xff] }
  0xa4   : > { %620 = vmatpush1.bf16.msra.mxu0 %v539_v20  ;;  %v479_v20 = vunpack.c.h.s8.bf16 %v383_v9  ;;  %v423_v9 = vld [vmem:[%s4513_s28 + $0x1e0] sm:$0xff] }
  0xa5   : > { %621 = vmatprep.subr.bf16.mxu0 %v548_v21  ;;  %702 = vmatpush1.bf16.msra.mxu1 %v541_v30  ;;  %v488_v21 = vunpack.c.l.s8.bf16 %v392_v15  ;;  %v481_v30 = vunpack.c.h.s8.bf16 %v385_v19  ;;  %v425_v19 = vld [vmem:[%s4513_s28 + $0x1f0] sm:$0xff] }
  0xa6   : > { %703 = vmatprep.subr.bf16.mxu1 %v550_v31  ;;  %v490_v31 = vunpack.c.l.s8.bf16 %v394_v27 }
  0xa8   : > { %622 = vmatpush1.bf16.msra.mxu0 %v547_v26  ;;  %v487_v26 = vunpack.c.l.s8.bf16 %v391_v23 }
  0xa9   : > { %623 = vmatprep.subr.bf16.mxu0 %v556_v28  ;;  %704 = vmatpush1.bf16.msra.mxu1 %v549_v36  ;;  %v496_v28 = vunpack.c.h.s8.bf16 %v392_v15  ;;  %v489_v36 = vunpack.c.l.s8.bf16 %v393_v32  ;;  %v432_v15 = vld [vmem:[%s4513_s28 + $0x228] sm:$0xff]  ;;  %v433_v32 = vld [vmem:[%s4513_s28 + $0x230] sm:$0xff] }
  0xaa   : > { %705 = vmatprep.subr.bf16.mxu1 %v558_v38  ;;  %v498_v38 = vunpack.c.h.s8.bf16 %v394_v27  ;;  %v434_v27 = vld [vmem:[%s4513_s28 + $0x238] sm:$0xff] }
  0xac   : > { %624 = vmatpush1.bf16.msra.mxu0 %v555_v33  ;;  %v495_v33 = vunpack.c.h.s8.bf16 %v391_v23  ;;  %v431_v23 = vld [vmem:[%s4513_s28 + $0x220] sm:$0xff] }
  0xad   : > { %634 = vmatprep.subr.bf16.mxu0 %v564_v34  ;;  %706 = vmatpush1.bf16.msra.mxu1 %v557_v42  ;;  %v504_v34 = vunpack.c.l.s8.bf16 %v400_v29  ;;  %v408_v42 = vld [vmem:[%s4513_s28 + $0x168] sm:$0xff] }
  0xae   : > { %716 = vmatprep.subr.bf16.mxu1 %v566_v44  ;;  %v506_v44 = vunpack.c.l.s8.bf16 %v402_v40  ;;  %v577_v40 = vunpack.c.h.s8.bf16 %v433_v32 }
  0xaf   : > { %626 = vmatmul.mubr.bf16.vlgmr.msra.gmra.mrb[0].mxu0 %v4574_v37 }
  0xb0   : > { %635 = vmatpush1.bf16.msra.mxu0 %v563_v39  ;;  %666 = vmatprep.mubr.bf16.mxu0 %v4317_v46  ;;  %v503_v39 = vunpack.c.l.s8.bf16 %v399_v35 }
  0xb1   : > { %636 = vmatprep.subr.bf16.mxu0 %v572_v41  ;;  %708 = vmatmul.mubr.bf16.vlgmr.msra.gmra.mrb[0].mxu1 %v4574_v37  ;;  %v512_v41 = vunpack.c.h.s8.bf16 %v400_v29  ;;  %v561_v29 = vunpack.c.h.s8.bf16 %v425_v19 }
  0xb2   : > { %717 = vmatpush1.bf16.msra.mxu1 %v565_v48  ;;  %748 = vmatprep.mubr.bf16.mxu1 %v4317_v46  ;;  %v407_v48 = vld [vmem:[%s4513_s28 + $0x160] sm:$0xff] }
  0xb3   : > { %718 = vmatprep.subr.bf16.mxu1 %v574_v49  ;;  %v505_v49 = vunpack.c.l.s8.bf16 %v401_v45  ;;  %v519_v51 = vunpack.c.l.s8.bf16 %v407_v48 }
  0xb4   : > { %637 = vmatpush1.bf16.msra.mxu0 %v571_v16  ;;  %v511_v16 = vunpack.c.h.s8.bf16 %v399_v35  ;;  %v569_v35 = vunpack.c.l.s8.bf16 %v433_v32 }
  0xb5   : > { %757 = vmatprep.subr.bf16.mxu0 %v440_v47  ;;  %v520_v47 = vunpack.c.l.s8.bf16 %v408_v42 }
  0xb6   : > { %719 = vmatpush1.bf16.msra.mxu1 %v573_v52  ;;  %v410_v52 = vld [vmem:[%s4513_s28 + $0x178] sm:$0xff] }
  0xb7   : > { %839 = vmatprep.subr.bf16.mxu1 %v442_v54  ;;  %v528_v54 = vunpack.c.h.s8.bf16 %v408_v42  ;;  %v522_v57 = vunpack.c.l.s8.bf16 %v410_v52 }
  0xbb   : > { %3690 = vmatmul.mubr.msk.bf16.vlgmr.msra.gmra.mrb[0].mxu0 %vm589_vm0, %v4588_v53 }
  0xbc   : > { %758 = vmatpush1.bf16.msra.mxu0 %v439_v55  ;;  %789 = vmatprep.mubr.bf16.mxu0 %v4543_v22  ;;  %v416_v55 = vld [vmem:[%s4513_s28 + $0x1a8] sm:$0xff] }
  0xbd   : > { %759 = vmatprep.subr.bf16.mxu0 %v448_v56  ;;  %3691 = vmatmul.mubr.msk.bf16.vlgmr.msra.gmra.mrb[0].mxu1 %vm589_vm0, %v4588_v53  ;;  %v513_v56 = vunpack.c.h.s8.bf16 %v401_v45  ;;  %v1037_v45 = vld [vmem:[%s4521_s14 + $0x10] sm:$0xff] }
  0xbe   : > { %840 = vmatpush1.bf16.msra.mxu1 %v441_v62  ;;  %871 = vmatprep.mubr.bf16.mxu1 %v4543_v22  ;;  %v521_v62 = vunpack.c.l.s8.bf16 %v409_v58 }
  0xbf   : > { %841 = vmatprep.subr.bf16.mxu1 %v450_v63  ;;  %v530_v63 = vunpack.c.h.s8.bf16 %v410_v52 }
  0xc0   : > { %760 = vmatpush1.bf16.msra.mxu0 %v447_v59  ;;  %v527_v59 = vunpack.c.h.s8.bf16 %v407_v48  ;;  %v1039_v48 = vld [vmem:[%s4521_s14 + $0x20] sm:$0xff] }
  0xc1   : > { %761 = vmatprep.subr.bf16.mxu0 %v456_v60  ;;  %v536_v60 = vunpack.c.l.s8.bf16 %v416_v55  ;;  %v1171_v52 = vunpack.c.l.s8.bf16 %v1039_v48 }
  0xc2   : > { %842 = vmatpush1.bf16.msra.mxu1 %v449_v4  ;;  %v529_v4 = vunpack.c.h.s8.bf16 %v409_v58  ;;  %v1041_v58 = vld [vmem:[%s4521_s14 + $0x30] sm:$0xff] }
  0xc3   : > { %843 = vmatprep.subr.bf16.mxu1 %v458_v5  ;;  %v538_v5 = vunpack.c.l.s8.bf16 %v418_v1 }
  0xc4   : > { %762 = vmatpush1.bf16.msra.mxu0 %v455_v0  ;;  %v535_v0 = vunpack.c.l.s8.bf16 %v415_v61 }
  0xc5   : > { %763 = vmatprep.subr.bf16.mxu0 %v464_v2  ;;  %v544_v2 = vunpack.c.h.s8.bf16 %v416_v55  ;;  %v1169_v55 = vunpack.c.h.s8.bf16 %v1037_v45 }
  0xc6   : > { %844 = vmatpush1.bf16.msra.mxu1 %v457_v10  ;;  %v537_v10 = vunpack.c.l.s8.bf16 %v417_v6 }
  0xc7   : > { %845 = vmatprep.subr.bf16.mxu1 %v466_v11  ;;  %v546_v11 = vunpack.c.h.s8.bf16 %v418_v1 }
  0xc8   : > { %764 = vmatpush1.bf16.msra.mxu0 %v463_v7  ;;  %v543_v7 = vunpack.c.h.s8.bf16 %v415_v61  ;;  %v1043_v61 = vld [vmem:[%s4521_s14 + $0x40] sm:$0xff] }
  0xc9   : > { %765 = vmatprep.subr.bf16.mxu0 %v472_v8  ;;  %v552_v8 = vunpack.c.l.s8.bf16 %v424_v3 }
  0xca   : > { %846 = vmatpush1.bf16.msra.mxu1 %v465_v17  ;;  %v545_v17 = vunpack.c.h.s8.bf16 %v417_v6  ;;  %v1183_v6 = vunpack.c.h.s8.bf16 %v1043_v61 }
  0xcb   : > { %847 = vmatprep.subr.bf16.mxu1 %v474_v18  ;;  %v554_v18 = vunpack.c.l.s8.bf16 %v426_v13 }
  0xcc   : > { %766 = vmatpush1.bf16.msra.mxu0 %v471_v12  ;;  %v551_v12 = vunpack.c.l.s8.bf16 %v423_v9 }
  0xcd   : > { %767 = vmatprep.subr.bf16.mxu0 %v480_v14  ;;  %v560_v14 = vunpack.c.h.s8.bf16 %v424_v3  ;;  %v1048_v3 = vld [vmem:[%s4521_s14 + $0x68] sm:$0xff] }
  0xce   : > { %848 = vmatpush1.bf16.msra.mxu1 %v473_v24  ;;  %v553_v24 = vunpack.c.l.s8.bf16 %v425_v19 }
  0xcf   : > { %849 = vmatprep.subr.bf16.mxu1 %v482_v25  ;;  %v562_v25 = vunpack.c.h.s8.bf16 %v426_v13  ;;  %v1192_v13 = vunpack.c.h.s8.bf16 %v1048_v3 }
  0xd0   : > { %768 = vmatpush1.bf16.msra.mxu0 %v479_v20  ;;  %v559_v20 = vunpack.c.h.s8.bf16 %v423_v9 }
  0xd1   : > { %769 = vmatprep.subr.bf16.mxu0 %v488_v21  ;;  %v568_v21 = vunpack.c.l.s8.bf16 %v432_v15 }
  0xd2   : > { %850 = vmatpush1.bf16.msra.mxu1 %v481_v30  ;;  %v1036_v30 = vld [vmem:[%s4521_s14 + $0x8] sm:$0xff] }
  0xd3   : > { %851 = vmatprep.subr.bf16.mxu1 %v490_v31  ;;  %v570_v31 = vunpack.c.l.s8.bf16 %v434_v27 }
  0xd4   : > { %770 = vmatpush1.bf16.msra.mxu0 %v487_v26  ;;  %v567_v26 = vunpack.c.l.s8.bf16 %v431_v23 }
  0xd5   : > { %771 = vmatprep.subr.bf16.mxu0 %v496_v28  ;;  %v576_v28 = vunpack.c.h.s8.bf16 %v432_v15  ;;  %v1052_v15 = vld [vmem:[%s4521_s14 + $0x88] sm:$0xff] }
  0xd6   : > { %852 = vmatpush1.bf16.msra.mxu1 %v489_v36  ;;  %v578_v36 = vunpack.c.h.s8.bf16 %v434_v27  ;;  %v1200_v27 = vunpack.c.h.s8.bf16 %v1052_v15 }
  0xd7   : > { %853 = vmatprep.subr.bf16.mxu1 %v498_v38  ;;  %v1038_v38 = vld [vmem:[%s4521_s14 + $0x18] sm:$0xff] }
  0xd8   : > { %772 = vmatpush1.bf16.msra.mxu0 %v495_v33  ;;  %v575_v33 = vunpack.c.h.s8.bf16 %v431_v23 }
  0xd9   : > { %773 = vmatprep.subr.bf16.mxu0 %v504_v34  ;;  %v1164_v34 = vunpack.c.l.s8.bf16 %v1036_v30 }
  0xda   : > { %854 = vmatpush1.bf16.msra.mxu1 %v497_v43  ;;  %v1168_v43 = vunpack.c.h.s8.bf16 %v1036_v30 }
  0xdb   : > { %855 = vmatprep.subr.bf16.mxu1 %v506_v44  ;;  %v1040_v44 = vld [vmem:[%s4521_s14 + $0x28] sm:$0xff] }
  0xdc   : > { %774 = vmatpush1.bf16.msra.mxu0 %v503_v39  ;;  %v1035_v39 = vld [vmem:[%s4521_s14] sm:$0xff] }
  0xdd   : > { %775 = vmatprep.subr.bf16.mxu0 %v512_v41  ;;  %v1166_v41 = vunpack.c.l.s8.bf16 %v1038_v38  ;;  %v1163_v42 = vunpack.c.l.s8.bf16 %v1035_v39 }
  0xde   : > { %856 = vmatpush1.bf16.msra.mxu1 %v505_v49  ;;  %v1165_v49 = vunpack.c.l.s8.bf16 %v1037_v45 }
  0xdf   : > { %857 = vmatprep.subr.bf16.mxu1 %v514_v50  ;;  %v1170_v50 = vunpack.c.h.s8.bf16 %v1038_v38  ;;  %v1058_v38 = vld [vmem:[%s4521_s14 + $0xb8] sm:$0xff] }
  0xe0   : > { %776 = vmatpush1.bf16.msra.mxu0 %v511_v16  ;;  %v1167_v16 = vunpack.c.h.s8.bf16 %v1035_v39 }
  0xe1   : > { %777 = vmatprep.subr.bf16.mxu0 %v520_v47  ;;  %v1172_v47 = vunpack.c.l.s8.bf16 %v1040_v44 }
  0xe2   : > { %858 = vmatpush1.bf16.msra.mxu1 %v513_v56  ;;  %v1044_v56 = vld [vmem:[%s4521_s14 + $0x48] sm:$0xff] }
  0xe3   : > { %859 = vmatprep.subr.bf16.mxu1 %v522_v57  ;;  %v1184_v1 = vunpack.c.h.s8.bf16 %v1044_v56 }
  0xe4   : > { %778 = vmatpush1.bf16.msra.mxu0 %v519_v51  ;;  %v1042_v51 = vld [vmem:[%s4521_s14 + $0x38] sm:$0xff] }
  0xe5   : > { %779 = vmatprep.subr.bf16.mxu0 %v528_v54  ;;  %v1176_v54 = vunpack.c.h.s8.bf16 %v1040_v44  ;;  %v1174_v57 = vunpack.c.l.s8.bf16 %v1042_v51  ;;  %v1057_v44 = vld [vmem:[%s4521_s14 + $0xb0] sm:$0xff] }
  0xe6   : > { %860 = vmatpush1.bf16.msra.mxu1 %v521_v62  ;;  %v1173_v62 = vunpack.c.l.s8.bf16 %v1041_v58 }
  0xe7   : > { %861 = vmatprep.subr.bf16.mxu1 %v530_v63  ;;  %v1046_v63 = vld [vmem:[%s4521_s14 + $0x58] sm:$0xff] }
  0xe8   : > { %780 = vmatpush1.bf16.msra.mxu0 %v527_v59  ;;  %v1175_v59 = vunpack.c.h.s8.bf16 %v1039_v48  ;;  %v1205_v48 = vunpack.c.l.s8.bf16 %v1057_v44 }
  0xe9   : > { %781 = vmatprep.subr.bf16.mxu0 %v536_v60  ;;  %v1180_v60 = vunpack.c.l.s8.bf16 %v1044_v56 }
  0xea   : > { %862 = vmatpush1.bf16.msra.mxu1 %v529_v4  ;;  %v1182_v4 = vunpack.c.l.s8.bf16 %v1046_v63 }
  0xeb   : > { %863 = vmatprep.subr.bf16.mxu1 %v538_v5  ;;  %v1045_v5 = vld [vmem:[%s4521_s14 + $0x50] sm:$0xff] }
  0xec   : > { %782 = vmatpush1.bf16.msra.mxu0 %v535_v0  ;;  %v1179_v0 = vunpack.c.l.s8.bf16 %v1043_v61  ;;  %v1181_v9 = vunpack.c.l.s8.bf16 %v1045_v5 }
  0xed   : > { %783 = vmatprep.subr.bf16.mxu0 %v544_v2  ;;  %v1177_v2 = vunpack.c.h.s8.bf16 %v1041_v58 }
  0xee   : > { %864 = vmatpush1.bf16.msra.mxu1 %v537_v10  ;;  %v1186_v10 = vunpack.c.h.s8.bf16 %v1046_v63 }
  0xef   : > { %865 = vmatprep.subr.bf16.mxu1 %v546_v11  ;;  %v1050_v11 = vld [vmem:[%s4521_s14 + $0x78] sm:$0xff] }
  0xf0   : > { %784 = vmatpush1.bf16.msra.mxu0 %v543_v7  ;;  %v1188_v7 = vunpack.c.l.s8.bf16 %v1048_v3 }
  0xf1   : > { %785 = vmatprep.subr.bf16.mxu0 %v552_v8  ;;  %v1047_v8 = vld [vmem:[%s4521_s14 + $0x60] sm:$0xff] }
  0xf2   : > { %866 = vmatpush1.bf16.msra.mxu1 %v545_v17  ;;  %v1190_v17 = vunpack.c.l.s8.bf16 %v1050_v11  ;;  %v1191_v19 = vunpack.c.h.s8.bf16 %v1047_v8 }
  0xf3   : > { %867 = vmatprep.subr.bf16.mxu1 %v554_v18  ;;  %v1049_v18 = vld [vmem:[%s4521_s14 + $0x70] sm:$0xff] }
  0xf4   : > { %786 = vmatpush1.bf16.msra.mxu0 %v551_v12  ;;  %v1187_v12 = vunpack.c.l.s8.bf16 %v1047_v8  ;;  %v1189_v23 = vunpack.c.l.s8.bf16 %v1049_v18 }
  0xf5   : > { %787 = vmatprep.subr.bf16.mxu0 %v560_v14  ;;  %v1185_v14 = vunpack.c.h.s8.bf16 %v1045_v5 }
  0xf6   : > { %868 = vmatpush1.bf16.msra.mxu1 %v553_v24  ;;  %v1194_v24 = vunpack.c.h.s8.bf16 %v1050_v11 }
  0xf7   : > { %869 = vmatprep.subr.bf16.mxu1 %v562_v25  ;;  %v1054_v25 = vld [vmem:[%s4521_s14 + $0x98] sm:$0xff] }
  0xf8   : > { %788 = vmatpush1.bf16.msra.mxu0 %v559_v20  ;;  %v1196_v20 = vunpack.c.l.s8.bf16 %v1052_v15  ;;  %v1198_v30 = vunpack.c.l.s8.bf16 %v1054_v25  ;;  %v4683_v15 = vld [vmem:[%s4680_s9] ss:$2 sm:$0xff] }
  0xf9   : > { %798 = vmatprep.subr.bf16.mxu0 %v568_v21  ;;  %v1051_v21 = vld [vmem:[%s4521_s14 + $0x80] sm:$0xff] }
  0xfa   : > { %870 = vmatpush1.bf16.msra.mxu1 %v561_v29  ;;  %v1056_v29 = vld [vmem:[%s4521_s14 + $0xa8] sm:$0xff]  ;;  %v1199_v32 = vunpack.c.h.s8.bf16 %v1051_v21 }
  0xfb   : > { %790 = vmatmul.mubr.bf16.vlgmr.msra.gmra.mrb[4].mxu0 %v4574_v37  ;;  %880 = vmatprep.subr.bf16.mxu1 %v570_v31  ;;  %v1053_v31 = vld [vmem:[%s4521_s14 + $0x90] sm:$0xff] }
  0xfc   : > { %799 = vmatpush1.bf16.msra.mxu0 %v567_v26  ;;  %830 = vmatprep.mubr.bf16.mxu0 %v4317_v46  ;;  %v1195_v26 = vunpack.c.l.s8.bf16 %v1051_v21 }
  0xfd   : > { %800 = vmatprep.subr.bf16.mxu0 %v576_v28  ;;  %872 = vmatmul.mubr.bf16.vlgmr.msra.gmra.mrb[4].mxu1 %v4574_v37  ;;  %v1193_v28 = vunpack.c.h.s8.bf16 %v1049_v18  ;;  %v4689_v18 = vld [vmem:[%s4680_s9 + $0x1] ss:$2 sm:$0xff] }
  0xfe   : > { %881 = vmatpush1.bf16.msra.mxu1 %v569_v35  ;;  %912 = vmatprep.mubr.bf16.mxu1 %v4317_v46  ;;  %v1197_v35 = vunpack.c.l.s8.bf16 %v1053_v31 }
  0xff   : > { %882 = vmatprep.subr.bf16.mxu1 %v578_v36  ;;  %v1202_v36 = vunpack.c.h.s8.bf16 %v1054_v25 }
 0x100   : > { %801 = vmatpush1.bf16.msra.mxu0 %v575_v33  ;;  %v1204_v33 = vunpack.c.l.s8.bf16 %v1056_v29 }
 0x101   : > { %1419 = vmatprep.subr.bf16.mxu0 %v1164_v34  ;;  %v1055_v34 = vld [vmem:[%s4521_s14 + $0xa0] sm:$0xff] }
 0x102   : > { %883 = vmatpush1.bf16.msra.mxu1 %v577_v40  ;;  %v1203_v39 = vunpack.c.l.s8.bf16 %v1055_v34  ;;  %v1208_v40 = vunpack.c.h.s8.bf16 %v1056_v29  ;;  %v1207_v45 = vunpack.c.h.s8.bf16 %v1055_v34 }
 0x103   : > { %1583 = vmatprep.subr.bf16.mxu1 %v1166_v41  ;;  %v1201_v41 = vunpack.c.h.s8.bf16 %v1053_v31 }
 0x107   : > { %3692 = vmatmul.mubr.msk.bf16.vlgmr.msra.gmra.mrb[4].mxu0 %vm589_vm0, %v4588_v53 }
 0x108   : > { %1420 = vmatpush1.bf16.msra.mxu0 %v1163_v42  ;;  %v1060_v42 = vld [vmem:[%s4521_s14 + $0xc8] sm:$0xff] }
 0x109   : > { %1421 = vmatprep.subr.bf16.mxu0 %v1168_v43  ;;  %3693 = vmatmul.mubr.msk.bf16.vlgmr.msra.gmra.mrb[4].mxu1 %vm589_vm0, %v4588_v53  ;;  %v1178_v53 = vunpack.c.h.s8.bf16 %v1042_v51  ;;  %v1206_v43 = vunpack.c.l.s8.bf16 %v1058_v38 }
 0x10a   : > { %1584 = vmatpush1.bf16.msra.mxu1 %v1165_v49  ;;  %v1210_v49 = vunpack.c.h.s8.bf16 %v1058_v38 }
 0x10b   : > { %1585 = vmatprep.subr.bf16.mxu1 %v1170_v50  ;;  %v1062_v50 = vld [vmem:[%s4521_s14 + $0xd8] sm:$0xff] }
 0x10c   : > { %1422 = vmatpush1.bf16.msra.mxu0 %v1167_v16  ;;  %v1212_v16 = vunpack.c.l.s8.bf16 %v1060_v42  ;;  %v1214_v56 = vunpack.c.l.s8.bf16 %v1062_v50 }
 0x10d   : > { %1423 = vmatprep.subr.bf16.mxu0 %v1172_v47  ;;  %v1059_v47 = vld [vmem:[%s4521_s14 + $0xc0] sm:$0xff] }
 0x10e   : > { %1586 = vmatpush1.bf16.msra.mxu1 %v1169_v55  ;;  %v1211_v51 = vunpack.c.l.s8.bf16 %v1059_v47  ;;  %v1064_v55 = vld [vmem:[%s4521_s14 + $0xe8] sm:$0xff]  ;;  %v1215_v58 = vunpack.c.h.s8.bf16 %v1059_v47 }
 0x10f   : > { %1587 = vmatprep.subr.bf16.mxu1 %v1174_v57  ;;  %v1061_v57 = vld [vmem:[%s4521_s14 + $0xd0] sm:$0xff] }
 0x110   : > { %1424 = vmatpush1.bf16.msra.mxu0 %v1171_v52  ;;  %v1216_v52 = vunpack.c.h.s8.bf16 %v1060_v42  ;;  %v1213_v61 = vunpack.c.l.s8.bf16 %v1061_v57 }
 0x111   : > { %1425 = vmatprep.subr.bf16.mxu0 %v1176_v54  ;;  %v1209_v54 = vunpack.c.h.s8.bf16 %v1057_v44 }
 0x112   : > { %1588 = vmatpush1.bf16.msra.mxu1 %v1173_v62  ;;  %v1218_v62 = vunpack.c.h.s8.bf16 %v1062_v50 }
 0x113   : > { %1589 = vmatprep.subr.bf16.mxu1 %v1178_v53  ;;  %v1066_v53 = vld [vmem:[%s4521_s14 + $0xf8] sm:$0xff] }
 0x114   : > { %1426 = vmatpush1.bf16.msra.mxu0 %v1175_v59  ;;  %v1220_v59 = vunpack.c.l.s8.bf16 %v1064_v55  ;;  %v1222_v3 = vunpack.c.l.s8.bf16 %v1066_v53  ;;  %v1226_v8 = vunpack.c.h.s8.bf16 %v1066_v53 }
 0x115   : > { %1427 = vmatprep.subr.bf16.mxu0 %v1180_v60  ;;  %v1063_v60 = vld [vmem:[%s4521_s14 + $0xe0] sm:$0xff] }
 0x116   : > { %1590 = vmatpush1.bf16.msra.mxu1 %v1177_v2  ;;  %v1219_v63 = vunpack.c.l.s8.bf16 %v1063_v60  ;;  %v4669_v2 = vld [vmem:[%s4521_s14 + $0x108] sm:$0xff]  ;;  %v1223_v5 = vunpack.c.h.s8.bf16 %v1063_v60  ;;  %v1071_v60 = vld [vmem:[%s4521_s14 + $0x120] sm:$0xff] }
 0x117   : > { %1591 = vmatprep.subr.bf16.mxu1 %v1182_v4  ;;  %v1065_v4 = vld [vmem:[%s4521_s14 + $0xf0] sm:$0xff]  ;;  %v1235_v53 = vunpack.c.l.s8.bf16 %v1071_v60 }
 0x118   : > { %1428 = vmatpush1.bf16.msra.mxu0 %v1179_v0  ;;  %v1224_v0 = vunpack.c.h.s8.bf16 %v1064_v55 }
 0x119   : > { %1429 = vmatprep.subr.bf16.mxu0 %v1184_v1  ;;  %v1217_v1 = vunpack.c.h.s8.bf16 %v1061_v57 }
 0x11a   : > { %1592 = vmatpush1.bf16.msra.mxu1 %v1181_v9  ;;  %v1070_v9 = vld [vmem:[%s4521_s14 + $0x118] sm:$0xff] }
 0x11b   : > { %1593 = vmatprep.subr.bf16.mxu1 %v1186_v10  ;;  %v1225_v10 = vunpack.c.h.s8.bf16 %v1065_v4  ;;  %v1230_v11 = vunpack.c.l.s8.bf16 %v1070_v9 }
 0x11c   : > { %1430 = vmatpush1.bf16.msra.mxu0 %v1183_v6  ;;  %v1228_v6 = vunpack.c.l.s8.bf16 %v4669_v2 }
 0x11d   : > { %1431 = vmatprep.subr.bf16.mxu0 %v1188_v7  ;;  %v1221_v7 = vunpack.c.l.s8.bf16 %v1065_v4  ;;  %v1239_v4 = vunpack.c.h.s8.bf16 %v1071_v60 }
 0x11e   : > { %1594 = vmatpush1.bf16.msra.mxu1 %v1185_v14 }
 0x11f   : > { %1595 = vmatprep.subr.bf16.mxu1 %v1190_v17 }
 0x120   : > { %1432 = vmatpush1.bf16.msra.mxu0 %v1187_v12  ;;  %v922_v12 = vlaneseq }
 0x121   : > { %1433 = vmatprep.subr.bf16.mxu0 %v1192_v13 }
 0x122   : > { %1596 = vmatpush1.bf16.msra.mxu1 %v1189_v23  ;;  %v4675_v13 = vshrl.u32 %v922_v12, 7 }
 0x123   : > { %1597 = vmatprep.subr.bf16.mxu1 %v1194_v24 }
 0x124   : > { %1434 = vmatpush1.bf16.msra.mxu0 %v1191_v19  ;;  %v4678_v14 = vsub.s32 0, %v4675_v13  ;;  %v4686_v17 = vsub.s32 1, %v4675_v13  ;;  %v4700_v25 = vsub.s32 3, %v4675_v13 }
 0x125   : > { %1435 = vmatprep.subr.bf16.mxu0 %v1196_v20 }
 0x126   : > { %1598 = vmatpush1.bf16.msra.mxu1 %v1193_v28  ;;  %v925_v19 = vrot.slane %v4683_v15, %v4678_v14  ;;  %v929_v20 = vrot.slane %v4683_v15, %v4686_v17  ;;  %v974_v21 = vrot.slane %v4689_v18, %v4678_v14  ;;  %v978_v24 = vrot.slane %v4689_v18, %v4686_v17 }
 0x127   : > { %1599 = vmatprep.subr.bf16.mxu1 %v1198_v30 }
 0x128   : > { %1436 = vmatpush1.bf16.msra.mxu0 %v1195_v26 }
 0x129   : > { %1437 = vmatprep.subr.bf16.mxu0 %v1200_v27 }
 0x12a   : > { %1600 = vmatpush1.bf16.msra.mxu1 %v1197_v35  ;;  %v1067_v35 = vld [vmem:[%s4521_s14 + $0x100] sm:$0xff] }
 0x12b   : > { %1601 = vmatprep.subr.bf16.mxu1 %v1202_v36  ;;  %v1069_v36 = vld [vmem:[%s4521_s14 + $0x110] sm:$0xff]  ;;  %v1231_v55 = vunpack.c.h.s8.bf16 %v1067_v35 }
 0x12c   : > { %1438 = vmatpush1.bf16.msra.mxu0 %v1199_v32  ;;  %v1229_v44 = vunpack.c.l.s8.bf16 %v1069_v36 }
 0x12d   : > { %1439 = vmatprep.subr.bf16.mxu0 %v1204_v33  ;;  %v937_v33 = vrot.slane %v4683_v15, %v4700_v25 }
 0x12e   : > { %1602 = vmatpush1.bf16.msra.mxu1 %v1201_v41 }
 0x12f   : > { %1603 = vmatprep.subr.bf16.mxu1 %v1206_v43  ;;  %v1227_v43 = vunpack.c.l.s8.bf16 %v1067_v35  ;;  %v1086_v35 = vld [vmem:[%s4521_s14 + $0x198] sm:$0xff] }
 0x130   : > { %1440 = vmatpush1.bf16.msra.mxu0 %v1203_v39 }
 0x131   : > { %1441 = vmatprep.subr.bf16.mxu0 %v1208_v40  ;;  %v986_v40 = vrot.slane %v4689_v18, %v4700_v25 }
 0x132   : > { %1604 = vmatpush1.bf16.msra.mxu1 %v1205_v48  ;;  %v1232_v48 = vunpack.c.h.s8.bf16 %v4669_v2  ;;  %v1076_v2 = vld [vmem:[%s4521_s14 + $0x148] sm:$0xff] }
 0x133   : > { %1605 = vmatprep.subr.bf16.mxu1 %v1210_v49  ;;  %v1234_v49 = vunpack.c.h.s8.bf16 %v1070_v9  ;;  %v1077_v9 = vld [vmem:[%s4521_s14 + $0x150] sm:$0xff]  ;;  %v1248_v12 = vunpack.c.h.s8.bf16 %v1076_v2 }
 0x134   : > { %1442 = vmatpush1.bf16.msra.mxu0 %v1207_v45 }
 0x135   : > { %1443 = vmatprep.subr.bf16.mxu0 %v1212_v16 }
 0x136   : > { %1606 = vmatpush1.bf16.msra.mxu1 %v1209_v54 }
 0x137   : > { %1607 = vmatprep.subr.bf16.mxu1 %v1214_v56  ;;  %v1233_v56 = vunpack.c.h.s8.bf16 %v1069_v36 }
 0x138   : > { %1444 = vmatpush1.bf16.msra.mxu0 %v1211_v51  ;;  %v1072_v51 = vld [vmem:[%s4521_s14 + $0x128] sm:$0xff] }
 0x139   : > { %1445 = vmatprep.subr.bf16.mxu0 %v1216_v52  ;;  %v1074_v52 = vld [vmem:[%s4521_s14 + $0x138] sm:$0xff] }
 0x13a   : > { %1608 = vmatpush1.bf16.msra.mxu1 %v1213_v61  ;;  %v1073_v61 = vld [vmem:[%s4521_s14 + $0x130] sm:$0xff] }
 0x13b   : > { %1609 = vmatprep.subr.bf16.mxu1 %v1218_v62 }
 0x13c   : > { %1446 = vmatpush1.bf16.msra.mxu0 %v1215_v58  ;;  %v1236_v58 = vunpack.c.l.s8.bf16 %v1072_v51 }
 0x13d   : > { %1447 = vmatprep.subr.bf16.mxu0 %v1220_v59  ;;  %v1238_v59 = vunpack.c.l.s8.bf16 %v1074_v52 }
 0x13e   : > { %1610 = vmatpush1.bf16.msra.mxu1 %v1217_v1  ;;  %v1242_v1 = vunpack.c.h.s8.bf16 %v1074_v52 }
 0x13f   : > { %1611 = vmatprep.subr.bf16.mxu1 %v1222_v3  ;;  %v1078_v3 = vld [vmem:[%s4521_s14 + $0x158] sm:$0xff] }
 0x140   : > { %1448 = vmatpush1.bf16.msra.mxu0 %v1219_v63  ;;  %v1237_v63 = vunpack.c.l.s8.bf16 %v1073_v61 }
 0x141   : > { %1449 = vmatprep.subr.bf16.mxu0 %v1224_v0  ;;  %v1240_v0 = vunpack.c.h.s8.bf16 %v1072_v51 }
 0x142   : > { %1612 = vmatpush1.bf16.msra.mxu1 %v1221_v7  ;;  %v1246_v7 = vunpack.c.l.s8.bf16 %v1078_v3 }
 0x143   : > { %1613 = vmatprep.subr.bf16.mxu1 %v1226_v8  ;;  %v1075_v8 = vld [vmem:[%s4521_s14 + $0x140] sm:$0xff] }
 0x144   : > { %1450 = vmatpush1.bf16.msra.mxu0 %v1223_v5  ;;  %v1241_v5 = vunpack.c.h.s8.bf16 %v1073_v61  ;;  %v1092_v61 = vld [vmem:[%s4521_s14 + $0x1c8] sm:$0xff] }
 0x145   : > { %1460 = vmatprep.subr.bf16.mxu0 %v1228_v6  ;;  %v1244_v6 = vunpack.c.l.s8.bf16 %v1076_v2 }
 0x146   : > { %1614 = vmatpush1.bf16.msra.mxu1 %v1225_v10  ;;  %v1243_v10 = vunpack.c.l.s8.bf16 %v1075_v8 }
 0x147   : > { %1624 = vmatprep.subr.bf16.mxu1 %v1230_v11  ;;  %v1245_v11 = vunpack.c.l.s8.bf16 %v1077_v9 }
 0x18e   : > { %v668_v23 = vpop.f32.mrb[0].mxu0 }
 0x18f   : > { %v962_v26 = vmul.f32 %v925_v19, %v668_v23  ;;  %v670_v27 = vpop.f32.mrb[1].mxu0  ;;  %v1250_v19 = vunpack.c.h.s8.bf16 %v1078_v3  ;;  %v1247_v23 = vunpack.c.h.s8.bf16 %v1075_v8  ;;  %v1091_v3 = vld [vmem:[%s4521_s14 + $0x1c0] sm:$0xff]  ;;  %v1280_v8 = vunpack.c.h.s8.bf16 %v1092_v61 }
 0x190   : > { %v963_v28 = vmul.f32 %v929_v20, %v670_v27  ;;  %v672_v29 = vpop.f32.mrb[2].mxu0  ;;  %v4706_v39 = vpop.f32.mrb[0].mxu1  ;;  %v1080_v20 = vld [vmem:[%s4521_s14 + $0x168] sm:$0xff] }
 0x191   : > { %v1011_v30 = vadd.f32 %v974_v21, %v962_v26  ;;  %v673_v31 = vpop.f32.mrb[3].mxu0  ;;  %v752_v41 = vpop.f32.mrb[1].mxu1  ;;  %v1082_v21 = vld [vmem:[%s4521_s14 + $0x178] sm:$0xff]  ;;  %v1252_v26 = vunpack.c.l.s8.bf16 %v1080_v20  ;;  %v1081_v29 = vld [vmem:[%s4521_s14 + $0x170] sm:$0xff] }
 0x192   : > { %v1012_v32 = vadd.f32 %v978_v24, %v963_v28  ;;  %v965_v45 = vmul.f32 %v937_v33, %v752_v41  ;;  %v754_v16 = vpop.f32.mrb[2].mxu1  ;;  %v1249_v24 = vunpack.c.h.s8.bf16 %v1077_v9  ;;  %v1254_v27 = vunpack.c.l.s8.bf16 %v1082_v21  ;;  %v1079_v28 = vld [vmem:[%s4521_s14 + $0x160] sm:$0xff] }
 0x193   : > { %v1019_v34 = vmax.f32 %v1011_v30, 0.0  ;;  %v755_v50 = vpop.f32.mrb[3].mxu1  ;;  %v1251_v30 = vunpack.c.l.s8.bf16 %v1079_v28  ;;  %v1253_v31 = vunpack.c.l.s8.bf16 %v1081_v29  ;;  %v1258_v33 = vunpack.c.h.s8.bf16 %v1082_v21 }
 0x194   : > { %v1020_v38 = vmax.f32 %v1012_v32, 0.0  ;;  %v1014_v54 = vadd.f32 %v986_v40, %v965_v45  ;;  %v1256_v32 = vunpack.c.h.s8.bf16 %v1080_v20  ;;  %v1255_v36 = vunpack.c.h.s8.bf16 %v1079_v28 }
 0x195   : > { %v1027_v47 = vpack.c.bf16 %v1019_v34, %v1019_v34  ;;  %v1084_v34 = vld [vmem:[%s4521_s14 + $0x188] sm:$0xff]  ;;  %v1262_v41 = vunpack.c.l.s8.bf16 %v1086_v35 }
 0x196   : > { %v1028_v42 = vpack.c.bf16 %v1020_v38, %v1020_v38  ;;  %v1022_v57 = vmax.f32 %v1014_v54, 0.0  ;;  %v1257_v38 = vunpack.c.h.s8.bf16 %v1081_v29  ;;  %v1260_v40 = vunpack.c.l.s8.bf16 %v1084_v34 }
 0x197   : > { %v1264_v16 = vunpack.c.h.s8.bf16 %v1084_v34 }
 0x198   : > { %1451 = vmatprep.mubr.bf16.mxu0 %v1028_v42  ;;  %1615 = vmatprep.mubr.bf16.mxu1 %v1028_v42  ;;  %v1030_v62 = vpack.c.bf16 %v1022_v57, %v1022_v57  ;;  %v1083_v42 = vld [vmem:[%s4521_s14 + $0x180] sm:$0xff] }
 0x199   : > { %1452 = vmatmul.mubr.bf16.vlgmr.msra.gmra.mrb[8].mxu0 %v1027_v47  ;;  %1616 = vmatmul.mubr.bf16.vlgmr.msra.gmra.mrb[8].mxu1 %v1027_v47  ;;  %v1266_v47 = vunpack.c.h.s8.bf16 %v1086_v35  ;;  %v1263_v50 = vunpack.c.h.s8.bf16 %v1083_v42 }
 0x19a   : > { %1461 = vmatpush1.bf16.msra.mxu0 %v1227_v43  ;;  %1625 = vmatpush1.bf16.msra.mxu1 %v1229_v44  ;;  %v1085_v43 = vld [vmem:[%s4521_s14 + $0x190] sm:$0xff]  ;;  %v1259_v44 = vunpack.c.l.s8.bf16 %v1083_v42 }
 0x19b   : > { %1462 = vmatprep.subr.bf16.mxu0 %v1232_v48  ;;  %1626 = vmatprep.subr.bf16.mxu1 %v1234_v49  ;;  %v1261_v45 = vunpack.c.l.s8.bf16 %v1085_v43  ;;  %v1088_v48 = vld [vmem:[%s4521_s14 + $0x1a8] sm:$0xff]  ;;  %v1090_v49 = vld [vmem:[%s4521_s14 + $0x1b8] sm:$0xff]  ;;  %v1265_v51 = vunpack.c.h.s8.bf16 %v1085_v43  ;;  %v1101_v42 = vld [vmem:[%s4521_s14 + $0x210] sm:$0xff]  ;;  %v4752_v43 = vsub.s32 5, %v4675_v13 }
 0x19c   : > { %1492 = vmatprep.mubr.bf16.mxu0 %v1030_v62  ;;  %1656 = vmatprep.mubr.bf16.mxu1 %v1030_v62  ;;  %v1268_v52 = vunpack.c.l.s8.bf16 %v1088_v48  ;;  %v1270_v54 = vunpack.c.l.s8.bf16 %v1090_v49  ;;  %v1274_v60 = vunpack.c.h.s8.bf16 %v1090_v49  ;;  %v1094_v62 = vld [vmem:[%s4521_s14 + $0x1d8] sm:$0xff]  ;;  %v1104_v49 = vld [vmem:[%s4521_s14 + $0x228] sm:$0xff] }
 0x19d   : > { %v1278_v2 = vunpack.c.l.s8.bf16 %v1094_v62  ;;  %v1282_v9 = vunpack.c.h.s8.bf16 %v1094_v62 }
 0x19e   : > { %1463 = vmatpush1.bf16.msra.mxu0 %v1231_v55  ;;  %1627 = vmatpush1.bf16.msra.mxu1 %v1233_v56  ;;  %v1087_v55 = vld [vmem:[%s4521_s14 + $0x1a0] sm:$0xff]  ;;  %v1089_v56 = vld [vmem:[%s4521_s14 + $0x1b0] sm:$0xff] }
 0x19f   : > { %1464 = vmatprep.subr.bf16.mxu0 %v1236_v58  ;;  %1628 = vmatprep.subr.bf16.mxu1 %v1238_v59  ;;  %v1267_v57 = vunpack.c.l.s8.bf16 %v1087_v55  ;;  %v1269_v58 = vunpack.c.l.s8.bf16 %v1089_v56  ;;  %v1272_v59 = vunpack.c.h.s8.bf16 %v1088_v48 }
 0x1a2   : > { %1465 = vmatpush1.bf16.msra.mxu0 %v1235_v53  ;;  %1629 = vmatpush1.bf16.msra.mxu1 %v1237_v63  ;;  %v1271_v53 = vunpack.c.h.s8.bf16 %v1087_v55  ;;  %v1273_v63 = vunpack.c.h.s8.bf16 %v1089_v56  ;;  %v994_v56 = vrot.slane %v4689_v18, %v4752_v43 }
 0x1a3   : > { %1466 = vmatprep.subr.bf16.mxu0 %v1240_v0  ;;  %1630 = vmatprep.subr.bf16.mxu1 %v1242_v1  ;;  %v4734_v0 = vsub.s32 2, %v4675_v13  ;;  %v1276_v1 = vunpack.c.l.s8.bf16 %v1092_v61 }
 0x1a5   : > { %v982_v21 = vrot.slane %v4689_v18, %v4734_v0 }
 0x1a6   : > { %1467 = vmatpush1.bf16.msra.mxu0 %v1239_v4  ;;  %1631 = vmatpush1.bf16.msra.mxu1 %v1241_v5  ;;  %v1093_v4 = vld [vmem:[%s4521_s14 + $0x1d0] sm:$0xff]  ;;  %v1275_v5 = vunpack.c.l.s8.bf16 %v1091_v3 }
 0x1a7   : > { %1468 = vmatprep.subr.bf16.mxu0 %v1244_v6  ;;  %1632 = vmatprep.subr.bf16.mxu1 %v1246_v7  ;;  %v1277_v6 = vunpack.c.l.s8.bf16 %v1093_v4  ;;  %v933_v7 = vrot.slane %v4683_v15, %v4734_v0 }
 0x1a9   : > { %v964_v20 = vmul.f32 %v933_v7, %v4706_v39  ;;  %v1110_v7 = vld [vmem:[%s4521_s14 + $0x258] sm:$0xff] }
 0x1aa   : > { %1469 = vmatpush1.bf16.msra.mxu0 %v1243_v10  ;;  %1633 = vmatpush1.bf16.msra.mxu1 %v1245_v11  ;;  %v1096_v10 = vld [vmem:[%s4521_s14 + $0x1e8] sm:$0xff]  ;;  %v1098_v11 = vld [vmem:[%s4521_s14 + $0x1f8] sm:$0xff] }
 0x1ab   : > { %1470 = vmatprep.subr.bf16.mxu0 %v1248_v12  ;;  %1634 = vmatprep.subr.bf16.mxu1 %v1250_v19  ;;  %v1279_v12 = vunpack.c.h.s8.bf16 %v1091_v3  ;;  %v1281_v19 = vunpack.c.h.s8.bf16 %v1093_v4  ;;  %v1288_v39 = vunpack.c.h.s8.bf16 %v1096_v10  ;;  %v1304_v4 = vunpack.c.h.s8.bf16 %v1104_v49 }
 0x1ae   : > { %1471 = vmatpush1.bf16.msra.mxu0 %v1247_v23  ;;  %1635 = vmatpush1.bf16.msra.mxu1 %v1249_v24  ;;  %v1284_v23 = vunpack.c.l.s8.bf16 %v1096_v10  ;;  %v1286_v24 = vunpack.c.l.s8.bf16 %v1098_v11 }
 0x1af   : > { %1472 = vmatprep.subr.bf16.mxu0 %v1252_v26  ;;  %1636 = vmatprep.subr.bf16.mxu1 %v1254_v27  ;;  %v1095_v26 = vld [vmem:[%s4521_s14 + $0x1e0] sm:$0xff]  ;;  %v1097_v27 = vld [vmem:[%s4521_s14 + $0x1f0] sm:$0xff] }
 0x1b0   : > { %v1283_v28 = vunpack.c.l.s8.bf16 %v1095_v26  ;;  %v1285_v29 = vunpack.c.l.s8.bf16 %v1097_v27  ;;  %v1287_v34 = vunpack.c.h.s8.bf16 %v1095_v26  ;;  %v1289_v35 = vunpack.c.h.s8.bf16 %v1097_v27  ;;  %v1109_v26 = vld [vmem:[%s4521_s14 + $0x250] sm:$0xff] }
 0x1b2   : > { %1473 = vmatpush1.bf16.msra.mxu0 %v1251_v30  ;;  %1637 = vmatpush1.bf16.msra.mxu1 %v1253_v31  ;;  %v1013_v30 = vadd.f32 %v982_v21, %v964_v20  ;;  %v1290_v31 = vunpack.c.h.s8.bf16 %v1098_v11 }
 0x1b3   : > { %1474 = vmatprep.subr.bf16.mxu0 %v1256_v32  ;;  %1638 = vmatprep.subr.bf16.mxu1 %v1258_v33  ;;  %v1100_v32 = vld [vmem:[%s4521_s14 + $0x208] sm:$0xff]  ;;  %v1102_v33 = vld [vmem:[%s4521_s14 + $0x218] sm:$0xff] }
 0x1b4   : > { %v1298_v48 = vunpack.c.h.s8.bf16 %v1102_v33 }
 0x1b6   : > { %1475 = vmatpush1.bf16.msra.mxu0 %v1255_v36  ;;  %1639 = vmatpush1.bf16.msra.mxu1 %v1257_v38  ;;  %v1021_v36 = vmax.f32 %v1013_v30, 0.0  ;;  %v1292_v38 = vunpack.c.l.s8.bf16 %v1100_v32 }
 0x1b7   : > { %1476 = vmatprep.subr.bf16.mxu0 %v1260_v40  ;;  %1640 = vmatprep.subr.bf16.mxu1 %v1262_v41  ;;  %v1294_v40 = vunpack.c.l.s8.bf16 %v1102_v33  ;;  %v1099_v41 = vld [vmem:[%s4521_s14 + $0x200] sm:$0xff] }
 0x1ba   : > { %1477 = vmatpush1.bf16.msra.mxu0 %v1259_v44  ;;  %1641 = vmatpush1.bf16.msra.mxu1 %v1261_v45  ;;  %v1291_v44 = vunpack.c.l.s8.bf16 %v1099_v41  ;;  %v1293_v45 = vunpack.c.l.s8.bf16 %v1101_v42 }
 0x1bb   : > { %1478 = vmatprep.subr.bf16.mxu0 %v1264_v16  ;;  %1642 = vmatprep.subr.bf16.mxu1 %v1266_v47  ;;  %v1029_v16 = vpack.c.bf16 %v1021_v36, %v1021_v36  ;;  %v1296_v47 = vunpack.c.h.s8.bf16 %v1100_v32  ;;  %v1114_v32 = vld [vmem:[%s4521_s14 + $0x278] sm:$0xff] }
 0x1bc   : > { %v1318_v36 = vunpack.c.l.s8.bf16 %v1114_v32 }
 0x1be   : > { %1479 = vmatpush1.bf16.msra.mxu0 %v1263_v50  ;;  %1643 = vmatpush1.bf16.msra.mxu1 %v1265_v51  ;;  %v1106_v50 = vld [vmem:[%s4521_s14 + $0x238] sm:$0xff]  ;;  %v945_v51 = vrot.slane %v4683_v15, %v4752_v43 }
 0x1bf   : > { %1480 = vmatprep.subr.bf16.mxu0 %v1268_v52  ;;  %1644 = vmatprep.subr.bf16.mxu1 %v1270_v54  ;;  %v1295_v52 = vunpack.c.h.s8.bf16 %v1099_v41  ;;  %v1297_v54 = vunpack.c.h.s8.bf16 %v1101_v42 }
 0x1c2   : > { %1481 = vmatpush1.bf16.msra.mxu0 %v1267_v57  ;;  %1645 = vmatpush1.bf16.msra.mxu1 %v1269_v58  ;;  %v1300_v57 = vunpack.c.l.s8.bf16 %v1104_v49  ;;  %v1302_v58 = vunpack.c.l.s8.bf16 %v1106_v50 }
 0x1c3   : > { %1482 = vmatprep.subr.bf16.mxu0 %v1272_v59  ;;  %1646 = vmatprep.subr.bf16.mxu1 %v1274_v60  ;;  %v1103_v59 = vld [vmem:[%s4521_s14 + $0x220] sm:$0xff]  ;;  %v1105_v60 = vld [vmem:[%s4521_s14 + $0x230] sm:$0xff] }
 0x1c4   : > { %v1303_v11 = vunpack.c.h.s8.bf16 %v1103_v59 }
 0x1c6   : > { %1483 = vmatpush1.bf16.msra.mxu0 %v1271_v53  ;;  %1647 = vmatpush1.bf16.msra.mxu1 %v1273_v63 }
 0x1c7   : > { %1484 = vmatprep.subr.bf16.mxu0 %v1276_v1  ;;  %1648 = vmatprep.subr.bf16.mxu1 %v1278_v2  ;;  %v1299_v1 = vunpack.c.l.s8.bf16 %v1103_v59  ;;  %v1301_v2 = vunpack.c.l.s8.bf16 %v1105_v60 }
 0x1ca   : > { %1485 = vmatpush1.bf16.msra.mxu0 %v1275_v5  ;;  %1649 = vmatpush1.bf16.msra.mxu1 %v1277_v6  ;;  %v1306_v5 = vunpack.c.h.s8.bf16 %v1106_v50  ;;  %v1108_v6 = vld [vmem:[%s4521_s14 + $0x248] sm:$0xff] }
 0x1cb   : > { %1486 = vmatprep.subr.bf16.mxu0 %v1280_v8  ;;  %1650 = vmatprep.subr.bf16.mxu1 %v1282_v9  ;;  %v1308_v21 = vunpack.c.l.s8.bf16 %v1108_v6  ;;  %v1312_v30 = vunpack.c.h.s8.bf16 %v1108_v6 }
 0x1ce   : > { %1487 = vmatpush1.bf16.msra.mxu0 %v1279_v12  ;;  %1651 = vmatpush1.bf16.msra.mxu1 %v1281_v19  ;;  %v1305_v12 = vunpack.c.h.s8.bf16 %v1105_v60  ;;  %v1120_v60 = vld [vmem:[%s4521_s14 + $0x2a8] sm:$0xff] }
 0x1cf   : > { %1488 = vmatprep.subr.bf16.mxu0 %v1284_v23  ;;  %1652 = vmatprep.subr.bf16.mxu1 %v1286_v24  ;;  %v1310_v23 = vunpack.c.l.s8.bf16 %v1110_v7  ;;  %v1107_v24 = vld [vmem:[%s4521_s14 + $0x240] sm:$0xff]  ;;  %v1336_v6 = vunpack.c.h.s8.bf16 %v1120_v60 }
 0x1d0   : > { %v1311_v33 = vunpack.c.h.s8.bf16 %v1107_v24 }
 0x1d2   : > { %1489 = vmatpush1.bf16.msra.mxu0 %v1283_v28  ;;  %1653 = vmatpush1.bf16.msra.mxu1 %v1285_v29  ;;  %v1307_v28 = vunpack.c.l.s8.bf16 %v1107_v24  ;;  %v1309_v29 = vunpack.c.l.s8.bf16 %v1109_v26  ;;  %v1123_v24 = vld [vmem:[%s4521_s14 + $0x2c0] sm:$0xff] }
 0x1d3   : > { %1490 = vmatprep.subr.bf16.mxu0 %v1288_v39  ;;  %1654 = vmatprep.subr.bf16.mxu1 %v1290_v31  ;;  %v1314_v39 = vunpack.c.h.s8.bf16 %v1110_v7  ;;  %v1112_v31 = vld [vmem:[%s4521_s14 + $0x268] sm:$0xff] }
 0x1d6   : > { %1491 = vmatpush1.bf16.msra.mxu0 %v1287_v34  ;;  %1655 = vmatpush1.bf16.msra.mxu1 %v1289_v35  ;;  %v1313_v34 = vunpack.c.h.s8.bf16 %v1109_v26  ;;  %v1316_v35 = vunpack.c.l.s8.bf16 %v1112_v31  ;;  %v1125_v26 = vld [vmem:[%s4521_s14 + $0x2d0] sm:$0xff] }
 0x1d7   : > { %1501 = vmatprep.subr.bf16.mxu0 %v1292_v38  ;;  %1665 = vmatprep.subr.bf16.mxu1 %v1294_v40  ;;  %v1111_v38 = vld [vmem:[%s4521_s14 + $0x260] sm:$0xff]  ;;  %v1113_v40 = vld [vmem:[%s4521_s14 + $0x270] sm:$0xff] }
 0x1d8   : > { %v1315_v41 = vunpack.c.l.s8.bf16 %v1111_v38  ;;  %v1317_v42 = vunpack.c.l.s8.bf16 %v1113_v40  ;;  %v1321_v49 = vunpack.c.h.s8.bf16 %v1113_v40 }
 0x1d9   : > { %1493 = vmatmul.mubr.bf16.vlgmr.msra.gmra.mrb[8].mxu0 %v1029_v16  ;;  %1657 = vmatmul.mubr.bf16.vlgmr.msra.gmra.mrb[8].mxu1 %v1029_v16  ;;  %v1116_v16 = vld [vmem:[%s4521_s14 + $0x288] sm:$0xff] }
 0x1da   : > { %1502 = vmatpush1.bf16.msra.mxu0 %v1291_v44  ;;  %1666 = vmatpush1.bf16.msra.mxu1 %v1293_v45  ;;  %v4758_v55 = vpop.f32.mrb[4].mxu0  ;;  %v1320_v44 = vunpack.c.h.s8.bf16 %v1112_v31  ;;  %v1322_v45 = vunpack.c.h.s8.bf16 %v1114_v32  ;;  %v1324_v50 = vunpack.c.l.s8.bf16 %v1116_v16  ;;  %v1128_v32 = vld [vmem:[%s4521_s14 + $0x2e8] sm:$0xff] }
 0x1db   : > { %1503 = vmatprep.subr.bf16.mxu0 %v1296_v47  ;;  %1667 = vmatprep.subr.bf16.mxu1 %v1298_v48  ;;  %v834_v61 = vpop.f32.mrb[5].mxu0  ;;  %v1118_v47 = vld [vmem:[%s4521_s14 + $0x298] sm:$0xff]  ;;  %v1319_v48 = vunpack.c.h.s8.bf16 %v1111_v38 }
 0x1dc   : > { %v967_v62 = vmul.f32 %v945_v51, %v834_v61  ;;  %v836_v53 = vpop.f32.mrb[6].mxu0  ;;  %v4766_v9 = vpop.f32.mrb[4].mxu1  ;;  %v1326_v51 = vunpack.c.l.s8.bf16 %v1118_v47  ;;  %v1330_v59 = vunpack.c.h.s8.bf16 %v1118_v47  ;;  %v1122_v61 = vld [vmem:[%s4521_s14 + $0x2b8] sm:$0xff] }
 0x1dd   : > { %v837_v63 = vpop.f32.mrb[7].mxu0  ;;  %v4768_v10 = vpop.f32.mrb[5].mxu1  ;;  %v1338_v7 = vunpack.c.h.s8.bf16 %v1122_v61 }
 0x1de   : > { %1504 = vmatpush1.bf16.msra.mxu0 %v1295_v52  ;;  %1668 = vmatpush1.bf16.msra.mxu1 %v1297_v54  ;;  %v1016_v3 = vadd.f32 %v994_v56, %v967_v62  ;;  %v918_v20 = vpop.f32.mrb[6].mxu1  ;;  %v1115_v52 = vld [vmem:[%s4521_s14 + $0x280] sm:$0xff]  ;;  %v1117_v54 = vld [vmem:[%s4521_s14 + $0x290] sm:$0xff]  ;;  %v1332_v63 = vunpack.c.l.s8.bf16 %v1120_v60 }
 0x1df   : > { %1505 = vmatprep.subr.bf16.mxu0 %v1300_v57  ;;  %1669 = vmatprep.subr.bf16.mxu1 %v1302_v58  ;;  %v919_v27 = vpop.f32.mrb[7].mxu1  ;;  %v1323_v56 = vunpack.c.l.s8.bf16 %v1115_v52  ;;  %v1325_v57 = vunpack.c.l.s8.bf16 %v1117_v54  ;;  %v1328_v58 = vunpack.c.h.s8.bf16 %v1116_v16  ;;  %v1327_v62 = vunpack.c.h.s8.bf16 %v1115_v52  ;;  %v1134_v52 = vld [vmem:[%s4521_s14 + $0x318] sm:$0xff]  ;;  %v1133_v60 = vld [vmem:[%s4521_s14 + $0x310] sm:$0xff] }
 0x1e0   : > { %v1024_v8 = vmax.f32 %v1016_v3, 0.0  ;;  %v1329_v53 = vunpack.c.h.s8.bf16 %v1117_v54  ;;  %v1121_v3 = vld [vmem:[%s4521_s14 + $0x2b0] sm:$0xff]  ;;  %v4787_v20 = vsub.s32 4, %v4675_v13  ;;  %v4792_v27 = vsub.s32 7, %v4675_v13 }
 0x1e2   : > { %1506 = vmatpush1.bf16.msra.mxu0 %v1299_v1  ;;  %1670 = vmatpush1.bf16.msra.mxu1 %v1301_v2  ;;  %v1032_v19 = vpack.c.bf16 %v1024_v8, %v1024_v8  ;;  %v1334_v1 = vunpack.c.l.s8.bf16 %v1122_v61  ;;  %v1119_v2 = vld [vmem:[%s4521_s14 + $0x2a0] sm:$0xff]  ;;  %v1124_v8 = vld [vmem:[%s4521_s14 + $0x2c8] sm:$0xff]  ;;  %v990_v40 = vrot.slane %v4689_v18, %v4787_v20 }
 0x1e3   : > { %1507 = vmatprep.subr.bf16.mxu0 %v1304_v4  ;;  %1671 = vmatprep.subr.bf16.mxu1 %v1306_v5  ;;  %v1331_v4 = vunpack.c.l.s8.bf16 %v1119_v2  ;;  %v1333_v5 = vunpack.c.l.s8.bf16 %v1121_v3 }
 0x1e4   : > { %1533 = vmatprep.mubr.bf16.mxu0 %v1032_v19  ;;  %1697 = vmatprep.mubr.bf16.mxu1 %v1032_v19  ;;  %v1337_v19 = vunpack.c.h.s8.bf16 %v1121_v3  ;;  %v1136_v3 = vld [vmem:[%s4521_s14 + $0x328] sm:$0xff] }
 0x1e6   : > { %1508 = vmatpush1.bf16.msra.mxu0 %v1303_v11  ;;  %1672 = vmatpush1.bf16.msra.mxu1 %v1305_v12  ;;  %v1126_v11 = vld [vmem:[%s4521_s14 + $0x2d8] sm:$0xff]  ;;  %v1335_v12 = vunpack.c.h.s8.bf16 %v1119_v2  ;;  %v1362_v2 = vunpack.c.h.s8.bf16 %v1134_v52 }
 0x1e7   : > { %1509 = vmatprep.subr.bf16.mxu0 %v1308_v21  ;;  %1673 = vmatprep.subr.bf16.mxu1 %v1310_v23  ;;  %v1340_v21 = vunpack.c.l.s8.bf16 %v1124_v8  ;;  %v1342_v23 = vunpack.c.l.s8.bf16 %v1126_v11  ;;  %v1346_v31 = vunpack.c.h.s8.bf16 %v1126_v11 }
 0x1ea   : > { %1510 = vmatpush1.bf16.msra.mxu0 %v1307_v28  ;;  %1674 = vmatpush1.bf16.msra.mxu1 %v1309_v29  ;;  %v1339_v28 = vunpack.c.l.s8.bf16 %v1123_v24  ;;  %v1341_v29 = vunpack.c.l.s8.bf16 %v1125_v26 }
 0x1eb   : > { %1511 = vmatprep.subr.bf16.mxu0 %v1312_v30  ;;  %1675 = vmatprep.subr.bf16.mxu1 %v1314_v39  ;;  %v941_v30 = vrot.slane %v4683_v15, %v4787_v20  ;;  %v1344_v39 = vunpack.c.h.s8.bf16 %v1124_v8  ;;  %v1364_v8 = vunpack.c.l.s8.bf16 %v1136_v3 }
 0x1ed   : > { %v966_v38 = vmul.f32 %v941_v30, %v4758_v55 }
 0x1ee   : > { %1512 = vmatpush1.bf16.msra.mxu0 %v1311_v33  ;;  %1676 = vmatpush1.bf16.msra.mxu1 %v1313_v34  ;;  %v1130_v33 = vld [vmem:[%s4521_s14 + $0x2f8] sm:$0xff]  ;;  %v953_v34 = vrot.slane %v4683_v15, %v4792_v27  ;;  %v1002_v15 = vrot.slane %v4689_v18, %v4792_v27 }
 0x1ef   : > { %1513 = vmatprep.subr.bf16.mxu0 %v1316_v35  ;;  %1677 = vmatprep.subr.bf16.mxu1 %v1318_v36  ;;  %v1343_v35 = vunpack.c.h.s8.bf16 %v1123_v24  ;;  %v1345_v36 = vunpack.c.h.s8.bf16 %v1125_v26  ;;  %v1368_v24 = vunpack.c.h.s8.bf16 %v1136_v3 }
 0x1f0   : > { %v969_v16 = vmul.f32 %v953_v34, %v4768_v10  ;;  %v1141_v34 = vld [vmem:[%s4521_s14 + $0x350] sm:$0xff] }
 0x1f2   : > { %1514 = vmatpush1.bf16.msra.mxu0 %v1315_v41  ;;  %1678 = vmatpush1.bf16.msra.mxu1 %v1317_v42  ;;  %v1348_v41 = vunpack.c.l.s8.bf16 %v1128_v32  ;;  %v1350_v42 = vunpack.c.l.s8.bf16 %v1130_v33  ;;  %v1018_v54 = vadd.f32 %v1002_v15, %v969_v16 }
 0x1f3   : > { %1515 = vmatprep.subr.bf16.mxu0 %v1320_v44  ;;  %1679 = vmatprep.subr.bf16.mxu1 %v1322_v45  ;;  %v1127_v44 = vld [vmem:[%s4521_s14 + $0x2e0] sm:$0xff]  ;;  %v1129_v45 = vld [vmem:[%s4521_s14 + $0x2f0] sm:$0xff] }
 0x1f4   : > { %v1347_v47 = vunpack.c.l.s8.bf16 %v1127_v44  ;;  %v1349_v55 = vunpack.c.l.s8.bf16 %v1129_v45  ;;  %v1351_v10 = vunpack.c.h.s8.bf16 %v1127_v44  ;;  %v1026_v61 = vmax.f32 %v1018_v54, 0.0  ;;  %v1150_v54 = vld [vmem:[%s4521_s14 + $0x398] sm:$0xff] }
 0x1f6   : > { %1516 = vmatpush1.bf16.msra.mxu0 %v1319_v48  ;;  %1680 = vmatpush1.bf16.msra.mxu1 %v1321_v49  ;;  %v1015_v48 = vadd.f32 %v990_v40, %v966_v38  ;;  %v1352_v49 = vunpack.c.h.s8.bf16 %v1128_v32 }
 0x1f7   : > { %1517 = vmatprep.subr.bf16.mxu0 %v1324_v50  ;;  %1681 = vmatprep.subr.bf16.mxu1 %v1326_v51  ;;  %v1354_v50 = vunpack.c.h.s8.bf16 %v1130_v33  ;;  %v1132_v51 = vld [vmem:[%s4521_s14 + $0x308] sm:$0xff]  ;;  %v1139_v33 = vld [vmem:[%s4521_s14 + $0x340] sm:$0xff] }
 0x1f8   : > { %v1356_v18 = vunpack.c.l.s8.bf16 %v1132_v51  ;;  %v1375_v44 = vunpack.c.h.s8.bf16 %v1139_v33 }
 0x1fa   : > { %1518 = vmatpush1.bf16.msra.mxu0 %v1323_v56  ;;  %1682 = vmatpush1.bf16.msra.mxu1 %v1325_v57  ;;  %v1353_v56 = vunpack.c.h.s8.bf16 %v1129_v45  ;;  %v1023_v57 = vmax.f32 %v1015_v48, 0.0  ;;  %v1377_v45 = vunpack.c.h.s8.bf16 %v1141_v34 }
 0x1fb   : > { %1519 = vmatprep.subr.bf16.mxu0 %v1328_v58  ;;  %1683 = vmatprep.subr.bf16.mxu1 %v1330_v59  ;;  %v1358_v58 = vunpack.c.l.s8.bf16 %v1134_v52  ;;  %v1131_v59 = vld [vmem:[%s4521_s14 + $0x300] sm:$0xff]  ;;  %v1148_v52 = vld [vmem:[%s4521_s14 + $0x388] sm:$0xff] }
 0x1fe   : > { %1520 = vmatpush1.bf16.msra.mxu0 %v1327_v62  ;;  %1684 = vmatpush1.bf16.msra.mxu1 %v1329_v53  ;;  %v1355_v62 = vunpack.c.l.s8.bf16 %v1131_v59  ;;  %v1357_v53 = vunpack.c.l.s8.bf16 %v1133_v60 }
 0x1ff   : > { %1521 = vmatprep.subr.bf16.mxu0 %v1332_v63  ;;  %1685 = vmatprep.subr.bf16.mxu1 %v1334_v1  ;;  %v1031_v63 = vpack.c.bf16 %v1023_v57, %v1023_v57  ;;  %v1360_v1 = vunpack.c.h.s8.bf16 %v1132_v51  ;;  %v1388_v57 = vunpack.c.l.s8.bf16 %v1148_v52 }
 0x202   : > { %1522 = vmatpush1.bf16.msra.mxu0 %v1331_v4  ;;  %1686 = vmatpush1.bf16.msra.mxu1 %v1333_v5  ;;  %v1138_v4 = vld [vmem:[%s4521_s14 + $0x338] sm:$0xff]  ;;  %v1034_v5 = vpack.c.bf16 %v1026_v61, %v1026_v61 }
 0x203   : > { %1523 = vmatprep.subr.bf16.mxu0 %v1336_v6  ;;  %1687 = vmatprep.subr.bf16.mxu1 %v1338_v7  ;;  %v1359_v6 = vunpack.c.h.s8.bf16 %v1131_v59  ;;  %v1361_v7 = vunpack.c.h.s8.bf16 %v1133_v60  ;;  %v1366_v11 = vunpack.c.l.s8.bf16 %v1138_v4  ;;  %v1370_v26 = vunpack.c.h.s8.bf16 %v1138_v4  ;;  %v1149_v59 = vld [vmem:[%s4521_s14 + $0x390] sm:$0xff] }
 0x204   : > { %v1389_v61 = vunpack.c.l.s8.bf16 %v1149_v59  ;;  %v1393_v3 = vunpack.c.h.s8.bf16 %v1149_v59  ;;  %v1805_v59 = vld [vmem:[%s4852_s11] sm:$0xff] }
 0x206   : > { %1524 = vmatpush1.bf16.msra.mxu0 %v1335_v12  ;;  %1688 = vmatpush1.bf16.msra.mxu1 %v1337_v19  ;;  %v1135_v12 = vld [vmem:[%s4521_s14 + $0x320] sm:$0xff]  ;;  %v1137_v19 = vld [vmem:[%s4521_s14 + $0x330] sm:$0xff] }
 0x207   : > { %1525 = vmatprep.subr.bf16.mxu0 %v1340_v21  ;;  %1689 = vmatprep.subr.bf16.mxu1 %v1342_v23  ;;  %v1363_v21 = vunpack.c.l.s8.bf16 %v1135_v12  ;;  %v1365_v23 = vunpack.c.l.s8.bf16 %v1137_v19  ;;  %v1367_v30 = vunpack.c.h.s8.bf16 %v1135_v12 }
 0x20a   : > { %1526 = vmatpush1.bf16.msra.mxu0 %v1339_v28  ;;  %1690 = vmatpush1.bf16.msra.mxu1 %v1341_v29  ;;  %v1140_v28 = vld [vmem:[%s4521_s14 + $0x348] sm:$0xff]  ;;  %v1142_v29 = vld [vmem:[%s4521_s14 + $0x358] sm:$0xff] }
 0x20b   : > { %1527 = vmatprep.subr.bf16.mxu0 %v1344_v39  ;;  %1691 = vmatprep.subr.bf16.mxu1 %v1346_v31  ;;  %v1369_v39 = vunpack.c.h.s8.bf16 %v1137_v19  ;;  %v1372_v31 = vunpack.c.l.s8.bf16 %v1140_v28  ;;  %v1374_v32 = vunpack.c.l.s8.bf16 %v1142_v29  ;;  %v1376_v38 = vunpack.c.h.s8.bf16 %v1140_v28 }
 0x20c   : > { %v1378_v40 = vunpack.c.h.s8.bf16 %v1142_v29  ;;  %v4836_v28 = vsub.s32 6, %v4675_v13 }
 0x20e   : > { %1528 = vmatpush1.bf16.msra.mxu0 %v1343_v35  ;;  %1692 = vmatpush1.bf16.msra.mxu1 %v1345_v36  ;;  %v1371_v35 = vunpack.c.l.s8.bf16 %v1139_v33  ;;  %v1373_v36 = vunpack.c.l.s8.bf16 %v1141_v34  ;;  %v4173_v34 = vld [vmem:[%s4680_s9] ss:$2 sm:$0xff] }
 0x20f   : > { %1529 = vmatprep.subr.bf16.mxu0 %v1348_v41  ;;  %1693 = vmatprep.subr.bf16.mxu1 %v1350_v42  ;;  %v1144_v41 = vld [vmem:[%s4521_s14 + $0x368] sm:$0xff]  ;;  %v1146_v42 = vld [vmem:[%s4521_s14 + $0x378] sm:$0xff] }
 0x210   : > { %v1380_v16 = vunpack.c.l.s8.bf16 %v1144_v41  ;;  %v1382_v15 = vunpack.c.l.s8.bf16 %v1146_v42  ;;  %v1386_v51 = vunpack.c.h.s8.bf16 %v1146_v42 }
 0x212   : > { %1530 = vmatpush1.bf16.msra.mxu0 %v1347_v47  ;;  %1694 = vmatpush1.bf16.msra.mxu1 %v1349_v55  ;;  %v1143_v47 = vld [vmem:[%s4521_s14 + $0x360] sm:$0xff]  ;;  %v1145_v55 = vld [vmem:[%s4521_s14 + $0x370] sm:$0xff] }
 0x213   : > { %1531 = vmatprep.subr.bf16.mxu0 %v1352_v49  ;;  %1695 = vmatprep.subr.bf16.mxu1 %v1354_v50  ;;  %v1379_v48 = vunpack.c.l.s8.bf16 %v1143_v47  ;;  %v1381_v49 = vunpack.c.l.s8.bf16 %v1145_v55  ;;  %v1384_v50 = vunpack.c.h.s8.bf16 %v1144_v41 }
 0x216   : > { %1532 = vmatpush1.bf16.msra.mxu0 %v1351_v10  ;;  %1696 = vmatpush1.bf16.msra.mxu1 %v1353_v56  ;;  %v1383_v10 = vunpack.c.h.s8.bf16 %v1143_v47  ;;  %v1385_v56 = vunpack.c.h.s8.bf16 %v1145_v55  ;;  %v1159_v55 = vld [vmem:[%s4521_s14 + $0x3e0] sm:$0xff] }
 0x217   : > { %1542 = vmatprep.subr.bf16.mxu0 %v1356_v18  ;;  %1706 = vmatprep.subr.bf16.mxu1 %v1358_v58  ;;  %v1390_v18 = vunpack.c.l.s8.bf16 %v1150_v54  ;;  %v1147_v58 = vld [vmem:[%s4521_s14 + $0x380] sm:$0xff] }
 0x218   : > { %v1387_v60 = vunpack.c.l.s8.bf16 %v1147_v58 }
 0x219   : > { %1534 = vmatmul.mubr.bf16.vlgmr.msra.gmra.mrb[8].mxu0 %v1031_v63  ;;  %1698 = vmatmul.mubr.bf16.vlgmr.msra.gmra.mrb[8].mxu1 %v1031_v63  ;;  %v1152_v63 = vld [vmem:[%s4521_s14 + $0x3a8] sm:$0xff] }
 0x21a   : > { %1543 = vmatpush1.bf16.msra.mxu0 %v1355_v62  ;;  %1707 = vmatpush1.bf16.msra.mxu1 %v1357_v53  ;;  %v1392_v62 = vunpack.c.h.s8.bf16 %v1148_v52  ;;  %v1394_v53 = vunpack.c.h.s8.bf16 %v1150_v54  ;;  %v1396_v4 = vunpack.c.l.s8.bf16 %v1152_v63  ;;  %v1400_v12 = vunpack.c.h.s8.bf16 %v1152_v63  ;;  %v1809_v54 = vld [vmem:[%s4852_s11 + $0x20] sm:$0xff] }
 0x21b   : > { %1544 = vmatprep.subr.bf16.mxu0 %v1360_v1  ;;  %1708 = vmatprep.subr.bf16.mxu1 %v1362_v2  ;;  %v1154_v1 = vld [vmem:[%s4521_s14 + $0x3b8] sm:$0xff]  ;;  %v1391_v2 = vunpack.c.h.s8.bf16 %v1147_v58  ;;  %v1829_v58 = vunpack.c.l.s8.bf16 %v1809_v54 }
 0x21c   : > { %1574 = vmatprep.mubr.bf16.mxu0 %v1034_v5  ;;  %1738 = vmatprep.mubr.bf16.mxu1 %v1034_v5  ;;  %v1398_v5 = vunpack.c.l.s8.bf16 %v1154_v1  ;;  %v1402_v19 = vunpack.c.h.s8.bf16 %v1154_v1  ;;  %v1830_v1 = vunpack.c.h.s8.bf16 %v1809_v54 }
 0x21e   : > { %1545 = vmatpush1.bf16.msra.mxu0 %v1359_v6  ;;  %1709 = vmatpush1.bf16.msra.mxu1 %v1361_v7  ;;  %v1151_v6 = vld [vmem:[%s4521_s14 + $0x3a0] sm:$0xff]  ;;  %v1153_v7 = vld [vmem:[%s4521_s14 + $0x3b0] sm:$0xff] }
 0x21f   : > { %1546 = vmatprep.subr.bf16.mxu0 %v1364_v8  ;;  %1710 = vmatprep.subr.bf16.mxu1 %v1366_v11  ;;  %v1395_v8 = vunpack.c.l.s8.bf16 %v1151_v6  ;;  %v1397_v11 = vunpack.c.l.s8.bf16 %v1153_v7 }
 0x222   : > { %1547 = vmatpush1.bf16.msra.mxu0 %v1363_v21  ;;  %1711 = vmatpush1.bf16.msra.mxu1 %v1365_v23  ;;  %v1156_v21 = vld [vmem:[%s4521_s14 + $0x3c8] sm:$0xff]  ;;  %v1158_v23 = vld [vmem:[%s4521_s14 + $0x3d8] sm:$0xff] }
 0x223   : > { %1548 = vmatprep.subr.bf16.mxu0 %v1368_v24  ;;  %1712 = vmatprep.subr.bf16.mxu1 %v1370_v26  ;;  %v1399_v24 = vunpack.c.h.s8.bf16 %v1151_v6  ;;  %v1401_v26 = vunpack.c.h.s8.bf16 %v1153_v7  ;;  %v1404_v29 = vunpack.c.l.s8.bf16 %v1156_v21  ;;  %v1408_v13 = vunpack.c.h.s8.bf16 %v1156_v21 }
 0x226   : > { %1549 = vmatpush1.bf16.msra.mxu0 %v1367_v30  ;;  %1713 = vmatpush1.bf16.msra.mxu1 %v1369_v39  ;;  %v1406_v30 = vunpack.c.l.s8.bf16 %v1158_v23  ;;  %v1155_v39 = vld [vmem:[%s4521_s14 + $0x3c0] sm:$0xff] }
 0x227   : > { %1550 = vmatprep.subr.bf16.mxu0 %v1372_v31  ;;  %1714 = vmatprep.subr.bf16.mxu1 %v1374_v32  ;;  %v1157_v31 = vld [vmem:[%s4521_s14 + $0x3d0] sm:$0xff]  ;;  %v1403_v32 = vunpack.c.l.s8.bf16 %v1155_v39  ;;  %v1407_v41 = vunpack.c.h.s8.bf16 %v1155_v39 }
 0x228   : > { %v1405_v33 = vunpack.c.l.s8.bf16 %v1157_v31  ;;  %v1409_v42 = vunpack.c.h.s8.bf16 %v1157_v31 }
 0x22a   : > { %1551 = vmatpush1.bf16.msra.mxu0 %v1371_v35  ;;  %1715 = vmatpush1.bf16.msra.mxu1 %v1373_v36  ;;  %v949_v35 = vrot.slane %v4173_v34, %v4836_v28  ;;  %v1410_v36 = vunpack.c.h.s8.bf16 %v1158_v23  ;;  %v1815_v34 = vld [vmem:[%s4852_s11 + $0x50] sm:$0xff] }
 0x22b   : > { %1552 = vmatprep.subr.bf16.mxu0 %v1376_v38  ;;  %1716 = vmatprep.subr.bf16.mxu1 %v1378_v40  ;;  %v1160_v38 = vld [vmem:[%s4521_s14 + $0x3e8] sm:$0xff]  ;;  %v1162_v40 = vld [vmem:[%s4521_s14 + $0x3f8] sm:$0xff] }
 0x22c   : > { %v1414_v47 = vunpack.c.l.s8.bf16 %v1162_v40  ;;  %v1418_v52 = vunpack.c.h.s8.bf16 %v1162_v40 }
 0x22e   : > { %1553 = vmatpush1.bf16.msra.mxu0 %v1375_v44  ;;  %1717 = vmatpush1.bf16.msra.mxu1 %v1377_v45  ;;  %v968_v44 = vmul.f32 %v949_v35, %v4766_v9  ;;  %v4174_v45 = vld [vmem:[%s4680_s9 + $0x1] ss:$2 sm:$0xff] }
 0x22f   : > { %1554 = vmatprep.subr.bf16.mxu0 %v1380_v16  ;;  %1718 = vmatprep.subr.bf16.mxu1 %v1382_v15  ;;  %v998_v16 = vrot.slane %v4174_v45, %v4836_v28  ;;  %v1412_v15 = vunpack.c.l.s8.bf16 %v1160_v38  ;;  %v1808_v45 = vld [vmem:[%s4852_s11 + $0x18] sm:$0xff] }
 0x232   : > { %1555 = vmatpush1.bf16.msra.mxu0 %v1379_v48  ;;  %1719 = vmatpush1.bf16.msra.mxu1 %v1381_v49  ;;  %v1161_v48 = vld [vmem:[%s4521_s14 + $0x3f0] sm:$0xff]  ;;  %v1411_v49 = vunpack.c.l.s8.bf16 %v1159_v55 }
 0x233   : > { %1556 = vmatprep.subr.bf16.mxu0 %v1384_v50  ;;  %1720 = vmatprep.subr.bf16.mxu1 %v1386_v51  ;;  %v1413_v9 = vunpack.c.l.s8.bf16 %v1161_v48  ;;  %v1017_v50 = vadd.f32 %v998_v16, %v968_v44  ;;  %v1416_v51 = vunpack.c.h.s8.bf16 %v1160_v38  ;;  %v1820_v16 = vld [vmem:[%s4852_s11 + $0x78] sm:$0xff] }
 0x236   : > { %1557 = vmatpush1.bf16.msra.mxu0 %v1383_v10  ;;  %1721 = vmatpush1.bf16.msra.mxu1 %v1385_v56  ;;  %v1817_v10 = vld [vmem:[%s4852_s11 + $0x60] sm:$0xff]  ;;  %v1415_v56 = vunpack.c.h.s8.bf16 %v1159_v55  ;;  %v1816_v55 = vld [vmem:[%s4852_s11 + $0x58] sm:$0xff] }
 0x237   : > { %1558 = vmatprep.subr.bf16.mxu0 %v1388_v57  ;;  %1722 = vmatprep.subr.bf16.mxu1 %v1390_v18  ;;  %v1417_v57 = vunpack.c.h.s8.bf16 %v1161_v48  ;;  %v1025_v18 = vmax.f32 %v1017_v50, 0.0  ;;  %v1843_v48 = vunpack.c.l.s8.bf16 %v1816_v55  ;;  %v1852_v50 = vunpack.c.h.s8.bf16 %v1820_v16 }
 0x239   : > { %v1033_v63 = vpack.c.bf16 %v1025_v18, %v1025_v18  ;;  %v3686_v18 = vld [vmem:[%s4680_s9 + $0x11] ss:$2 sm:$0xf] }
 0x23a   : > { %1559 = vmatpush1.bf16.msra.mxu0 %v1387_v60  ;;  %1723 = vmatpush1.bf16.msra.mxu1 %v1389_v61  ;;  %v1845_v60 = vunpack.c.l.s8.bf16 %v1817_v10  ;;  %v1813_v61 = vld [vmem:[%s4852_s11 + $0x40] sm:$0xff] }
 0x23b   : > { %1560 = vmatprep.subr.bf16.mxu0 %v1392_v62  ;;  %1724 = vmatprep.subr.bf16.mxu1 %v1394_v53  ;;  %v1821_v62 = vunpack.c.l.s8.bf16 %v1805_v59  ;;  %v1837_v53 = vunpack.c.l.s8.bf16 %v1813_v61  ;;  %v1838_v6 = vunpack.c.h.s8.bf16 %v1813_v61 }
 0x23e   : > { %1561 = vmatpush1.bf16.msra.mxu0 %v1391_v2  ;;  %1725 = vmatpush1.bf16.msra.mxu1 %v1393_v3  ;;  %v1846_v2 = vunpack.c.h.s8.bf16 %v1817_v10  ;;  %v1810_v3 = vld [vmem:[%s4852_s11 + $0x28] sm:$0xff]  ;;  %v3706_v10 = vld [vmem:[%s4513_s28 + $0x258] sm:$0xff] }
 0x23f   : > { %1562 = vmatprep.subr.bf16.mxu0 %v1396_v4  ;;  %1726 = vmatprep.subr.bf16.mxu1 %v1398_v5  ;;  %v1818_v4 = vld [vmem:[%s4852_s11 + $0x68] sm:$0xff]  ;;  %v1822_v5 = vunpack.c.h.s8.bf16 %v1805_v59  ;;  %v1831_v7 = vunpack.c.l.s8.bf16 %v1810_v3  ;;  %v1832_v23 = vunpack.c.h.s8.bf16 %v1810_v3  ;;  %v1788_v3 = vrot.slane %v3686_v18, %v4700_v25 }
 0x242   : > { %1563 = vmatpush1.bf16.msra.mxu0 %v1395_v8  ;;  %1727 = vmatpush1.bf16.msra.mxu1 %v1397_v11  ;;  %v1806_v8 = vld [vmem:[%s4852_s11 + $0x8] sm:$0xff]  ;;  %v1847_v11 = vunpack.c.l.s8.bf16 %v1818_v4 }
 0x243   : > { %1564 = vmatprep.subr.bf16.mxu0 %v1400_v12  ;;  %1728 = vmatprep.subr.bf16.mxu1 %v1402_v19  ;;  %v1814_v12 = vld [vmem:[%s4852_s11 + $0x48] sm:$0xff]  ;;  %v1823_v19 = vunpack.c.l.s8.bf16 %v1806_v8 }
 0x244   : > { %v1839_v21 = vunpack.c.l.s8.bf16 %v1814_v12  ;;  %v1840_v39 = vunpack.c.h.s8.bf16 %v1814_v12 }
 0x246   : > { %1565 = vmatpush1.bf16.msra.mxu0 %v1399_v24  ;;  %1729 = vmatpush1.bf16.msra.mxu1 %v1401_v26  ;;  %v1848_v24 = vunpack.c.h.s8.bf16 %v1818_v4  ;;  %v1811_v26 = vld [vmem:[%s4852_s11 + $0x30] sm:$0xff] }
 0x247   : > { %1566 = vmatprep.subr.bf16.mxu0 %v1404_v29  ;;  %1730 = vmatprep.subr.bf16.mxu1 %v1406_v30  ;;  %v1819_v29 = vld [vmem:[%s4852_s11 + $0x70] sm:$0xff]  ;;  %v1824_v30 = vunpack.c.h.s8.bf16 %v1806_v8  ;;  %v1833_v31 = vunpack.c.l.s8.bf16 %v1811_v26 }
 0x248   : > { %v1850_v38 = vunpack.c.h.s8.bf16 %v1819_v29 }
 0x24a   : > { %1567 = vmatpush1.bf16.msra.mxu0 %v1403_v32  ;;  %1731 = vmatpush1.bf16.msra.mxu1 %v1405_v33  ;;  %v1807_v32 = vld [vmem:[%s4852_s11 + $0x10] sm:$0xff]  ;;  %v1849_v33 = vunpack.c.l.s8.bf16 %v1819_v29 }
 0x24b   : > { %1568 = vmatprep.subr.bf16.mxu0 %v1408_v13  ;;  %1732 = vmatprep.subr.bf16.mxu1 %v1410_v36  ;;  %v1825_v35 = vunpack.c.l.s8.bf16 %v1807_v32  ;;  %v1841_v13 = vunpack.c.l.s8.bf16 %v1815_v34  ;;  %v1834_v36 = vunpack.c.h.s8.bf16 %v1811_v26  ;;  %v1826_v40 = vunpack.c.h.s8.bf16 %v1807_v32  ;;  %v3703_v32 = vld [vmem:[%s4513_s28 + $0x240] sm:$0xff] }
 0x24e   : > { %1569 = vmatpush1.bf16.msra.mxu0 %v1407_v41  ;;  %1733 = vmatpush1.bf16.msra.mxu1 %v1409_v42  ;;  %v1842_v41 = vunpack.c.h.s8.bf16 %v1815_v34  ;;  %v1812_v42 = vld [vmem:[%s4852_s11 + $0x38] sm:$0xff] }
 0x24f   : > { %1570 = vmatprep.subr.bf16.mxu0 %v1412_v15  ;;  %1734 = vmatprep.subr.bf16.mxu1 %v1414_v47  ;;  %v1835_v44 = vunpack.c.l.s8.bf16 %v1812_v42  ;;  %v1827_v15 = vunpack.c.l.s8.bf16 %v1808_v45  ;;  %v1851_v47 = vunpack.c.l.s8.bf16 %v1820_v16  ;;  %v3712_v16 = vld [vmem:[%s4513_s28 + $0x288] sm:$0xff] }
 0x252   : > { %1571 = vmatpush1.bf16.msra.mxu0 %v1411_v49  ;;  %1735 = vmatpush1.bf16.msra.mxu1 %v1413_v9  ;;  %v1836_v49 = vunpack.c.h.s8.bf16 %v1812_v42  ;;  %v1828_v9 = vunpack.c.h.s8.bf16 %v1808_v45  ;;  %v2043_v45 = vunpack.c.h.s8.bf16 %v3706_v10 }
 0x253   : > { %1572 = vmatprep.subr.bf16.mxu0 %v1416_v51  ;;  %1736 = vmatprep.subr.bf16.mxu1 %v1418_v52  ;;  %v1844_v51 = vunpack.c.h.s8.bf16 %v1816_v55  ;;  %v3704_v52 = vld [vmem:[%s4513_s28 + $0x248] sm:$0xff] }
 0x254   : > { %v2033_v54 = vunpack.c.l.s8.bf16 %v3704_v52 }
 0x256   : > { %1573 = vmatpush1.bf16.msra.mxu0 %v1415_v56  ;;  %1737 = vmatpush1.bf16.msra.mxu1 %v1417_v57  ;;  %v2035_v56 = vunpack.c.l.s8.bf16 %v3706_v10  ;;  %v3685_v57 = vld [vmem:[%s4680_s9 + $0x10] ss:$2 sm:$0xf] }
 0x257   : > { %3931 = vmatprep.subr.bf16.mxu0 %v1829_v58  ;;  %3953 = vmatprep.subr.bf16.mxu1 %v1845_v60  ;;  %v1751_v58 = vrot.slane %v3685_v57, %v4678_v14  ;;  %v1759_v59 = vrot.slane %v3685_v57, %v4734_v0  ;;  %v1755_v60 = vrot.slane %v3685_v57, %v4686_v17 }
 0x258   : > { %v1763_v61 = vrot.slane %v3685_v57, %v4700_v25  ;;  %v3722_v57 = vld [vmem:[%s4513_s28 + $0x2d8] sm:$0xff] }
 0x259   : > { %1575 = vmatmul.mubr.bf16.vlgmr.msra.gmra.mrb[8].mxu0 %v1033_v63  ;;  %1739 = vmatmul.mubr.bf16.vlgmr.msra.gmra.mrb[8].mxu1 %v1033_v63 }
 0x25a   : > { %3932 = vmatpush3.bf16.msra.mxu0 %v1821_v62  ;;  %3954 = vmatpush3.bf16.msra.mxu1 %v1837_v53  ;;  %v1776_v62 = vrot.slane %v3686_v18, %v4678_v14  ;;  %v1784_v53 = vrot.slane %v3686_v18, %v4734_v0 }
 0x25b   : > { %3933 = vmatprep.subr.bf16.mxu0 %v1830_v1  ;;  %3955 = vmatprep.subr.bf16.mxu1 %v1846_v2  ;;  %v1780_v2 = vrot.slane %v3686_v18, %v4686_v17 }
 0x25e   : > { %3934 = vmatpush3.bf16.msra.mxu0 %v1822_v5  ;;  %3956 = vmatpush3.bf16.msra.mxu1 %v1838_v6 }
 0x25f   : > { %3935 = vmatprep.subr.bf16.mxu0 %v1831_v7  ;;  %3957 = vmatprep.subr.bf16.mxu1 %v1847_v11 }
 0x262   : > { %3936 = vmatpush3.bf16.msra.mxu0 %v1823_v19  ;;  %3958 = vmatpush3.bf16.msra.mxu1 %v1839_v21 }
 0x263   : > { %3937 = vmatprep.subr.bf16.mxu0 %v1832_v23  ;;  %3959 = vmatprep.subr.bf16.mxu1 %v1848_v24 }
 0x266   : > { %3938 = vmatpush3.bf16.msra.mxu0 %v1824_v30  ;;  %3960 = vmatpush3.bf16.msra.mxu1 %v1840_v39 }
 0x267   : > { %3939 = vmatprep.subr.bf16.mxu0 %v1833_v31  ;;  %3961 = vmatprep.subr.bf16.mxu1 %v1849_v33  ;;  %v3705_v33 = vld [vmem:[%s4513_s28 + $0x250] sm:$0xff] }
 0x268   : > { %v2042_v55 = vunpack.c.h.s8.bf16 %v3705_v33 }
 0x26a   : > { %3940 = vmatpush3.bf16.msra.mxu0 %v1825_v35  ;;  %3962 = vmatpush3.bf16.msra.mxu1 %v1841_v13 }
 0x26b   : > { %3941 = vmatprep.subr.bf16.mxu0 %v1834_v36  ;;  %3963 = vmatprep.subr.bf16.mxu1 %v1850_v38  ;;  %v2032_v38 = vunpack.c.l.s8.bf16 %v3703_v32 }
 0x26e   : > { %3942 = vmatpush3.bf16.msra.mxu0 %v1826_v40  ;;  %3964 = vmatpush3.bf16.msra.mxu1 %v1842_v41  ;;  %v2034_v40 = vunpack.c.l.s8.bf16 %v3705_v33 }
 0x26f   : > { %3943 = vmatprep.subr.bf16.mxu0 %v1835_v44  ;;  %3965 = vmatprep.subr.bf16.mxu1 %v1851_v47  ;;  %v2041_v44 = vunpack.c.h.s8.bf16 %v3704_v52  ;;  %v2040_v47 = vunpack.c.h.s8.bf16 %v3703_v32  ;;  %v3735_v32 = vld [vmem:[%s4513_s28 + $0x340] sm:$0xff] }
 0x272   : > { %3944 = vmatpush3.bf16.msra.mxu0 %v1827_v15  ;;  %3966 = vmatpush3.bf16.msra.mxu1 %v1843_v48  ;;  %v3714_v15 = vld [vmem:[%s4513_s28 + $0x298] sm:$0xff]  ;;  %v2049_v48 = vunpack.c.l.s8.bf16 %v3712_v16 }
 0x273   : > { %3945 = vmatprep.subr.bf16.mxu0 %v1836_v49  ;;  %3967 = vmatprep.subr.bf16.mxu1 %v1852_v50  ;;  %v3711_v49 = vld [vmem:[%s4513_s28 + $0x280] sm:$0xff]  ;;  %v3713_v50 = vld [vmem:[%s4513_s28 + $0x290] sm:$0xff]  ;;  %v2059_v10 = vunpack.c.h.s8.bf16 %v3714_v15 }
 0x274   : > { %v2050_v52 = vunpack.c.l.s8.bf16 %v3713_v50  ;;  %v2056_v18 = vunpack.c.h.s8.bf16 %v3711_v49 }
 0x276   : > { %3946 = vmatpush3.bf16.msra.mxu0 %v1828_v9  ;;  %3968 = vmatpush3.bf16.msra.mxu1 %v1844_v51  ;;  %v2051_v9 = vunpack.c.l.s8.bf16 %v3714_v15  ;;  %v2048_v51 = vunpack.c.l.s8.bf16 %v3711_v49 }
 0x277   : > { %2176 = vmatprep.subr.bf16.mxu0 %v2033_v54  ;;  %2258 = vmatprep.subr.bf16.mxu1 %v2035_v56  ;;  %v2057_v54 = vunpack.c.h.s8.bf16 %v3712_v16  ;;  %v3720_v56 = vld [vmem:[%s4513_s28 + $0x2c8] sm:$0xff]  ;;  %v3743_v16 = vld [vmem:[%s4513_s28 + $0x380] sm:$0xff] }
 0x32c   : > { %v1576_v63 = vpop.f32.mrb[8].mxu0  ;;  %v1740_v1 = vpop.f32.mrb[8].mxu1 }
 0x32d   : > { %v1768_v4 = vmul.f32 %v1751_v58, %v1576_v63  ;;  %v1770_v5 = vmul.f32 %v1759_v59, %v1740_v1  ;;  %v1578_v6 = vpop.f32.mrb[9].mxu0  ;;  %v1742_v7 = vpop.f32.mrb[9].mxu1  ;;  %v2058_v58 = vunpack.c.h.s8.bf16 %v3713_v50  ;;  %v2065_v59 = vunpack.c.l.s8.bf16 %v3720_v56  ;;  %v3752_v50 = vld [vmem:[%s4513_s28 + $0x3c8] sm:$0xff] }
 0x32e   : > { %v1769_v8 = vmul.f32 %v1755_v60, %v1578_v6  ;;  %v1771_v11 = vmul.f32 %v1763_v61, %v1742_v7  ;;  %v1580_v12 = vpop.f32.mrb[10].mxu0  ;;  %v1744_v19 = vpop.f32.mrb[10].mxu1  ;;  %v3719_v60 = vld [vmem:[%s4513_s28 + $0x2c0] sm:$0xff]  ;;  %v2067_v61 = vunpack.c.l.s8.bf16 %v3722_v57  ;;  %v2073_v1 = vunpack.c.h.s8.bf16 %v3720_v56 }
 0x32f   : > { %v1793_v21 = vadd.f32 %v1776_v62, %v1768_v4  ;;  %v1795_v23 = vadd.f32 %v1784_v53, %v1770_v5  ;;  %v1581_v24 = vpop.f32.mrb[11].mxu0  ;;  %v1745_v26 = vpop.f32.mrb[11].mxu1  ;;  %v3721_v62 = vld [vmem:[%s4513_s28 + $0x2d0] sm:$0xff]  ;;  %v2064_v53 = vunpack.c.l.s8.bf16 %v3719_v60  ;;  %v3730_v4 = vld [vmem:[%s4513_s28 + $0x318] sm:$0xff]  ;;  %v2072_v5 = vunpack.c.h.s8.bf16 %v3719_v60  ;;  %v3751_v56 = vld [vmem:[%s4513_s28 + $0x3c0] sm:$0xff] }
 0x330   : > { %v1794_v29 = vadd.f32 %v1780_v2, %v1769_v8  ;;  %v1796_v30 = vadd.f32 %v1788_v3, %v1771_v11  ;;  %v2066_v63 = vunpack.c.l.s8.bf16 %v3721_v62  ;;  %v2075_v2 = vunpack.c.h.s8.bf16 %v3722_v57  ;;  %v3728_v3 = vld [vmem:[%s4513_s28 + $0x308] sm:$0xff]  ;;  %v3727_v8 = vld [vmem:[%s4513_s28 + $0x300] sm:$0xff]  ;;  %v3729_v12 = vld [vmem:[%s4513_s28 + $0x310] sm:$0xff] }
 0x331   : > { %v1797_v39 = vmax.f32 %v1793_v21, 0.0  ;;  %v1799_v31 = vmax.f32 %v1795_v23, 0.0  ;;  %v2074_v6 = vunpack.c.h.s8.bf16 %v3721_v62  ;;  %v2081_v7 = vunpack.c.l.s8.bf16 %v3728_v3  ;;  %v3736_v26 = vld [vmem:[%s4513_s28 + $0x348] sm:$0xff] }
 0x332   : > { %v1798_v34 = vmax.f32 %v1794_v29, 0.0  ;;  %v1800_v35 = vmax.f32 %v1796_v30, 0.0  ;;  %v2083_v11 = vunpack.c.l.s8.bf16 %v3730_v4  ;;  %v2080_v19 = vunpack.c.l.s8.bf16 %v3727_v8  ;;  %v3738_v29 = vld [vmem:[%s4513_s28 + $0x358] sm:$0xff]  ;;  %v3760_v62 = vld [vmem:[%s4513_s28 + $0x408] sm:$0xff] }
 0x333   : > { %v1801_v41 = vpack.c.bf16 %v1797_v39, %v1797_v39  ;;  %v1803_v42 = vpack.c.bf16 %v1799_v31, %v1799_v31  ;;  %v2082_v21 = vunpack.c.l.s8.bf16 %v3729_v12  ;;  %v2089_v23 = vunpack.c.h.s8.bf16 %v3728_v3  ;;  %v3759_v3 = vld [vmem:[%s4513_s28 + $0x400] sm:$0xff] }
 0x334   : > { %v1802_v13 = vpack.c.bf16 %v1798_v34, %v1798_v34  ;;  %v1804_v36 = vpack.c.bf16 %v1800_v35, %v1800_v35  ;;  %v2091_v24 = vunpack.c.h.s8.bf16 %v3730_v4  ;;  %v2088_v30 = vunpack.c.h.s8.bf16 %v3727_v8  ;;  %v3737_v34 = vld [vmem:[%s4513_s28 + $0x350] sm:$0xff] }
 0x335   : > { %v2090_v39 = vunpack.c.h.s8.bf16 %v3729_v12  ;;  %v2097_v31 = vunpack.c.l.s8.bf16 %v3736_v26  ;;  %v2099_v33 = vunpack.c.l.s8.bf16 %v3738_v29  ;;  %v2096_v35 = vunpack.c.l.s8.bf16 %v3735_v32  ;;  %v3768_v12 = vld [vmem:[%s4513_s28 + $0x448] sm:$0xff] }
 0x336   : > { %1885 = vmatprep.mubr.bf16.mxu0 %v1802_v13  ;;  %1925 = vmatprep.mubr.bf16.mxu1 %v1804_v36  ;;  %v2098_v13 = vunpack.c.l.s8.bf16 %v3737_v34  ;;  %v2105_v36 = vunpack.c.h.s8.bf16 %v3736_v26  ;;  %v2137_v60 = vunpack.c.h.s8.bf16 %v3752_v50  ;;  %v2153_v8 = vunpack.c.h.s8.bf16 %v3760_v62  ;;  %v3767_v26 = vld [vmem:[%s4513_s28 + $0x440] sm:$0xff] }
 0x337   : > { %1886 = vmatmul.mubr.bf16.vlgmr.msra.gmra.mrb[12].mxu0 %v1801_v41  ;;  %1926 = vmatmul.mubr.bf16.vlgmr.msra.gmra.mrb[12].mxu1 %v1803_v42  ;;  %v3746_v41 = vld [vmem:[%s4513_s28 + $0x398] sm:$0xff]  ;;  %v2104_v42 = vunpack.c.h.s8.bf16 %v3735_v32 }
 0x338   : > { %2177 = vmatpush1.bf16.msra.mxu0 %v2032_v38  ;;  %2259 = vmatpush1.bf16.msra.mxu1 %v2034_v40  ;;  %v2107_v38 = vunpack.c.h.s8.bf16 %v3738_v29  ;;  %v3744_v40 = vld [vmem:[%s4513_s28 + $0x388] sm:$0xff]  ;;  %v2115_v15 = vunpack.c.l.s8.bf16 %v3746_v41 }
 0x339   : > { %2178 = vmatprep.subr.bf16.mxu0 %v2041_v44  ;;  %2260 = vmatprep.subr.bf16.mxu1 %v2043_v45  ;;  %v2106_v44 = vunpack.c.h.s8.bf16 %v3737_v34  ;;  %v2113_v45 = vunpack.c.l.s8.bf16 %v3744_v40  ;;  %v2121_v49 = vunpack.c.h.s8.bf16 %v3744_v40 }
 0x33a   : > { %2208 = vmatprep.mubr.bf16.mxu0 %v4543_v22  ;;  %2290 = vmatprep.mubr.bf16.mxu1 %v4543_v22 }
 0x33c   : > { %2179 = vmatpush1.bf16.msra.mxu0 %v2040_v47  ;;  %2261 = vmatpush1.bf16.msra.mxu1 %v2042_v55  ;;  %v3745_v47 = vld [vmem:[%s4513_s28 + $0x390] sm:$0xff]  ;;  %v2112_v55 = vunpack.c.l.s8.bf16 %v3743_v16 }
 0x33d   : > { %2180 = vmatprep.subr.bf16.mxu0 %v2049_v48  ;;  %2262 = vmatprep.subr.bf16.mxu1 %v2051_v9  ;;  %v2114_v48 = vunpack.c.l.s8.bf16 %v3745_v47  ;;  %v2123_v9 = vunpack.c.h.s8.bf16 %v3746_v41  ;;  %v3707_v41 = vld [vmem:[%s4513_s28 + $0x260] sm:$0xff] }
 0x340   : > { %2181 = vmatpush1.bf16.msra.mxu0 %v2048_v51  ;;  %2263 = vmatpush1.bf16.msra.mxu1 %v2050_v52  ;;  %v3754_v51 = vld [vmem:[%s4513_s28 + $0x3d8] sm:$0xff]  ;;  %v2120_v52 = vunpack.c.h.s8.bf16 %v3743_v16 }
 0x341   : > { %2182 = vmatprep.subr.bf16.mxu0 %v2057_v54  ;;  %2264 = vmatprep.subr.bf16.mxu1 %v2059_v10  ;;  %v2122_v54 = vunpack.c.h.s8.bf16 %v3745_v47  ;;  %v2129_v10 = vunpack.c.l.s8.bf16 %v3752_v50  ;;  %v2131_v57 = vunpack.c.l.s8.bf16 %v3754_v51  ;;  %v3716_v47 = vld [vmem:[%s4513_s28 + $0x2a8] sm:$0xff] }
 0x342   : > { %v2053_v50 = vunpack.c.l.s8.bf16 %v3716_v47 }
 0x344   : > { %2183 = vmatpush1.bf16.msra.mxu0 %v2056_v18  ;;  %2265 = vmatpush1.bf16.msra.mxu1 %v2058_v58  ;;  %v3753_v18 = vld [vmem:[%s4513_s28 + $0x3d0] sm:$0xff]  ;;  %v2128_v58 = vunpack.c.l.s8.bf16 %v3751_v56 }
 0x345   : > { %2184 = vmatprep.subr.bf16.mxu0 %v2065_v59  ;;  %2266 = vmatprep.subr.bf16.mxu1 %v2067_v61  ;;  %v2130_v59 = vunpack.c.l.s8.bf16 %v3753_v18  ;;  %v2139_v61 = vunpack.c.h.s8.bf16 %v3754_v51  ;;  %v3715_v51 = vld [vmem:[%s4513_s28 + $0x2a0] sm:$0xff] }
 0x348   : > { %2185 = vmatpush1.bf16.msra.mxu0 %v2064_v53  ;;  %2267 = vmatpush1.bf16.msra.mxu1 %v2066_v63  ;;  %v3762_v53 = vld [vmem:[%s4513_s28 + $0x418] sm:$0xff]  ;;  %v2136_v63 = vunpack.c.h.s8.bf16 %v3751_v56 }
 0x349   : > { %2186 = vmatprep.subr.bf16.mxu0 %v2073_v1  ;;  %2268 = vmatprep.subr.bf16.mxu1 %v2075_v2  ;;  %v2138_v1 = vunpack.c.h.s8.bf16 %v3753_v18  ;;  %v2145_v2 = vunpack.c.l.s8.bf16 %v3760_v62  ;;  %v2147_v4 = vunpack.c.l.s8.bf16 %v3762_v53  ;;  %v3723_v62 = vld [vmem:[%s4513_s28 + $0x2e0] sm:$0xff] }
 0x34c   : > { %2187 = vmatpush1.bf16.msra.mxu0 %v2072_v5  ;;  %2269 = vmatpush1.bf16.msra.mxu1 %v2074_v6  ;;  %v3761_v5 = vld [vmem:[%s4513_s28 + $0x410] sm:$0xff]  ;;  %v2144_v6 = vunpack.c.l.s8.bf16 %v3759_v3 }
 0x34d   : > { %2188 = vmatprep.subr.bf16.mxu0 %v2081_v7  ;;  %2270 = vmatprep.subr.bf16.mxu1 %v2083_v11  ;;  %v2146_v7 = vunpack.c.l.s8.bf16 %v3761_v5  ;;  %v2155_v11 = vunpack.c.h.s8.bf16 %v3762_v53 }
 0x350   : > { %2189 = vmatpush1.bf16.msra.mxu0 %v2080_v19  ;;  %2271 = vmatpush1.bf16.msra.mxu1 %v2082_v21  ;;  %v3770_v19 = vld [vmem:[%s4513_s28 + $0x458] sm:$0xff]  ;;  %v2152_v21 = vunpack.c.h.s8.bf16 %v3759_v3 }
 0x351   : > { %2190 = vmatprep.subr.bf16.mxu0 %v2089_v23  ;;  %2272 = vmatprep.subr.bf16.mxu1 %v2091_v24  ;;  %v2154_v23 = vunpack.c.h.s8.bf16 %v3761_v5  ;;  %v2161_v24 = vunpack.c.l.s8.bf16 %v3768_v12  ;;  %v2163_v29 = vunpack.c.l.s8.bf16 %v3770_v19  ;;  %v2171_v34 = vunpack.c.h.s8.bf16 %v3770_v19  ;;  %v3732_v5 = vld [vmem:[%s4513_s28 + $0x328] sm:$0xff] }
 0x354   : > { %2191 = vmatpush1.bf16.msra.mxu0 %v2088_v30  ;;  %2273 = vmatpush1.bf16.msra.mxu1 %v2090_v39  ;;  %v3769_v30 = vld [vmem:[%s4513_s28 + $0x450] sm:$0xff]  ;;  %v2160_v39 = vunpack.c.l.s8.bf16 %v3767_v26 }
 0x355   : > { %2192 = vmatprep.subr.bf16.mxu0 %v2097_v31  ;;  %2274 = vmatprep.subr.bf16.mxu1 %v2099_v33  ;;  %v2169_v31 = vunpack.c.h.s8.bf16 %v3768_v12  ;;  %v2162_v32 = vunpack.c.l.s8.bf16 %v3769_v30  ;;  %v3708_v33 = vld [vmem:[%s4513_s28 + $0x268] sm:$0xff]  ;;  %v3731_v12 = vld [vmem:[%s4513_s28 + $0x320] sm:$0xff] }
 0x356   : > { %v2045_v16 = vunpack.c.h.s8.bf16 %v3708_v33 }
 0x358   : > { %2193 = vmatpush1.bf16.msra.mxu0 %v2096_v35  ;;  %2275 = vmatpush1.bf16.msra.mxu1 %v2098_v13  ;;  %v3710_v35 = vld [vmem:[%s4513_s28 + $0x278] sm:$0xff]  ;;  %v2168_v13 = vunpack.c.h.s8.bf16 %v3767_v26  ;;  %v2093_v26 = vunpack.c.h.s8.bf16 %v3732_v5 }
 0x359   : > { %2194 = vmatprep.subr.bf16.mxu0 %v2105_v36  ;;  %2276 = vmatprep.subr.bf16.mxu1 %v2107_v38  ;;  %v2037_v36 = vunpack.c.l.s8.bf16 %v3708_v33  ;;  %v2170_v38 = vunpack.c.h.s8.bf16 %v3769_v30  ;;  %v2039_v40 = vunpack.c.l.s8.bf16 %v3710_v35  ;;  %v3740_v30 = vld [vmem:[%s4513_s28 + $0x368] sm:$0xff] }
 0x35a   : > { %v2101_v33 = vunpack.c.l.s8.bf16 %v3740_v30 }
 0x35c   : > { %2195 = vmatpush1.bf16.msra.mxu0 %v2104_v42  ;;  %2277 = vmatpush1.bf16.msra.mxu1 %v2106_v44  ;;  %v3709_v42 = vld [vmem:[%s4513_s28 + $0x270] sm:$0xff]  ;;  %v2036_v44 = vunpack.c.l.s8.bf16 %v3707_v41 }
 0x35d   : > { %2196 = vmatprep.subr.bf16.mxu0 %v2113_v45  ;;  %2278 = vmatprep.subr.bf16.mxu1 %v2115_v15  ;;  %v2038_v45 = vunpack.c.l.s8.bf16 %v3709_v42  ;;  %v2047_v15 = vunpack.c.h.s8.bf16 %v3710_v35 }
 0x360   : > { %2197 = vmatpush1.bf16.msra.mxu0 %v2112_v55  ;;  %2279 = vmatpush1.bf16.msra.mxu1 %v2114_v48  ;;  %v3718_v55 = vld [vmem:[%s4513_s28 + $0x2b8] sm:$0xff]  ;;  %v4931_v48 = vld [vmem:[%s5215_s0 + $0x8] ss:$0 sps:$4 sm:$0xff]  }
 0x361   : > { %2198 = vmatprep.subr.bf16.mxu0 %v2121_v49  ;;  %2280 = vmatprep.subr.bf16.mxu1 %v2123_v9  ;;  %v2044_v49 = vunpack.c.h.s8.bf16 %v3707_v41  ;;  %v2046_v9 = vunpack.c.h.s8.bf16 %v3709_v42  ;;  %v2063_v18 = vunpack.c.h.s8.bf16 %v3718_v55  ;;  %v3748_v42 = vld [vmem:[%s4513_s28 + $0x3a8] sm:$0xff] }
 0x364   : > { %2199 = vmatpush1.bf16.msra.mxu0 %v2120_v52  ;;  %2281 = vmatpush1.bf16.msra.mxu1 %v2122_v54  ;;  %v2055_v52 = vunpack.c.l.s8.bf16 %v3718_v55  ;;  %v3717_v54 = vld [vmem:[%s4513_s28 + $0x2b0] sm:$0xff] }
 0x365   : > { %2200 = vmatprep.subr.bf16.mxu0 %v2129_v10  ;;  %2282 = vmatprep.subr.bf16.mxu1 %v2131_v57  ;;  %v2052_v10 = vunpack.c.l.s8.bf16 %v3715_v51  ;;  %v2054_v56 = vunpack.c.l.s8.bf16 %v3717_v54  ;;  %v2061_v57 = vunpack.c.h.s8.bf16 %v3716_v47  ;;  %v3747_v47 = vld [vmem:[%s4513_s28 + $0x3a0] sm:$0xff] }
 0x368   : > { %2201 = vmatpush1.bf16.msra.mxu0 %v2128_v58  ;;  %2283 = vmatpush1.bf16.msra.mxu1 %v2130_v59  ;;  %v3724_v58 = vld [vmem:[%s4513_s28 + $0x2e8] sm:$0xff]  ;;  %v3726_v59 = vld [vmem:[%s4513_s28 + $0x2f8] sm:$0xff] }
 0x369   : > { %2202 = vmatprep.subr.bf16.mxu0 %v2137_v60  ;;  %2284 = vmatprep.subr.bf16.mxu1 %v2139_v61  ;;  %v2060_v60 = vunpack.c.h.s8.bf16 %v3715_v51  ;;  %v2062_v61 = vunpack.c.h.s8.bf16 %v3717_v54  ;;  %v2071_v53 = vunpack.c.l.s8.bf16 %v3726_v59  ;;  %v2077_v3 = vunpack.c.h.s8.bf16 %v3724_v58  ;;  %v3756_v54 = vld [vmem:[%s4513_s28 + $0x3e8] sm:$0xff] }
 0x36a   : > { %v2125_v51 = vunpack.c.h.s8.bf16 %v3748_v42 }
 0x36c   : > { %2203 = vmatpush1.bf16.msra.mxu0 %v2136_v63  ;;  %2285 = vmatpush1.bf16.msra.mxu1 %v2138_v1  ;;  %v3725_v63 = vld [vmem:[%s4513_s28 + $0x2f0] sm:$0xff]  ;;  %v2068_v1 = vunpack.c.l.s8.bf16 %v3723_v62 }
 0x36d   : > { %2204 = vmatprep.subr.bf16.mxu0 %v2145_v2  ;;  %2286 = vmatprep.subr.bf16.mxu1 %v2147_v4  ;;  %v2070_v2 = vunpack.c.l.s8.bf16 %v3725_v63  ;;  %v2079_v4 = vunpack.c.h.s8.bf16 %v3726_v59 }
 0x370   : > { %2205 = vmatpush1.bf16.msra.mxu0 %v2144_v6  ;;  %2287 = vmatpush1.bf16.msra.mxu1 %v2146_v7  ;;  %v3734_v6 = vld [vmem:[%s4513_s28 + $0x338] sm:$0xff]  ;;  %v2076_v7 = vunpack.c.h.s8.bf16 %v3723_v62  ;;  %v2141_v62 = vunpack.c.h.s8.bf16 %v3756_v54 }
 0x371   : > { %2206 = vmatprep.subr.bf16.mxu0 %v2153_v8  ;;  %2288 = vmatprep.subr.bf16.mxu1 %v2155_v11  ;;  %v2078_v8 = vunpack.c.h.s8.bf16 %v3725_v63  ;;  %v2085_v11 = vunpack.c.l.s8.bf16 %v3732_v5  ;;  %v2087_v19 = vunpack.c.l.s8.bf16 %v3734_v6  ;;  %v3764_v63 = vld [vmem:[%s4513_s28 + $0x428] sm:$0xff]  ;;  %v3763_v5 = vld [vmem:[%s4513_s28 + $0x420] sm:$0xff] }
 0x374   : > { %2207 = vmatpush1.bf16.msra.mxu0 %v2152_v21  ;;  %2289 = vmatpush1.bf16.msra.mxu1 %v2154_v23  ;;  %v3733_v21 = vld [vmem:[%s4513_s28 + $0x330] sm:$0xff]  ;;  %v2084_v23 = vunpack.c.l.s8.bf16 %v3731_v12 }
 0x375   : > { %2217 = vmatprep.subr.bf16.mxu0 %v2161_v24  ;;  %2299 = vmatprep.subr.bf16.mxu1 %v2163_v29  ;;  %v2086_v24 = vunpack.c.l.s8.bf16 %v3733_v21  ;;  %v2095_v29 = vunpack.c.h.s8.bf16 %v3734_v6 }
 0x377   : > { %2209 = vmatmul.mubr.bf16.vlgmr.msra.gmra.mrb[16].mxu0 %v4574_v37  ;;  %2291 = vmatmul.mubr.bf16.vlgmr.msra.gmra.mrb[16].mxu1 %v4574_v37 }
 0x378   : > { %2218 = vmatpush1.bf16.msra.mxu0 %v2160_v39  ;;  %2249 = vmatprep.mubr.bf16.mxu0 %v4317_v46  ;;  %v3742_v39 = vld [vmem:[%s4513_s28 + $0x378] sm:$0xff] }
 0x379   : > { %2219 = vmatprep.subr.bf16.mxu0 %v2169_v31  ;;  %2300 = vmatpush1.bf16.msra.mxu1 %v2162_v32  ;;  %v2092_v31 = vunpack.c.h.s8.bf16 %v3731_v12  ;;  %v2094_v32 = vunpack.c.h.s8.bf16 %v3733_v21  ;;  %v2103_v35 = vunpack.c.l.s8.bf16 %v3742_v39  ;;  %v2111_v41 = vunpack.c.h.s8.bf16 %v3742_v39  ;;  %v3772_v21 = vld [vmem:[%s4513_s28 + $0x468] sm:$0xff] }
 0x37a   : > { %2301 = vmatprep.subr.bf16.mxu1 %v2171_v34  ;;  %2331 = vmatprep.mubr.bf16.mxu1 %v4317_v46  ;;  %v3739_v34 = vld [vmem:[%s4513_s28 + $0x360] sm:$0xff]  ;;  %v2157_v12 = vunpack.c.h.s8.bf16 %v3764_v63 }
 0x37c   : > { %2220 = vmatpush1.bf16.msra.mxu0 %v2168_v13  ;;  %v3741_v13 = vld [vmem:[%s4513_s28 + $0x370] sm:$0xff] }
 0x37d   : > { %2340 = vmatprep.subr.bf16.mxu0 %v2037_v36  ;;  %2302 = vmatpush1.bf16.msra.mxu1 %v2170_v38  ;;  %v2100_v36 = vunpack.c.l.s8.bf16 %v3739_v34  ;;  %v2102_v38 = vunpack.c.l.s8.bf16 %v3741_v13 }
 0x37e   : > { %2422 = vmatprep.subr.bf16.mxu1 %v2039_v40  ;;  %v2109_v40 = vunpack.c.h.s8.bf16 %v3740_v30  ;;  %v3771_v30 = vld [vmem:[%s4513_s28 + $0x460] sm:$0xff] }
 0x383   : > { %3775 = vmatmul.mubr.msk.bf16.vlgmr.msra.gmra.mrb[16].mxu0 %vm589_vm0, %v4931_v48  ;;  %3776 = vmatmul.mubr.msk.bf16.vlgmr.msra.gmra.mrb[16].mxu1 %vm589_vm0, %v4931_v48 }
 0x384   : > { %2341 = vmatpush1.bf16.msra.mxu0 %v2036_v44  ;;  %2423 = vmatpush1.bf16.msra.mxu1 %v2038_v45  ;;  %v3750_v44 = vld [vmem:[%s4513_s28 + $0x3b8] sm:$0xff]  ;;  %v2108_v45 = vunpack.c.h.s8.bf16 %v3739_v34 }
 0x385   : > { %2342 = vmatprep.subr.bf16.mxu0 %v2045_v16  ;;  %2424 = vmatprep.subr.bf16.mxu1 %v2047_v15  ;;  %v2110_v16 = vunpack.c.h.s8.bf16 %v3741_v13  ;;  %v2117_v15 = vunpack.c.l.s8.bf16 %v3748_v42  ;;  %v2119_v55 = vunpack.c.l.s8.bf16 %v3750_v44  ;;  %v3780_v13 = vld [vmem:[%s4521_s14 + $0x408] sm:$0xff] }
 0x386   : > { %2372 = vmatprep.mubr.bf16.mxu0 %v4543_v22  ;;  %2454 = vmatprep.mubr.bf16.mxu1 %v4543_v22  ;;  %v2069_v22 = vunpack.c.l.s8.bf16 %v3724_v58  ;;  %v3755_v58 = vld [vmem:[%s4513_s28 + $0x3e0] sm:$0xff] }
 0x388   : > { %2343 = vmatpush1.bf16.msra.mxu0 %v2044_v49  ;;  %2425 = vmatpush1.bf16.msra.mxu1 %v2046_v9  ;;  %v3749_v49 = vld [vmem:[%s4513_s28 + $0x3b0] sm:$0xff]  ;;  %v2116_v9 = vunpack.c.l.s8.bf16 %v3747_v47 }
 0x389   : > { %2344 = vmatprep.subr.bf16.mxu0 %v2053_v50  ;;  %2426 = vmatprep.subr.bf16.mxu1 %v2055_v52  ;;  %v2118_v50 = vunpack.c.l.s8.bf16 %v3749_v49  ;;  %v2127_v52 = vunpack.c.h.s8.bf16 %v3750_v44  ;;  %v3781_v44 = vld [vmem:[%s4521_s14 + $0x410] sm:$0xff] }
 0x38c   : > { %2345 = vmatpush1.bf16.msra.mxu0 %v2052_v10  ;;  %2427 = vmatpush1.bf16.msra.mxu1 %v2054_v56  ;;  %v3758_v10 = vld [vmem:[%s4513_s28 + $0x3f8] sm:$0xff]  ;;  %v2124_v56 = vunpack.c.h.s8.bf16 %v3747_v47 }
 0x38d   : > { %2346 = vmatprep.subr.bf16.mxu0 %v2061_v57  ;;  %2428 = vmatprep.subr.bf16.mxu1 %v2063_v18  ;;  %v2126_v57 = vunpack.c.h.s8.bf16 %v3749_v49  ;;  %v2133_v18 = vunpack.c.l.s8.bf16 %v3756_v54  ;;  %v2135_v59 = vunpack.c.l.s8.bf16 %v3758_v10  ;;  %v3786_v49 = vld [vmem:[%s4521_s14 + $0x438] sm:$0xff]  ;;  %v3785_v54 = vld [vmem:[%s4521_s14 + $0x430] sm:$0xff] }
 0x390   : > { %2347 = vmatpush1.bf16.msra.mxu0 %v2060_v60  ;;  %2429 = vmatpush1.bf16.msra.mxu1 %v2062_v61  ;;  %v3757_v60 = vld [vmem:[%s4513_s28 + $0x3f0] sm:$0xff]  ;;  %v2132_v61 = vunpack.c.l.s8.bf16 %v3755_v58 }
 0x391   : > { %2348 = vmatprep.subr.bf16.mxu0 %v2069_v22  ;;  %2430 = vmatprep.subr.bf16.mxu1 %v2071_v53  ;;  %v2134_v22 = vunpack.c.l.s8.bf16 %v3757_v60  ;;  %v2143_v53 = vunpack.c.h.s8.bf16 %v3758_v10 }
 0x394   : > { %2349 = vmatpush1.bf16.msra.mxu0 %v2068_v1  ;;  %2431 = vmatpush1.bf16.msra.mxu1 %v2070_v2  ;;  %v3766_v1 = vld [vmem:[%s4513_s28 + $0x438] sm:$0xff]  ;;  %v2140_v2 = vunpack.c.h.s8.bf16 %v3755_v58 }
 0x395   : > { %2350 = vmatprep.subr.bf16.mxu0 %v2077_v3  ;;  %2432 = vmatprep.subr.bf16.mxu1 %v2079_v4  ;;  %v2142_v3 = vunpack.c.h.s8.bf16 %v3757_v60  ;;  %v2149_v4 = vunpack.c.l.s8.bf16 %v3764_v63  ;;  %v2151_v6 = vunpack.c.l.s8.bf16 %v3766_v1  ;;  %v3790_v58 = vld [vmem:[%s4521_s14 + $0x458] sm:$0xff]  ;;  %v2761_v60 = vunpack.c.h.s8.bf16 %v3785_v54 }
 0x398   : > { %2351 = vmatpush1.bf16.msra.mxu0 %v2076_v7  ;;  %2433 = vmatpush1.bf16.msra.mxu1 %v2078_v8  ;;  %v3765_v7 = vld [vmem:[%s4513_s28 + $0x430] sm:$0xff]  ;;  %v2148_v8 = vunpack.c.l.s8.bf16 %v3763_v5 }
 0x399   : > { %2352 = vmatprep.subr.bf16.mxu0 %v2085_v11  ;;  %2434 = vmatprep.subr.bf16.mxu1 %v2087_v19  ;;  %v2150_v11 = vunpack.c.l.s8.bf16 %v3765_v7  ;;  %v2159_v19 = vunpack.c.h.s8.bf16 %v3766_v1 }
 0x39c   : > { %2353 = vmatpush1.bf16.msra.mxu0 %v2084_v23  ;;  %2435 = vmatpush1.bf16.msra.mxu1 %v2086_v24  ;;  %v3774_v23 = vld [vmem:[%s4513_s28 + $0x478] sm:$0xff]  ;;  %v2156_v24 = vunpack.c.h.s8.bf16 %v3763_v5 }
 0x39d   : > { %2354 = vmatprep.subr.bf16.mxu0 %v2093_v26  ;;  %2436 = vmatprep.subr.bf16.mxu1 %v2095_v29  ;;  %v2158_v26 = vunpack.c.h.s8.bf16 %v3765_v7  ;;  %v2165_v29 = vunpack.c.l.s8.bf16 %v3772_v21  ;;  %v2167_v39 = vunpack.c.l.s8.bf16 %v3774_v23  ;;  %v3794_v5 = vld [vmem:[%s4521_s14 + $0x478] sm:$0xff] }
 0x3a0   : > { %2355 = vmatpush1.bf16.msra.mxu0 %v2092_v31  ;;  %2437 = vmatpush1.bf16.msra.mxu1 %v2094_v32  ;;  %v3773_v31 = vld [vmem:[%s4513_s28 + $0x470] sm:$0xff]  ;;  %v2164_v32 = vunpack.c.l.s8.bf16 %v3771_v30 }
 0x3a1   : > { %2356 = vmatprep.subr.bf16.mxu0 %v2101_v33  ;;  %2438 = vmatprep.subr.bf16.mxu1 %v2103_v35  ;;  %v2173_v33 = vunpack.c.h.s8.bf16 %v3772_v21  ;;  %v2166_v34 = vunpack.c.l.s8.bf16 %v3773_v31  ;;  %v2175_v35 = vunpack.c.h.s8.bf16 %v3774_v23 }
 0x3a4   : > { %2357 = vmatpush1.bf16.msra.mxu0 %v2100_v36  ;;  %2439 = vmatpush1.bf16.msra.mxu1 %v2102_v38  ;;  %v3782_v36 = vld [vmem:[%s4521_s14 + $0x418] sm:$0xff]  ;;  %v2172_v38 = vunpack.c.h.s8.bf16 %v3771_v30 }
 0x3a5   : > { %2358 = vmatprep.subr.bf16.mxu0 %v2109_v40  ;;  %2440 = vmatprep.subr.bf16.mxu1 %v2111_v41  ;;  %v2174_v40 = vunpack.c.h.s8.bf16 %v3773_v31  ;;  %v2748_v41 = vunpack.c.l.s8.bf16 %v3780_v13  ;;  %v2750_v42 = vunpack.c.l.s8.bf16 %v3782_v36  ;;  %v2754_v47 = vunpack.c.h.s8.bf16 %v3782_v36  ;;  %v3798_v30 = vld [vmem:[%s4521_s14 + $0x498] sm:$0xff] }
 0x3a8   : > { %2359 = vmatpush1.bf16.msra.mxu0 %v2108_v45  ;;  %2441 = vmatpush1.bf16.msra.mxu1 %v2110_v16  ;;  %v2749_v16 = vunpack.c.l.s8.bf16 %v3781_v44 }
 0x3a9   : > { %2360 = vmatprep.subr.bf16.mxu0 %v2117_v15  ;;  %2442 = vmatprep.subr.bf16.mxu1 %v2119_v55  ;;  %v2752_v15 = vunpack.c.h.s8.bf16 %v3780_v13  ;;  %v3784_v55 = vld [vmem:[%s4521_s14 + $0x428] sm:$0xff] }
 0x3ac   : > { %2361 = vmatpush1.bf16.msra.mxu0 %v2116_v9  ;;  %2443 = vmatpush1.bf16.msra.mxu1 %v2118_v50  ;;  %v2753_v9 = vunpack.c.h.s8.bf16 %v3781_v44  ;;  %v2756_v50 = vunpack.c.l.s8.bf16 %v3784_v55 }
 0x3ad   : > { %2362 = vmatprep.subr.bf16.mxu0 %v2125_v51  ;;  %2444 = vmatprep.subr.bf16.mxu1 %v2127_v52  ;;  %v2758_v51 = vunpack.c.l.s8.bf16 %v3786_v49  ;;  %v3783_v52 = vld [vmem:[%s4521_s14 + $0x420] sm:$0xff] }
 0x3ae   : > { %v2755_v10 = vunpack.c.l.s8.bf16 %v3783_v52 }
 0x3b0   : > { %2363 = vmatpush1.bf16.msra.mxu0 %v2124_v56  ;;  %2445 = vmatpush1.bf16.msra.mxu1 %v2126_v57  ;;  %v2757_v56 = vunpack.c.l.s8.bf16 %v3785_v54  ;;  %v2762_v57 = vunpack.c.h.s8.bf16 %v3786_v49 }
 0x3b1   : > { %2364 = vmatprep.subr.bf16.mxu0 %v2133_v18  ;;  %2446 = vmatprep.subr.bf16.mxu1 %v2135_v59  ;;  %v3788_v18 = vld [vmem:[%s4521_s14 + $0x448] sm:$0xff]  ;;  %v2759_v59 = vunpack.c.h.s8.bf16 %v3783_v52 }
 0x3b4   : > { %2365 = vmatpush1.bf16.msra.mxu0 %v2132_v61  ;;  %2447 = vmatpush1.bf16.msra.mxu1 %v2134_v22  ;;  %v2764_v61 = vunpack.c.l.s8.bf16 %v3788_v18  ;;  %v2766_v22 = vunpack.c.l.s8.bf16 %v3790_v58 }
 0x3b5   : > { %2366 = vmatprep.subr.bf16.mxu0 %v2141_v62  ;;  %2448 = vmatprep.subr.bf16.mxu1 %v2143_v53  ;;  %v3787_v62 = vld [vmem:[%s4521_s14 + $0x440] sm:$0xff]  ;;  %v3789_v53 = vld [vmem:[%s4521_s14 + $0x450] sm:$0xff] }
 0x3b6   : > { %v2763_v63 = vunpack.c.l.s8.bf16 %v3787_v62  ;;  %v2765_v1 = vunpack.c.l.s8.bf16 %v3789_v53  ;;  %v2769_v7 = vunpack.c.h.s8.bf16 %v3789_v53 }
 0x3b8   : > { %2367 = vmatpush1.bf16.msra.mxu0 %v2140_v2  ;;  %2449 = vmatpush1.bf16.msra.mxu1 %v2142_v3  ;;  %v2768_v2 = vunpack.c.h.s8.bf16 %v3788_v18  ;;  %v2770_v3 = vunpack.c.h.s8.bf16 %v3790_v58 }
 0x3b9   : > { %2368 = vmatprep.subr.bf16.mxu0 %v2149_v4  ;;  %2450 = vmatprep.subr.bf16.mxu1 %v2151_v6  ;;  %v3792_v4 = vld [vmem:[%s4521_s14 + $0x468] sm:$0xff]  ;;  %v2767_v6 = vunpack.c.h.s8.bf16 %v3787_v62 }
 0x3bc   : > { %2369 = vmatpush1.bf16.msra.mxu0 %v2148_v8  ;;  %2451 = vmatpush1.bf16.msra.mxu1 %v2150_v11  ;;  %v2772_v8 = vunpack.c.l.s8.bf16 %v3792_v4  ;;  %v2774_v11 = vunpack.c.l.s8.bf16 %v3794_v5 }
 0x3bd   : > { %2370 = vmatprep.subr.bf16.mxu0 %v2157_v12  ;;  %2452 = vmatprep.subr.bf16.mxu1 %v2159_v19  ;;  %v3791_v12 = vld [vmem:[%s4521_s14 + $0x460] sm:$0xff]  ;;  %v3793_v19 = vld [vmem:[%s4521_s14 + $0x470] sm:$0xff] }
 0x3be   : > { %v2771_v21 = vunpack.c.l.s8.bf16 %v3791_v12  ;;  %v2773_v23 = vunpack.c.l.s8.bf16 %v3793_v19  ;;  %v2777_v31 = vunpack.c.h.s8.bf16 %v3793_v19 }
 0x3c0   : > { %2371 = vmatpush1.bf16.msra.mxu0 %v2156_v24  ;;  %2453 = vmatpush1.bf16.msra.mxu1 %v2158_v26  ;;  %v2776_v24 = vunpack.c.h.s8.bf16 %v3792_v4  ;;  %v2778_v26 = vunpack.c.h.s8.bf16 %v3794_v5 }
 0x3c1   : > { %2381 = vmatprep.subr.bf16.mxu0 %v2165_v29  ;;  %2463 = vmatprep.subr.bf16.mxu1 %v2167_v39  ;;  %v3796_v29 = vld [vmem:[%s4521_s14 + $0x488] sm:$0xff]  ;;  %v2775_v39 = vunpack.c.h.s8.bf16 %v3791_v12 }
 0x3c3   : > { %2373 = vmatmul.mubr.bf16.vlgmr.msra.gmra.mrb[20].mxu0 %v4574_v37  ;;  %2455 = vmatmul.mubr.bf16.vlgmr.msra.gmra.mrb[20].mxu1 %v4574_v37  ;;  %v3779_v37 = vld [vmem:[%s4521_s14 + $0x400] sm:$0xff] }
 0x3c4   : > { %2382 = vmatpush1.bf16.msra.mxu0 %v2164_v32  ;;  %2413 = vmatprep.mubr.bf16.mxu0 %v4317_v46  ;;  %v2747_v45 = vunpack.c.l.s8.bf16 %v3779_v37  ;;  %v2780_v32 = vunpack.c.l.s8.bf16 %v3796_v29 }
 0x3c5   : > { %2383 = vmatprep.subr.bf16.mxu0 %v2173_v33  ;;  %2464 = vmatpush1.bf16.msra.mxu1 %v2166_v34  ;;  %v2782_v33 = vunpack.c.l.s8.bf16 %v3798_v30  ;;  %v3795_v34 = vld [vmem:[%s4521_s14 + $0x480] sm:$0xff] }
 0x3c6   : > { %2465 = vmatprep.subr.bf16.mxu1 %v2175_v35  ;;  %2495 = vmatprep.mubr.bf16.mxu1 %v4317_v46  ;;  %v2751_v46 = vunpack.c.h.s8.bf16 %v3779_v37  ;;  %v3797_v35 = vld [vmem:[%s4521_s14 + $0x490] sm:$0xff]  ;;  %v2779_v13 = vunpack.c.l.s8.bf16 %v3795_v34  ;;  %v2783_v37 = vunpack.c.h.s8.bf16 %v3795_v34 }
 0x3c7   : > { %v2781_v36 = vunpack.c.l.s8.bf16 %v3797_v35  ;;  %v2785_v44 = vunpack.c.h.s8.bf16 %v3797_v35 }
 0x3c8   : > { %2384 = vmatpush1.bf16.msra.mxu0 %v2172_v38  ;;  %v2784_v38 = vunpack.c.h.s8.bf16 %v3796_v29 }
 0x3c9   : > { %2466 = vmatpush1.bf16.msra.mxu1 %v2174_v40  ;;  %3003 = vmatprep.subr.bf16.mxu0 %v2748_v41  ;;  %v2786_v40 = vunpack.c.h.s8.bf16 %v3798_v30  ;;  %v3800_v41 = vld [vmem:[%s4521_s14 + $0x4a8] sm:$0xff] }
 0x3ca   : > { %3167 = vmatprep.subr.bf16.mxu1 %v2750_v42  ;;  %v3802_v42 = vld [vmem:[%s4521_s14 + $0x4b8] sm:$0xff] }
 0x3cf   : > { %3777 = vmatmul.mubr.msk.bf16.vlgmr.msra.gmra.mrb[20].mxu0 %vm589_vm0, %v4931_v48  ;;  %3778 = vmatmul.mubr.msk.bf16.vlgmr.msra.gmra.mrb[20].mxu1 %vm589_vm0, %v4931_v48  ;;  %v2760_v48 = vunpack.c.h.s8.bf16 %v3784_v55 }
 0x3d0   : > { %3004 = vmatpush1.bf16.msra.mxu0 %v2747_v45  ;;  %3168 = vmatpush1.bf16.msra.mxu1 %v2749_v16  ;;  %v2788_v45 = vunpack.c.l.s8.bf16 %v3800_v41  ;;  %v2790_v16 = vunpack.c.l.s8.bf16 %v3802_v42 }
 0x3d1   : > { %3005 = vmatprep.subr.bf16.mxu0 %v2752_v15  ;;  %3169 = vmatprep.subr.bf16.mxu1 %v2754_v47  ;;  %v3799_v15 = vld [vmem:[%s4521_s14 + $0x4a0] sm:$0xff]  ;;  %v3801_v47 = vld [vmem:[%s4521_s14 + $0x4b0] sm:$0xff] }
 0x3d2   : > { %v2787_v55 = vunpack.c.l.s8.bf16 %v3799_v15  ;;  %v2789_v49 = vunpack.c.l.s8.bf16 %v3801_v47  ;;  %v2791_v52 = vunpack.c.h.s8.bf16 %v3799_v15  ;;  %v2793_v54 = vunpack.c.h.s8.bf16 %v3801_v47 }
 0x3d4   : > { %3006 = vmatpush1.bf16.msra.mxu0 %v2751_v46  ;;  %3170 = vmatpush1.bf16.msra.mxu1 %v2753_v9  ;;  %v2792_v46 = vunpack.c.h.s8.bf16 %v3800_v41  ;;  %v2794_v9 = vunpack.c.h.s8.bf16 %v3802_v42 }
 0x3d5   : > { %3007 = vmatprep.subr.bf16.mxu0 %v2756_v50  ;;  %3171 = vmatprep.subr.bf16.mxu1 %v2758_v51  ;;  %v3804_v50 = vld [vmem:[%s4521_s14 + $0x4c8] sm:$0xff]  ;;  %v3806_v51 = vld [vmem:[%s4521_s14 + $0x4d8] sm:$0xff] }
 0x3d8   : > { %3008 = vmatpush1.bf16.msra.mxu0 %v2755_v10  ;;  %3172 = vmatpush1.bf16.msra.mxu1 %v2757_v56  ;;  %v2796_v10 = vunpack.c.l.s8.bf16 %v3804_v50  ;;  %v2798_v56 = vunpack.c.l.s8.bf16 %v3806_v51 }
 0x3d9   : > { %3009 = vmatprep.subr.bf16.mxu0 %v2760_v48  ;;  %3173 = vmatprep.subr.bf16.mxu1 %v2762_v57  ;;  %v3803_v48 = vld [vmem:[%s4521_s14 + $0x4c0] sm:$0xff]  ;;  %v3805_v57 = vld [vmem:[%s4521_s14 + $0x4d0] sm:$0xff] }
 0x3da   : > { %v2795_v18 = vunpack.c.l.s8.bf16 %v3803_v48  ;;  %v2797_v58 = vunpack.c.l.s8.bf16 %v3805_v57  ;;  %v2799_v62 = vunpack.c.h.s8.bf16 %v3803_v48  ;;  %v2801_v53 = vunpack.c.h.s8.bf16 %v3805_v57 }
 0x3dc   : > { %3010 = vmatpush1.bf16.msra.mxu0 %v2759_v59  ;;  %3174 = vmatpush1.bf16.msra.mxu1 %v2761_v60  ;;  %v2800_v59 = vunpack.c.h.s8.bf16 %v3804_v50  ;;  %v2802_v60 = vunpack.c.h.s8.bf16 %v3806_v51 }
 0x3dd   : > { %3011 = vmatprep.subr.bf16.mxu0 %v2764_v61  ;;  %3175 = vmatprep.subr.bf16.mxu1 %v2766_v22  ;;  %v3808_v61 = vld [vmem:[%s4521_s14 + $0x4e8] sm:$0xff]  ;;  %v3810_v22 = vld [vmem:[%s4521_s14 + $0x4f8] sm:$0xff] }
 0x3e0   : > { %3012 = vmatpush1.bf16.msra.mxu0 %v2763_v63  ;;  %3176 = vmatpush1.bf16.msra.mxu1 %v2765_v1  ;;  %v2804_v63 = vunpack.c.l.s8.bf16 %v3808_v61  ;;  %v2806_v1 = vunpack.c.l.s8.bf16 %v3810_v22 }
 0x3e1   : > { %3013 = vmatprep.subr.bf16.mxu0 %v2768_v2  ;;  %3177 = vmatprep.subr.bf16.mxu1 %v2770_v3  ;;  %v3807_v2 = vld [vmem:[%s4521_s14 + $0x4e0] sm:$0xff]  ;;  %v3809_v3 = vld [vmem:[%s4521_s14 + $0x4f0] sm:$0xff] }
 0x3e2   : > { %v2803_v4 = vunpack.c.l.s8.bf16 %v3807_v2  ;;  %v2805_v5 = vunpack.c.l.s8.bf16 %v3809_v3  ;;  %v2807_v12 = vunpack.c.h.s8.bf16 %v3807_v2  ;;  %v2809_v19 = vunpack.c.h.s8.bf16 %v3809_v3  ;;  %v3816_v2 = vld [vmem:[%s4521_s14 + $0x528] sm:$0xff]  ;;  %v3818_v3 = vld [vmem:[%s4521_s14 + $0x538] sm:$0xff] }
 0x3e4   : > { %3014 = vmatpush1.bf16.msra.mxu0 %v2767_v6  ;;  %3178 = vmatpush1.bf16.msra.mxu1 %v2769_v7  ;;  %v2808_v6 = vunpack.c.h.s8.bf16 %v3808_v61  ;;  %v2810_v7 = vunpack.c.h.s8.bf16 %v3810_v22 }
 0x3e5   : > { %3015 = vmatprep.subr.bf16.mxu0 %v2772_v8  ;;  %3179 = vmatprep.subr.bf16.mxu1 %v2774_v11  ;;  %v5010_v8 = vld [vmem:[%s4521_s14 + $0x508] sm:$0xff]  ;;  %v5013_v11 = vld [vmem:[%s4521_s14 + $0x518] sm:$0xff] }
 0x3e8   : > { %3016 = vmatpush1.bf16.msra.mxu0 %v2771_v21  ;;  %3180 = vmatpush1.bf16.msra.mxu1 %v2773_v23  ;;  %v2812_v21 = vunpack.c.l.s8.bf16 %v5010_v8  ;;  %v2814_v23 = vunpack.c.l.s8.bf16 %v5013_v11 }
 0x3e9   : > { %3017 = vmatprep.subr.bf16.mxu0 %v2776_v24  ;;  %3181 = vmatprep.subr.bf16.mxu1 %v2778_v26 }
 0x3ec   : > { %3018 = vmatpush1.bf16.msra.mxu0 %v2775_v39  ;;  %3182 = vmatpush1.bf16.msra.mxu1 %v2777_v31 }
 0x3ed   : > { %3019 = vmatprep.subr.bf16.mxu0 %v2780_v32  ;;  %3183 = vmatprep.subr.bf16.mxu1 %v2782_v33 }
 0x3f0   : > { %3020 = vmatpush1.bf16.msra.mxu0 %v2779_v13  ;;  %3184 = vmatpush1.bf16.msra.mxu1 %v2781_v36  ;;  %v5020_v36 = vld [vmem:[%s4680_s9 + $0x1a] ss:$2 sm:$0xff] }
 0x3f1   : > { %3021 = vmatprep.subr.bf16.mxu0 %v2784_v38  ;;  %3185 = vmatprep.subr.bf16.mxu1 %v2786_v40  ;;  %v5023_v38 = vld [vmem:[%s4680_s9 + $0x1b] ss:$2 sm:$0xff]  ;;  %v2508_v40 = vrot.slane %v5020_v36, %v4678_v14  ;;  %v2512_v41 = vrot.slane %v5020_v36, %v4686_v17  ;;  %v2520_v42 = vrot.slane %v5020_v36, %v4700_v25 }
 0x3f2   : > { %v2569_v15 = vrot.slane %v5023_v38, %v4700_v25 }
 0x3f4   : > { %3022 = vmatpush1.bf16.msra.mxu0 %v2783_v37  ;;  %3186 = vmatpush1.bf16.msra.mxu1 %v2785_v44  ;;  %v2557_v37 = vrot.slane %v5023_v38, %v4678_v14 }
 0x3f5   : > { %3023 = vmatprep.subr.bf16.mxu0 %v2788_v45  ;;  %3187 = vmatprep.subr.bf16.mxu1 %v2790_v16  ;;  %v2561_v45 = vrot.slane %v5023_v38, %v4686_v17 }
 0x3f8   : > { %3024 = vmatpush1.bf16.msra.mxu0 %v2787_v55  ;;  %3188 = vmatpush1.bf16.msra.mxu1 %v2789_v49 }
 0x3f9   : > { %3025 = vmatprep.subr.bf16.mxu0 %v2792_v46  ;;  %3189 = vmatprep.subr.bf16.mxu1 %v2794_v9 }
 0x3fc   : > { %3026 = vmatpush1.bf16.msra.mxu0 %v2791_v52  ;;  %3190 = vmatpush1.bf16.msra.mxu1 %v2793_v54 }
 0x3fd   : > { %3027 = vmatprep.subr.bf16.mxu0 %v2796_v10  ;;  %3191 = vmatprep.subr.bf16.mxu1 %v2798_v56 }
 0x400   : > { %3028 = vmatpush1.bf16.msra.mxu0 %v2795_v18  ;;  %3192 = vmatpush1.bf16.msra.mxu1 %v2797_v58  ;;  %v3811_v18 = vld [vmem:[%s4521_s14 + $0x500] sm:$0xff]  ;;  %v3813_v58 = vld [vmem:[%s4521_s14 + $0x510] sm:$0xff] }
 0x401   : > { %3029 = vmatprep.subr.bf16.mxu0 %v2800_v59  ;;  %3193 = vmatprep.subr.bf16.mxu1 %v2802_v60  ;;  %v2811_v22 = vunpack.c.l.s8.bf16 %v3811_v18 }
 0x404   : > { %3030 = vmatpush1.bf16.msra.mxu0 %v2799_v62  ;;  %3194 = vmatpush1.bf16.msra.mxu1 %v2801_v53  ;;  %v2813_v62 = vunpack.c.l.s8.bf16 %v3813_v58 }
 0x405   : > { %3031 = vmatprep.subr.bf16.mxu0 %v2804_v63  ;;  %3195 = vmatprep.subr.bf16.mxu1 %v2806_v1  ;;  %v2816_v63 = vunpack.c.h.s8.bf16 %v5010_v8  ;;  %v2818_v1 = vunpack.c.h.s8.bf16 %v5013_v11  ;;  %v2822_v8 = vunpack.c.l.s8.bf16 %v3818_v3  ;;  %v3815_v11 = vld [vmem:[%s4521_s14 + $0x520] sm:$0xff] }
 0x408   : > { %3032 = vmatpush1.bf16.msra.mxu0 %v2803_v4  ;;  %3196 = vmatpush1.bf16.msra.mxu1 %v2805_v5  ;;  %v2815_v5 = vunpack.c.h.s8.bf16 %v3811_v18 }
 0x409   : > { %3033 = vmatprep.subr.bf16.mxu0 %v2808_v6  ;;  %3197 = vmatprep.subr.bf16.mxu1 %v2810_v7  ;;  %v2817_v6 = vunpack.c.h.s8.bf16 %v3813_v58  ;;  %v2820_v7 = vunpack.c.l.s8.bf16 %v3816_v2  ;;  %v3827_v58 = vld [vmem:[%s4521_s14 + $0x580] sm:$0xff] }
 0x40a   : > { %v3947_v24 = vpop.f32.mrb[12].mxu0  ;;  %v3969_v26 = vpop.f32.mrb[12].mxu1 }
 0x40b   : > { %v3948_v29 = vpop.f32.mrb[13].mxu0  ;;  %v3970_v30 = vpop.f32.mrb[13].mxu1 }
 0x40c   : > { %v3949_v39 = vadd.f32 %v3948_v29, %v3947_v24  ;;  %v3971_v31 = vadd.f32 %v3970_v30, %v3969_v26  ;;  %v3950_v32 = vpop.f32.mrb[14].mxu0  ;;  %v3972_v33 = vpop.f32.mrb[14].mxu1  ;;  %3034 = vmatpush1.bf16.msra.mxu0 %v2807_v12  ;;  %3198 = vmatpush1.bf16.msra.mxu1 %v2809_v19  ;;  %v3817_v12 = vld [vmem:[%s4521_s14 + $0x530] sm:$0xff]  ;;  %v2819_v19 = vunpack.c.l.s8.bf16 %v3815_v11  ;;  %v2826_v24 = vunpack.c.h.s8.bf16 %v3818_v3  ;;  %v3820_v26 = vld [vmem:[%s4521_s14 + $0x548] sm:$0xff]  ;;  %v3822_v29 = vld [vmem:[%s4521_s14 + $0x558] sm:$0xff] }
 0x40d   : > { %v3951_v34 = vpop.f32.mrb[15].mxu0  ;;  %v3973_v35 = vpop.f32.mrb[15].mxu1  ;;  %3044 = vmatprep.subr.bf16.mxu0 %v2812_v21  ;;  %3208 = vmatprep.subr.bf16.mxu1 %v2814_v23  ;;  %v2821_v21 = vunpack.c.l.s8.bf16 %v3817_v12  ;;  %v2824_v23 = vunpack.c.h.s8.bf16 %v3816_v2  ;;  %v2823_v30 = vunpack.c.h.s8.bf16 %v3815_v11  ;;  %v2830_v32 = vunpack.c.l.s8.bf16 %v3822_v29  ;;  %v3819_v33 = vld [vmem:[%s4521_s14 + $0x540] sm:$0xff] }
 0x40e   : > { %v5017_v13 = vadd.f32 %v3971_v31, %v3949_v39  ;;  %v2825_v39 = vunpack.c.h.s8.bf16 %v3817_v12  ;;  %v2828_v31 = vunpack.c.l.s8.bf16 %v3820_v26  ;;  %v3821_v34 = vld [vmem:[%s4521_s14 + $0x550] sm:$0xff]  ;;  %v2827_v35 = vunpack.c.l.s8.bf16 %v3819_v33 }
 0x456   : > { %v2251_v44 = vpop.f32.mrb[16].mxu0  ;;  %v5035_v16 = vpop.f32.mrb[16].mxu1 }
 0x457   : > { %v2545_v47 = vmul.f32 %v2508_v40, %v2251_v44  ;;  %v2253_v55 = vpop.f32.mrb[17].mxu0  ;;  %v2335_v49 = vpop.f32.mrb[17].mxu1  ;;  %v2829_v40 = vunpack.c.l.s8.bf16 %v3821_v34  ;;  %v3826_v44 = vld [vmem:[%s4521_s14 + $0x578] sm:$0xff] }
 0x458   : > { %v2546_v46 = vmul.f32 %v2512_v41, %v2253_v55  ;;  %v2255_v9 = vpop.f32.mrb[18].mxu0  ;;  %v2548_v50 = vmul.f32 %v2520_v42, %v2335_v49  ;;  %v2337_v51 = vpop.f32.mrb[18].mxu1  ;;  %v2832_v41 = vunpack.c.h.s8.bf16 %v3820_v26  ;;  %v2834_v42 = vunpack.c.h.s8.bf16 %v3822_v29  ;;  %v3823_v49 = vld [vmem:[%s4521_s14 + $0x560] sm:$0xff] }
 0x459   : > { %v2594_v52 = vadd.f32 %v2557_v37, %v2545_v47  ;;  %v2256_v54 = vpop.f32.mrb[19].mxu0  ;;  %v2338_v10 = vpop.f32.mrb[19].mxu1  ;;  %v3824_v37 = vld [vmem:[%s4521_s14 + $0x568] sm:$0xff]  ;;  %v2838_v55 = vunpack.c.l.s8.bf16 %v3826_v44  ;;  %v2835_v9 = vunpack.c.l.s8.bf16 %v3823_v49 }
 0x45a   : > { %v2595_v56 = vadd.f32 %v2561_v45, %v2546_v46  ;;  %v2597_v48 = vadd.f32 %v2569_v15, %v2548_v50  ;;  %v2831_v45 = vunpack.c.h.s8.bf16 %v3819_v33  ;;  %v2833_v15 = vunpack.c.h.s8.bf16 %v3821_v34  ;;  %v3825_v46 = vld [vmem:[%s4521_s14 + $0x570] sm:$0xff]  ;;  %v3828_v54 = vld [vmem:[%s4521_s14 + $0x588] sm:$0xff]  ;;  %v3830_v10 = vld [vmem:[%s4521_s14 + $0x598] sm:$0xff] }
 0x45b   : > { %v2602_v57 = vmax.f32 %v2594_v52, 0.0  ;;  %v2836_v47 = vunpack.c.l.s8.bf16 %v3824_v37  ;;  %v2837_v50 = vunpack.c.l.s8.bf16 %v3825_v46  ;;  %v2840_v51 = vunpack.c.h.s8.bf16 %v3824_v37 }
 0x45c   : > { %v2603_v59 = vmax.f32 %v2595_v56, 0.0  ;;  %v2605_v60 = vmax.f32 %v2597_v48, 0.0  ;;  %v2842_v52 = vunpack.c.h.s8.bf16 %v3826_v44  ;;  %v2839_v56 = vunpack.c.h.s8.bf16 %v3823_v49  ;;  %v3841_v49 = vld [vmem:[%s4521_s14 + $0x5f0] sm:$0xff] }
 0x45d   : > { %v2610_v53 = vpack.c.bf16 %v2602_v57, %v2602_v57  ;;  %v2841_v48 = vunpack.c.h.s8.bf16 %v3825_v46  ;;  %v2844_v57 = vunpack.c.l.s8.bf16 %v3828_v54  ;;  %v2846_v18 = vunpack.c.l.s8.bf16 %v3830_v10 }
 0x45e   : > { %v2611_v61 = vpack.c.bf16 %v2603_v59, %v2603_v59  ;;  %v2613_v4 = vpack.c.bf16 %v2605_v60, %v2605_v60  ;;  %v3829_v59 = vld [vmem:[%s4521_s14 + $0x590] sm:$0xff]  ;;  %v2843_v60 = vunpack.c.l.s8.bf16 %v3827_v58  ;;  %v2516_v33 = vrot.slane %v5020_v36, %v4734_v0 }
 0x45f   : > { %v2849_v2 = vunpack.c.h.s8.bf16 %v3829_v59 }
 0x460   : > { %3035 = vmatprep.mubr.bf16.mxu0 %v2611_v61  ;;  %3199 = vmatprep.mubr.bf16.mxu1 %v2611_v61  ;;  %v2845_v61 = vunpack.c.l.s8.bf16 %v3829_v59  ;;  %v2547_v44 = vmul.f32 %v2516_v33, %v5035_v16  ;;  %v3845_v59 = vld [vmem:[%s4521_s14 + $0x610] sm:$0xff] }
 0x461   : > { %3036 = vmatmul.mubr.bf16.vlgmr.msra.gmra.mrb[24].mxu0 %v2610_v53  ;;  %3200 = vmatmul.mubr.bf16.vlgmr.msra.gmra.mrb[24].mxu1 %v2610_v53  ;;  %v3832_v53 = vld [vmem:[%s4521_s14 + $0x5a8] sm:$0xff] }
 0x462   : > { %3045 = vmatpush1.bf16.msra.mxu0 %v2811_v22  ;;  %3209 = vmatpush1.bf16.msra.mxu1 %v2813_v62  ;;  %v2848_v22 = vunpack.c.h.s8.bf16 %v3828_v54  ;;  %v2850_v62 = vunpack.c.h.s8.bf16 %v3830_v10  ;;  %v2852_v3 = vunpack.c.l.s8.bf16 %v3832_v53  ;;  %v2856_v11 = vunpack.c.h.s8.bf16 %v3832_v53  ;;  %v3846_v54 = vld [vmem:[%s4521_s14 + $0x618] sm:$0xff] }
 0x463   : > { %3046 = vmatprep.subr.bf16.mxu0 %v2816_v63  ;;  %3210 = vmatprep.subr.bf16.mxu1 %v2818_v1  ;;  %v3834_v63 = vld [vmem:[%s4521_s14 + $0x5b8] sm:$0xff]  ;;  %v2847_v1 = vunpack.c.h.s8.bf16 %v3827_v58  ;;  %v3843_v58 = vld [vmem:[%s4521_s14 + $0x600] sm:$0xff]  ;;  %v2882_v53 = vunpack.c.h.s8.bf16 %v3846_v54 }
 0x464   : > { %3076 = vmatprep.mubr.bf16.mxu0 %v2613_v4  ;;  %3240 = vmatprep.mubr.bf16.mxu1 %v2613_v4  ;;  %v2854_v4 = vunpack.c.l.s8.bf16 %v3834_v63  ;;  %v2858_v12 = vunpack.c.h.s8.bf16 %v3834_v63  ;;  %v3848_v63 = vld [vmem:[%s4521_s14 + $0x628] sm:$0xff] }
 0x465   : > { %v2888_v33 = vunpack.c.h.s8.bf16 %v3848_v63 }
 0x466   : > { %3047 = vmatpush1.bf16.msra.mxu0 %v2815_v5  ;;  %3211 = vmatpush1.bf16.msra.mxu1 %v2817_v6  ;;  %v3831_v5 = vld [vmem:[%s4521_s14 + $0x5a0] sm:$0xff]  ;;  %v3833_v6 = vld [vmem:[%s4521_s14 + $0x5b0] sm:$0xff] }
 0x467   : > { %3048 = vmatprep.subr.bf16.mxu0 %v2820_v7  ;;  %3212 = vmatprep.subr.bf16.mxu1 %v2822_v8  ;;  %v2851_v7 = vunpack.c.l.s8.bf16 %v3831_v5  ;;  %v2853_v8 = vunpack.c.l.s8.bf16 %v3833_v6 }
 0x46a   : > { %3049 = vmatpush1.bf16.msra.mxu0 %v2819_v19  ;;  %3213 = vmatpush1.bf16.msra.mxu1 %v2821_v21  ;;  %v3836_v19 = vld [vmem:[%s4521_s14 + $0x5c8] sm:$0xff]  ;;  %v3838_v21 = vld [vmem:[%s4521_s14 + $0x5d8] sm:$0xff] }
 0x46b   : > { %3050 = vmatprep.subr.bf16.mxu0 %v2824_v23  ;;  %3214 = vmatprep.subr.bf16.mxu1 %v2826_v24  ;;  %v2855_v23 = vunpack.c.h.s8.bf16 %v3831_v5  ;;  %v2857_v24 = vunpack.c.h.s8.bf16 %v3833_v6  ;;  %v2860_v26 = vunpack.c.l.s8.bf16 %v3836_v19  ;;  %v2862_v29 = vunpack.c.l.s8.bf16 %v3838_v21 }
 0x46c   : > { %v2864_v34 = vunpack.c.h.s8.bf16 %v3836_v19  ;;  %v2577_v6 = vrot.slane %v5023_v38, %v4752_v43  ;;  %v3849_v19 = vld [vmem:[%s4521_s14 + $0x630] sm:$0xff] }
 0x46e   : > { %3051 = vmatpush1.bf16.msra.mxu0 %v2823_v30  ;;  %3215 = vmatpush1.bf16.msra.mxu1 %v2825_v39  ;;  %v3835_v30 = vld [vmem:[%s4521_s14 + $0x5c0] sm:$0xff]  ;;  %v3837_v39 = vld [vmem:[%s4521_s14 + $0x5d0] sm:$0xff] }
 0x46f   : > { %3052 = vmatprep.subr.bf16.mxu0 %v2828_v31  ;;  %3216 = vmatprep.subr.bf16.mxu1 %v2830_v32  ;;  %v2859_v31 = vunpack.c.l.s8.bf16 %v3835_v30  ;;  %v2861_v32 = vunpack.c.l.s8.bf16 %v3837_v39  ;;  %v2865_v37 = vunpack.c.h.s8.bf16 %v3837_v39 }
 0x472   : > { %3053 = vmatpush1.bf16.msra.mxu0 %v2827_v35  ;;  %3217 = vmatpush1.bf16.msra.mxu1 %v2829_v40  ;;  %v2866_v35 = vunpack.c.h.s8.bf16 %v3838_v21  ;;  %v3840_v40 = vld [vmem:[%s4521_s14 + $0x5e8] sm:$0xff] }
 0x473   : > { %3054 = vmatprep.subr.bf16.mxu0 %v2832_v41  ;;  %3218 = vmatprep.subr.bf16.mxu1 %v2834_v42  ;;  %v3842_v41 = vld [vmem:[%s4521_s14 + $0x5f8] sm:$0xff]  ;;  %v2863_v42 = vunpack.c.h.s8.bf16 %v3835_v30  ;;  %v2872_v16 = vunpack.c.h.s8.bf16 %v3840_v40 }
 0x476   : > { %3055 = vmatpush1.bf16.msra.mxu0 %v2831_v45  ;;  %3219 = vmatpush1.bf16.msra.mxu1 %v2833_v15  ;;  %v2565_v45 = vrot.slane %v5023_v38, %v4734_v0  ;;  %v2868_v15 = vunpack.c.l.s8.bf16 %v3840_v40  ;;  %v3854_v40 = vld [vmem:[%s4521_s14 + $0x658] sm:$0xff] }
 0x477   : > { %3056 = vmatprep.subr.bf16.mxu0 %v2836_v47  ;;  %3220 = vmatprep.subr.bf16.mxu1 %v2838_v55  ;;  %v2870_v47 = vunpack.c.l.s8.bf16 %v3842_v41  ;;  %v3839_v55 = vld [vmem:[%s4521_s14 + $0x5e0] sm:$0xff] }
 0x478   : > { %v2867_v46 = vunpack.c.l.s8.bf16 %v3839_v55  ;;  %v2871_v10 = vunpack.c.h.s8.bf16 %v3839_v55  ;;  %v3853_v55 = vld [vmem:[%s4521_s14 + $0x650] sm:$0xff] }
 0x47a   : > { %3057 = vmatpush1.bf16.msra.mxu0 %v2835_v9  ;;  %3221 = vmatpush1.bf16.msra.mxu1 %v2837_v50  ;;  %v2869_v9 = vunpack.c.l.s8.bf16 %v3841_v49  ;;  %v2596_v50 = vadd.f32 %v2565_v45, %v2547_v44 }
 0x47b   : > { %3058 = vmatprep.subr.bf16.mxu0 %v2840_v51  ;;  %3222 = vmatprep.subr.bf16.mxu1 %v2842_v52  ;;  %v2874_v51 = vunpack.c.h.s8.bf16 %v3842_v41  ;;  %v3844_v52 = vld [vmem:[%s4521_s14 + $0x608] sm:$0xff] }
 0x47e   : > { %3059 = vmatpush1.bf16.msra.mxu0 %v2839_v56  ;;  %3223 = vmatpush1.bf16.msra.mxu1 %v2841_v48  ;;  %v2873_v56 = vunpack.c.h.s8.bf16 %v3841_v49  ;;  %v2604_v48 = vmax.f32 %v2596_v50, 0.0  ;;  %v2898_v50 = vunpack.c.h.s8.bf16 %v3854_v40 }
 0x47f   : > { %3060 = vmatprep.subr.bf16.mxu0 %v2844_v57  ;;  %3224 = vmatprep.subr.bf16.mxu1 %v2846_v18  ;;  %v2876_v57 = vunpack.c.l.s8.bf16 %v3844_v52  ;;  %v2878_v18 = vunpack.c.l.s8.bf16 %v3846_v54  ;;  %v2897_v54 = vunpack.c.h.s8.bf16 %v3853_v55 }
 0x482   : > { %3061 = vmatpush1.bf16.msra.mxu0 %v2843_v60  ;;  %3225 = vmatpush1.bf16.msra.mxu1 %v2845_v61  ;;  %v2875_v60 = vunpack.c.l.s8.bf16 %v3843_v58  ;;  %v2877_v61 = vunpack.c.l.s8.bf16 %v3845_v59 }
 0x483   : > { %3062 = vmatprep.subr.bf16.mxu0 %v2848_v22  ;;  %3226 = vmatprep.subr.bf16.mxu1 %v2850_v62  ;;  %v2612_v22 = vpack.c.bf16 %v2604_v48, %v2604_v48  ;;  %v2880_v62 = vunpack.c.h.s8.bf16 %v3844_v52  ;;  %v3855_v48 = vld [vmem:[%s4521_s14 + $0x660] sm:$0xff] }
 0x486   : > { %3063 = vmatpush1.bf16.msra.mxu0 %v2847_v1  ;;  %3227 = vmatpush1.bf16.msra.mxu1 %v2849_v2  ;;  %v3850_v1 = vld [vmem:[%s4521_s14 + $0x638] sm:$0xff]  ;;  %v2528_v2 = vrot.slane %v5020_v36, %v4752_v43 }
 0x487   : > { %3064 = vmatprep.subr.bf16.mxu0 %v2852_v3  ;;  %3228 = vmatprep.subr.bf16.mxu1 %v2854_v4  ;;  %v2879_v3 = vunpack.c.h.s8.bf16 %v3843_v58  ;;  %v2881_v4 = vunpack.c.h.s8.bf16 %v3845_v59 }
 0x48a   : > { %3065 = vmatpush1.bf16.msra.mxu0 %v2851_v7  ;;  %3229 = vmatpush1.bf16.msra.mxu1 %v2853_v8  ;;  %v2884_v8 = vunpack.c.l.s8.bf16 %v3848_v63 }
 0x48b   : > { %3066 = vmatprep.subr.bf16.mxu0 %v2856_v11  ;;  %3230 = vmatprep.subr.bf16.mxu1 %v2858_v12  ;;  %v2886_v11 = vunpack.c.l.s8.bf16 %v3850_v1  ;;  %v3847_v12 = vld [vmem:[%s4521_s14 + $0x620] sm:$0xff] }
 0x48c   : > { %v2883_v43 = vunpack.c.l.s8.bf16 %v3847_v12 }
 0x48e   : > { %3067 = vmatpush1.bf16.msra.mxu0 %v2855_v23  ;;  %3231 = vmatpush1.bf16.msra.mxu1 %v2857_v24 }
 0x48f   : > { %3068 = vmatprep.subr.bf16.mxu0 %v2860_v26  ;;  %3232 = vmatprep.subr.bf16.mxu1 %v2862_v29 }
 0x492   : > { %3069 = vmatpush1.bf16.msra.mxu0 %v2859_v31  ;;  %3233 = vmatpush1.bf16.msra.mxu1 %v2861_v32  ;;  %v2885_v31 = vunpack.c.l.s8.bf16 %v3849_v19 }
 0x493   : > { %3070 = vmatprep.subr.bf16.mxu0 %v2864_v34  ;;  %3234 = vmatprep.subr.bf16.mxu1 %v2866_v35  ;;  %v2890_v34 = vunpack.c.h.s8.bf16 %v3850_v1  ;;  %v3852_v35 = vld [vmem:[%s4521_s14 + $0x648] sm:$0xff] }
 0x494   : > { %v2892_v45 = vunpack.c.l.s8.bf16 %v3852_v35 }
 0x496   : > { %3071 = vmatpush1.bf16.msra.mxu0 %v2863_v42  ;;  %3235 = vmatpush1.bf16.msra.mxu1 %v2865_v37  ;;  %v2887_v42 = vunpack.c.h.s8.bf16 %v3847_v12  ;;  %v2889_v37 = vunpack.c.h.s8.bf16 %v3849_v19  ;;  %v3864_v12 = vld [vmem:[%s4521_s14 + $0x6a8] sm:$0xff]  ;;  %v3866_v19 = vld [vmem:[%s4521_s14 + $0x6b8] sm:$0xff] }
 0x497   : > { %3072 = vmatprep.subr.bf16.mxu0 %v2868_v15  ;;  %3236 = vmatprep.subr.bf16.mxu1 %v2870_v47  ;;  %v2894_v15 = vunpack.c.l.s8.bf16 %v3854_v40  ;;  %v3851_v47 = vld [vmem:[%s4521_s14 + $0x640] sm:$0xff] }
 0x498   : > { %v2891_v49 = vunpack.c.l.s8.bf16 %v3851_v47  ;;  %v2895_v52 = vunpack.c.h.s8.bf16 %v3851_v47 }
 0x49a   : > { %3073 = vmatpush1.bf16.msra.mxu0 %v2867_v46  ;;  %3237 = vmatpush1.bf16.msra.mxu1 %v2869_v9  ;;  %v2893_v46 = vunpack.c.l.s8.bf16 %v3853_v55  ;;  %v2896_v9 = vunpack.c.h.s8.bf16 %v3852_v35  ;;  %v3870_v35 = vld [vmem:[%s4521_s14 + $0x6d8] sm:$0xff]  ;;  %v2524_v55 = vrot.slane %v5020_v36, %v4787_v20 }
 0x49b   : > { %3074 = vmatprep.subr.bf16.mxu0 %v2872_v16  ;;  %3238 = vmatprep.subr.bf16.mxu1 %v2874_v51  ;;  %v3856_v16 = vld [vmem:[%s4521_s14 + $0x668] sm:$0xff]  ;;  %v3858_v51 = vld [vmem:[%s4521_s14 + $0x678] sm:$0xff] }
 0x49c   : > { %v2904_v59 = vunpack.c.h.s8.bf16 %v3856_v16 }
 0x49e   : > { %3075 = vmatpush1.bf16.msra.mxu0 %v2871_v10  ;;  %3239 = vmatpush1.bf16.msra.mxu1 %v2873_v56  ;;  %v2900_v10 = vunpack.c.l.s8.bf16 %v3856_v16  ;;  %v2902_v56 = vunpack.c.l.s8.bf16 %v3858_v51  ;;  %v2536_v16 = vrot.slane %v5020_v36, %v4792_v27  ;;  %v2585_v36 = vrot.slane %v5023_v38, %v4792_v27 }
 0x49f   : > { %3085 = vmatprep.subr.bf16.mxu0 %v2876_v57  ;;  %3249 = vmatprep.subr.bf16.mxu1 %v2878_v18  ;;  %v3857_v57 = vld [vmem:[%s4521_s14 + $0x670] sm:$0xff]  ;;  %v2899_v18 = vunpack.c.l.s8.bf16 %v3855_v48 }
 0x4a0   : > { %v2901_v58 = vunpack.c.l.s8.bf16 %v3857_v57 }
 0x4a1   : > { %3077 = vmatmul.mubr.bf16.vlgmr.msra.gmra.mrb[24].mxu0 %v2612_v22  ;;  %3241 = vmatmul.mubr.bf16.vlgmr.msra.gmra.mrb[24].mxu1 %v2612_v22  ;;  %v3862_v22 = vld [vmem:[%s4521_s14 + $0x698] sm:$0xff] }
 0x4a2   : > { %3086 = vmatpush1.bf16.msra.mxu0 %v2875_v60  ;;  %3250 = vmatpush1.bf16.msra.mxu1 %v2877_v61  ;;  %v5084_v5 = vpop.f32.mrb[20].mxu0  ;;  %v5088_v7 = vpop.f32.mrb[20].mxu1  ;;  %v2906_v60 = vunpack.c.h.s8.bf16 %v3858_v51  ;;  %v3860_v61 = vld [vmem:[%s4521_s14 + $0x688] sm:$0xff]  ;;  %v2910_v1 = vunpack.c.l.s8.bf16 %v3862_v22 }
 0x4a3   : > { %3087 = vmatprep.subr.bf16.mxu0 %v2880_v62  ;;  %3251 = vmatprep.subr.bf16.mxu1 %v2882_v53  ;;  %v2417_v21 = vpop.f32.mrb[21].mxu0  ;;  %v5092_v23 = vpop.f32.mrb[21].mxu1  ;;  %v2903_v62 = vunpack.c.h.s8.bf16 %v3855_v48  ;;  %v2905_v53 = vunpack.c.h.s8.bf16 %v3857_v57  ;;  %v2908_v63 = vunpack.c.l.s8.bf16 %v3860_v61  ;;  %v3871_v57 = vld [vmem:[%s4521_s14 + $0x6e0] sm:$0xff] }
 0x4a4   : > { %v2550_v24 = vmul.f32 %v2528_v2, %v2417_v21  ;;  %v2419_v26 = vpop.f32.mrb[22].mxu0  ;;  %v2501_v29 = vpop.f32.mrb[22].mxu1  ;;  %v3859_v2 = vld [vmem:[%s4521_s14 + $0x680] sm:$0xff] }
 0x4a5   : > { %v2420_v30 = vpop.f32.mrb[23].mxu0  ;;  %v2502_v39 = vpop.f32.mrb[23].mxu1  ;;  %v2911_v21 = vunpack.c.h.s8.bf16 %v3859_v2  ;;  %v2916_v26 = vunpack.c.l.s8.bf16 %v3864_v12  ;;  %v2918_v29 = vunpack.c.l.s8.bf16 %v3866_v19 }
 0x4a6   : > { %3088 = vmatpush1.bf16.msra.mxu0 %v2879_v3  ;;  %3252 = vmatpush1.bf16.msra.mxu1 %v2881_v4  ;;  %v2599_v32 = vadd.f32 %v2577_v6, %v2550_v24  ;;  %v3861_v3 = vld [vmem:[%s4521_s14 + $0x690] sm:$0xff]  ;;  %v2907_v4 = vunpack.c.l.s8.bf16 %v3859_v2  ;;  %v3863_v30 = vld [vmem:[%s4521_s14 + $0x6a0] sm:$0xff] }
 0x4a7   : > { %3089 = vmatprep.subr.bf16.mxu0 %v2884_v8  ;;  %3253 = vmatprep.subr.bf16.mxu1 %v2886_v11  ;;  %v2909_v6 = vunpack.c.l.s8.bf16 %v3861_v3  ;;  %v2912_v8 = vunpack.c.h.s8.bf16 %v3860_v61  ;;  %v2914_v11 = vunpack.c.h.s8.bf16 %v3862_v22  ;;  %v2913_v24 = vunpack.c.h.s8.bf16 %v3861_v3  ;;  %v3865_v39 = vld [vmem:[%s4521_s14 + $0x6b0] sm:$0xff]  ;;  %v3876_v22 = vld [vmem:[%s4521_s14 + $0x708] sm:$0xff]  ;;  %v3875_v2 = vld [vmem:[%s4521_s14 + $0x700] sm:$0xff] }
 0x4a8   : > { %v2607_v41 = vmax.f32 %v2599_v32, 0.0  ;;  %v2920_v32 = vunpack.c.h.s8.bf16 %v3864_v12  ;;  %v2919_v40 = vunpack.c.h.s8.bf16 %v3863_v30  ;;  %v2940_v27 = vunpack.c.l.s8.bf16 %v3876_v22  ;;  %v3877_v3 = vld [vmem:[%s4521_s14 + $0x710] sm:$0xff] }
 0x4a9   : > { %v2944_v12 = vunpack.c.h.s8.bf16 %v3876_v22 }
 0x4aa   : > { %3090 = vmatpush1.bf16.msra.mxu0 %v2883_v43  ;;  %3254 = vmatpush1.bf16.msra.mxu1 %v2885_v31  ;;  %v2615_v44 = vpack.c.bf16 %v2607_v41, %v2607_v41  ;;  %v2915_v43 = vunpack.c.l.s8.bf16 %v3863_v30  ;;  %v2917_v31 = vunpack.c.l.s8.bf16 %v3865_v39  ;;  %v2921_v41 = vunpack.c.h.s8.bf16 %v3865_v39 }
 0x4ab   : > { %3091 = vmatprep.subr.bf16.mxu0 %v2888_v33  ;;  %3255 = vmatprep.subr.bf16.mxu1 %v2890_v34  ;;  %v2922_v33 = vunpack.c.h.s8.bf16 %v3866_v19  ;;  %v3868_v34 = vld [vmem:[%s4521_s14 + $0x6c8] sm:$0xff]  ;;  %v2945_v30 = vunpack.c.h.s8.bf16 %v3877_v3 }
 0x4ac   : > { %3117 = vmatprep.mubr.bf16.mxu0 %v2615_v44  ;;  %3281 = vmatprep.mubr.bf16.mxu1 %v2615_v44  ;;  %v3867_v44 = vld [vmem:[%s4521_s14 + $0x6c0] sm:$0xff] }
 0x4ad   : > { %v2927_v51 = vunpack.c.h.s8.bf16 %v3867_v44 }
 0x4ae   : > { %3092 = vmatpush1.bf16.msra.mxu0 %v2887_v42  ;;  %3256 = vmatpush1.bf16.msra.mxu1 %v2889_v37  ;;  %v2924_v42 = vunpack.c.l.s8.bf16 %v3868_v34  ;;  %v2926_v37 = vunpack.c.l.s8.bf16 %v3870_v35 }
 0x4af   : > { %3093 = vmatprep.subr.bf16.mxu0 %v2892_v45  ;;  %3257 = vmatprep.subr.bf16.mxu1 %v2894_v15  ;;  %v3869_v45 = vld [vmem:[%s4521_s14 + $0x6d0] sm:$0xff]  ;;  %v2923_v15 = vunpack.c.l.s8.bf16 %v3867_v44 }
 0x4b0   : > { %v2925_v47 = vunpack.c.l.s8.bf16 %v3869_v45 }
 0x4b2   : > { %3094 = vmatpush1.bf16.msra.mxu0 %v2891_v49  ;;  %3258 = vmatpush1.bf16.msra.mxu1 %v2893_v46  ;;  %v2928_v49 = vunpack.c.h.s8.bf16 %v3868_v34  ;;  %v2930_v46 = vunpack.c.h.s8.bf16 %v3870_v35 }
 0x4b3   : > { %3095 = vmatprep.subr.bf16.mxu0 %v2896_v9  ;;  %3259 = vmatprep.subr.bf16.mxu1 %v2898_v50  ;;  %v3872_v9 = vld [vmem:[%s4521_s14 + $0x6e8] sm:$0xff]  ;;  %v3874_v50 = vld [vmem:[%s4521_s14 + $0x6f8] sm:$0xff] }
 0x4b4   : > { %v2934_v48 = vunpack.c.l.s8.bf16 %v3874_v50  ;;  %v2938_v61 = vunpack.c.h.s8.bf16 %v3874_v50 }
 0x4b6   : > { %3096 = vmatpush1.bf16.msra.mxu0 %v2895_v52  ;;  %3260 = vmatpush1.bf16.msra.mxu1 %v2897_v54  ;;  %v2929_v52 = vunpack.c.h.s8.bf16 %v3869_v45  ;;  %v2549_v54 = vmul.f32 %v2524_v55, %v5084_v5  ;;  %v3885_v55 = vld [vmem:[%s4521_s14 + $0x750] sm:$0xff] }
 0x4b7   : > { %3097 = vmatprep.subr.bf16.mxu0 %v2900_v10  ;;  %3261 = vmatprep.subr.bf16.mxu1 %v2902_v56  ;;  %v2573_v10 = vrot.slane %v5023_v38, %v4787_v20  ;;  %v2932_v56 = vunpack.c.l.s8.bf16 %v3872_v9  ;;  %v2936_v20 = vunpack.c.h.s8.bf16 %v3872_v9 }
 0x4ba   : > { %3098 = vmatpush1.bf16.msra.mxu0 %v2899_v18  ;;  %3262 = vmatpush1.bf16.msra.mxu1 %v2901_v58  ;;  %v3873_v18 = vld [vmem:[%s4521_s14 + $0x6f0] sm:$0xff]  ;;  %v2552_v58 = vmul.f32 %v2536_v16, %v5092_v23  ;;  %v2935_v23 = vunpack.c.h.s8.bf16 %v3871_v57  ;;  %v3888_v16 = vld [vmem:[%s4521_s14 + $0x768] sm:$0xff] }
 0x4bb   : > { %3099 = vmatprep.subr.bf16.mxu0 %v2904_v59  ;;  %3263 = vmatprep.subr.bf16.mxu1 %v2906_v60  ;;  %v2931_v59 = vunpack.c.l.s8.bf16 %v3871_v57  ;;  %v2933_v5 = vunpack.c.l.s8.bf16 %v3873_v18  ;;  %v2598_v60 = vadd.f32 %v2573_v10, %v2549_v54  ;;  %v2961_v54 = vunpack.c.h.s8.bf16 %v3885_v55  ;;  %v3889_v57 = vld [vmem:[%s4521_s14 + $0x770] sm:$0xff] }
 0x4bc   : > { %v2964_v10 = vunpack.c.l.s8.bf16 %v3888_v16 }
 0x4be   : > { %3100 = vmatpush1.bf16.msra.mxu0 %v2903_v62  ;;  %3264 = vmatpush1.bf16.msra.mxu1 %v2905_v53  ;;  %v3878_v62 = vld [vmem:[%s4521_s14 + $0x718] sm:$0xff]  ;;  %v2601_v53 = vadd.f32 %v2585_v36, %v2552_v58  ;;  %v2965_v58 = vunpack.c.l.s8.bf16 %v3889_v57  ;;  %v2968_v36 = vunpack.c.h.s8.bf16 %v3888_v16 }
 0x4bf   : > { %3101 = vmatprep.subr.bf16.mxu0 %v2908_v63  ;;  %3265 = vmatprep.subr.bf16.mxu1 %v2910_v1  ;;  %v2937_v63 = vunpack.c.h.s8.bf16 %v3873_v18  ;;  %v2606_v1 = vmax.f32 %v2598_v60, 0.0  ;;  %v2942_v38 = vunpack.c.l.s8.bf16 %v3878_v62  ;;  %v2946_v19 = vunpack.c.h.s8.bf16 %v3878_v62  ;;  %v3894_v60 = vld [vmem:[%s4521_s14 + $0x798] sm:$0xff] }
 0x4c0   : > { %v2974_v62 = vunpack.c.l.s8.bf16 %v3894_v60 }
 0x4c2   : > { %3102 = vmatpush1.bf16.msra.mxu0 %v2907_v4  ;;  %3266 = vmatpush1.bf16.msra.mxu1 %v2909_v6  ;;  %v2609_v4 = vmax.f32 %v2601_v53, 0.0  ;;  %v2939_v6 = vunpack.c.l.s8.bf16 %v3875_v2  ;;  %v3891_v53 = vld [vmem:[%s4521_s14 + $0x780] sm:$0xff] }
 0x4c3   : > { %3103 = vmatprep.subr.bf16.mxu0 %v2912_v8  ;;  %3267 = vmatprep.subr.bf16.mxu1 %v2914_v11  ;;  %v2941_v8 = vunpack.c.l.s8.bf16 %v3877_v3  ;;  %v2614_v11 = vpack.c.bf16 %v2606_v1, %v2606_v1  ;;  %v3898_v3 = vld [vmem:[%s4521_s14 + $0x7b8] sm:$0xff] }
 0x4c6   : > { %3104 = vmatpush1.bf16.msra.mxu0 %v2911_v21  ;;  %3268 = vmatpush1.bf16.msra.mxu1 %v2913_v24  ;;  %v2617_v21 = vpack.c.bf16 %v2609_v4, %v2609_v4  ;;  %v3880_v24 = vld [vmem:[%s4521_s14 + $0x728] sm:$0xff]  ;;  %v2975_v4 = vunpack.c.h.s8.bf16 %v3891_v53 }
 0x4c7   : > { %3105 = vmatprep.subr.bf16.mxu0 %v2916_v26  ;;  %3269 = vmatprep.subr.bf16.mxu1 %v2918_v29  ;;  %v3882_v26 = vld [vmem:[%s4521_s14 + $0x738] sm:$0xff]  ;;  %v2943_v29 = vunpack.c.h.s8.bf16 %v3875_v2  ;;  %v2948_v39 = vunpack.c.l.s8.bf16 %v3880_v24  ;;  %v2952_v35 = vunpack.c.h.s8.bf16 %v3880_v24  ;;  %v3896_v2 = vld [vmem:[%s4521_s14 + $0x7a8] sm:$0xff] }
 0x4ca   : > { %3106 = vmatpush1.bf16.msra.mxu0 %v2915_v43  ;;  %3270 = vmatpush1.bf16.msra.mxu1 %v2917_v31  ;;  %v2950_v43 = vunpack.c.l.s8.bf16 %v3882_v26  ;;  %v3879_v31 = vld [vmem:[%s4521_s14 + $0x720] sm:$0xff] }
 0x4cb   : > { %3107 = vmatprep.subr.bf16.mxu0 %v2920_v32  ;;  %3271 = vmatprep.subr.bf16.mxu1 %v2922_v33  ;;  %v3881_v32 = vld [vmem:[%s4521_s14 + $0x730] sm:$0xff]  ;;  %v2947_v33 = vunpack.c.l.s8.bf16 %v3879_v31 }
 0x4cc   : > { %v2949_v34 = vunpack.c.l.s8.bf16 %v3881_v32  ;;  %v2953_v44 = vunpack.c.h.s8.bf16 %v3881_v32 }
 0x4ce   : > { %3108 = vmatpush1.bf16.msra.mxu0 %v2919_v40  ;;  %3272 = vmatpush1.bf16.msra.mxu1 %v2921_v41  ;;  %v2954_v40 = vunpack.c.h.s8.bf16 %v3882_v26  ;;  %v3884_v41 = vld [vmem:[%s4521_s14 + $0x748] sm:$0xff]  ;;  %v2984_v26 = vunpack.c.h.s8.bf16 %v3896_v2 }
 0x4cf   : > { %3109 = vmatprep.subr.bf16.mxu0 %v2924_v42  ;;  %3273 = vmatprep.subr.bf16.mxu1 %v2926_v37  ;;  %v3886_v42 = vld [vmem:[%s4521_s14 + $0x758] sm:$0xff]  ;;  %v2951_v37 = vunpack.c.h.s8.bf16 %v3879_v31  ;;  %v2956_v45 = vunpack.c.l.s8.bf16 %v3884_v41  ;;  %v2960_v9 = vunpack.c.h.s8.bf16 %v3884_v41 }
 0x4d0   : > { %v2962_v50 = vunpack.c.h.s8.bf16 %v3886_v42 }
 0x4d2   : > { %3110 = vmatpush1.bf16.msra.mxu0 %v2923_v15  ;;  %3274 = vmatpush1.bf16.msra.mxu1 %v2925_v47  ;;  %v2958_v15 = vunpack.c.l.s8.bf16 %v3886_v42  ;;  %v3883_v47 = vld [vmem:[%s4521_s14 + $0x740] sm:$0xff] }
 0x4d3   : > { %3111 = vmatprep.subr.bf16.mxu0 %v2928_v49  ;;  %3275 = vmatprep.subr.bf16.mxu1 %v2930_v46  ;;  %v2955_v49 = vunpack.c.l.s8.bf16 %v3883_v47  ;;  %v2957_v46 = vunpack.c.l.s8.bf16 %v3885_v55  ;;  %v4176_v42 = vld [vmem:[%s4680_s9 + $0x1a] ss:$2 sm:$0xff] }
 0x4d6   : > { %3112 = vmatpush1.bf16.msra.mxu0 %v2927_v51  ;;  %3276 = vmatpush1.bf16.msra.mxu1 %v2929_v52  ;;  %v3890_v51 = vld [vmem:[%s4521_s14 + $0x778] sm:$0xff]  ;;  %v2959_v52 = vunpack.c.h.s8.bf16 %v3883_v47 }
 0x4d7   : > { %3113 = vmatprep.subr.bf16.mxu0 %v2932_v56  ;;  %3277 = vmatprep.subr.bf16.mxu1 %v2934_v48  ;;  %v2966_v56 = vunpack.c.l.s8.bf16 %v3890_v51  ;;  %v3887_v48 = vld [vmem:[%s4521_s14 + $0x760] sm:$0xff]  ;;  %v3906_v47 = vld [vmem:[%s4521_s14 + $0x7f8] sm:$0xff] }
 0x4d8   : > { %v2963_v18 = vunpack.c.l.s8.bf16 %v3887_v48 }
 0x4da   : > { %3114 = vmatpush1.bf16.msra.mxu0 %v2931_v59  ;;  %3278 = vmatpush1.bf16.msra.mxu1 %v2933_v5  ;;  %v2970_v59 = vunpack.c.h.s8.bf16 %v3890_v51  ;;  %v3892_v5 = vld [vmem:[%s4521_s14 + $0x788] sm:$0xff]  ;;  %v2998_v51 = vunpack.c.l.s8.bf16 %v3906_v47 }
 0x4db   : > { %3115 = vmatprep.subr.bf16.mxu0 %v2936_v20  ;;  %3279 = vmatprep.subr.bf16.mxu1 %v2938_v61  ;;  %v2967_v20 = vunpack.c.h.s8.bf16 %v3887_v48  ;;  %v2969_v61 = vunpack.c.h.s8.bf16 %v3889_v57  ;;  %v2972_v22 = vunpack.c.l.s8.bf16 %v3892_v5  ;;  %v3002_v57 = vunpack.c.h.s8.bf16 %v3906_v47  ;;  %v3910_v47 = vld [vmem:[%s4852_s11 + $0x98] sm:$0xff] }
 0x4de   : > { %3116 = vmatpush1.bf16.msra.mxu0 %v2935_v23  ;;  %3280 = vmatpush1.bf16.msra.mxu1 %v2937_v63  ;;  %v3893_v23 = vld [vmem:[%s4521_s14 + $0x790] sm:$0xff]  ;;  %v2971_v63 = vunpack.c.l.s8.bf16 %v3891_v53 }
 0x4df   : > { %3126 = vmatprep.subr.bf16.mxu0 %v2940_v27  ;;  %3290 = vmatprep.subr.bf16.mxu1 %v2942_v38  ;;  %v2973_v1 = vunpack.c.l.s8.bf16 %v3893_v23  ;;  %v2976_v27 = vunpack.c.h.s8.bf16 %v3892_v5  ;;  %v2978_v38 = vunpack.c.h.s8.bf16 %v3894_v60 }
 0x4e1   : > { %3118 = vmatmul.mubr.bf16.vlgmr.msra.gmra.mrb[24].mxu0 %v2614_v11  ;;  %3282 = vmatmul.mubr.bf16.vlgmr.msra.gmra.mrb[24].mxu1 %v2614_v11  ;;  %v2982_v11 = vunpack.c.l.s8.bf16 %v3898_v3 }
 0x4e2   : > { %3127 = vmatpush1.bf16.msra.mxu0 %v2939_v6  ;;  %3291 = vmatpush1.bf16.msra.mxu1 %v2941_v8  ;;  %v2977_v6 = vunpack.c.h.s8.bf16 %v3893_v23  ;;  %v2980_v8 = vunpack.c.l.s8.bf16 %v3896_v2 }
 0x4e3   : > { %3128 = vmatprep.subr.bf16.mxu0 %v2944_v12  ;;  %3292 = vmatprep.subr.bf16.mxu1 %v2946_v19  ;;  %v3895_v12 = vld [vmem:[%s4521_s14 + $0x7a0] sm:$0xff]  ;;  %v3897_v19 = vld [vmem:[%s4521_s14 + $0x7b0] sm:$0xff] }
 0x4e4   : > { %3158 = vmatprep.mubr.bf16.mxu0 %v2617_v21  ;;  %3322 = vmatprep.mubr.bf16.mxu1 %v2617_v21  ;;  %v2979_v21 = vunpack.c.l.s8.bf16 %v3895_v12  ;;  %v2981_v24 = vunpack.c.l.s8.bf16 %v3897_v19  ;;  %v2985_v31 = vunpack.c.h.s8.bf16 %v3897_v19 }
 0x4e6   : > { %3129 = vmatpush1.bf16.msra.mxu0 %v2943_v29  ;;  %3293 = vmatpush1.bf16.msra.mxu1 %v2945_v30  ;;  %v2986_v29 = vunpack.c.h.s8.bf16 %v3898_v3  ;;  %v3900_v30 = vld [vmem:[%s4521_s14 + $0x7c8] sm:$0xff] }
 0x4e7   : > { %3130 = vmatprep.subr.bf16.mxu0 %v2948_v39  ;;  %3294 = vmatprep.subr.bf16.mxu1 %v2950_v43  ;;  %v3902_v39 = vld [vmem:[%s4521_s14 + $0x7d8] sm:$0xff]  ;;  %v2983_v43 = vunpack.c.h.s8.bf16 %v3895_v12  ;;  %v2988_v32 = vunpack.c.l.s8.bf16 %v3900_v30 }
 0x4ea   : > { %3131 = vmatpush1.bf16.msra.mxu0 %v2947_v33  ;;  %3295 = vmatpush1.bf16.msra.mxu1 %v2949_v34  ;;  %v2990_v33 = vunpack.c.l.s8.bf16 %v3902_v39  ;;  %v3899_v34 = vld [vmem:[%s4521_s14 + $0x7c0] sm:$0xff] }
 0x4eb   : > { %3132 = vmatprep.subr.bf16.mxu0 %v2952_v35  ;;  %3296 = vmatprep.subr.bf16.mxu1 %v2954_v40  ;;  %v3901_v35 = vld [vmem:[%s4521_s14 + $0x7d0] sm:$0xff]  ;;  %v2987_v40 = vunpack.c.l.s8.bf16 %v3899_v34  ;;  %v2991_v55 = vunpack.c.h.s8.bf16 %v3899_v34 }
 0x4ec   : > { %v2989_v41 = vunpack.c.l.s8.bf16 %v3901_v35 }
 0x4ee   : > { %3133 = vmatpush1.bf16.msra.mxu0 %v2951_v37  ;;  %3297 = vmatpush1.bf16.msra.mxu1 %v2953_v44  ;;  %v2532_v37 = vrot.slane %v4176_v42, %v4836_v28  ;;  %v2992_v44 = vunpack.c.h.s8.bf16 %v3900_v30 }
 0x4ef   : > { %3134 = vmatprep.subr.bf16.mxu0 %v2956_v45  ;;  %3298 = vmatprep.subr.bf16.mxu1 %v2958_v15  ;;  %v2994_v45 = vunpack.c.h.s8.bf16 %v3902_v39  ;;  %v3904_v15 = vld [vmem:[%s4521_s14 + $0x7e8] sm:$0xff] }
 0x4f0   : > { %v2996_v16 = vunpack.c.l.s8.bf16 %v3904_v15 }
 0x4f2   : > { %3135 = vmatpush1.bf16.msra.mxu0 %v2955_v49  ;;  %3299 = vmatpush1.bf16.msra.mxu1 %v2957_v46  ;;  %v2993_v49 = vunpack.c.h.s8.bf16 %v3901_v35  ;;  %v2551_v46 = vmul.f32 %v2532_v37, %v5088_v7  ;;  %v3000_v7 = vunpack.c.h.s8.bf16 %v3904_v15  ;;  %v3914_v37 = vld [vmem:[%s4852_s11 + $0xb8] sm:$0xff] }
 0x4f3   : > { %3136 = vmatprep.subr.bf16.mxu0 %v2960_v9  ;;  %3300 = vmatprep.subr.bf16.mxu1 %v2962_v50  ;;  %v4177_v9 = vld [vmem:[%s4680_s9 + $0x1b] ss:$2 sm:$0xff] }
 0x4f4   : > { %v2581_v50 = vrot.slane %v4177_v9, %v4836_v28  ;;  %v3911_v28 = vld [vmem:[%s4852_s11 + $0xa0] sm:$0xff]  ;;  %v3421_v9 = vunpack.c.h.s8.bf16 %v3914_v37 }
 0x4f5   : > { %v3414_v5 = vunpack.c.l.s8.bf16 %v3911_v28  ;;  %v3415_v23 = vunpack.c.h.s8.bf16 %v3911_v28 }
 0x4f6   : > { %3137 = vmatpush1.bf16.msra.mxu0 %v2959_v52  ;;  %3301 = vmatpush1.bf16.msra.mxu1 %v2961_v54  ;;  %v3903_v52 = vld [vmem:[%s4521_s14 + $0x7e0] sm:$0xff]  ;;  %v3905_v54 = vld [vmem:[%s4521_s14 + $0x7f0] sm:$0xff]  ;;  %v2600_v48 = vadd.f32 %v2581_v50, %v2551_v46 }
 0x4f7   : > { %3138 = vmatprep.subr.bf16.mxu0 %v2964_v10  ;;  %3302 = vmatprep.subr.bf16.mxu1 %v2966_v56  ;;  %v2995_v10 = vunpack.c.l.s8.bf16 %v3903_v52  ;;  %v2997_v56 = vunpack.c.l.s8.bf16 %v3905_v54 }
 0x4fa   : > { %3139 = vmatpush1.bf16.msra.mxu0 %v2963_v18  ;;  %3303 = vmatpush1.bf16.msra.mxu1 %v2965_v58  ;;  %v3919_v18 = vld [vmem:[%s4852_s11 + $0xe0] sm:$0xff]  ;;  %v2999_v58 = vunpack.c.h.s8.bf16 %v3903_v52 }
 0x4fb   : > { %3140 = vmatprep.subr.bf16.mxu0 %v2968_v36  ;;  %3304 = vmatprep.subr.bf16.mxu1 %v2970_v59  ;;  %v3001_v36 = vunpack.c.h.s8.bf16 %v3905_v54  ;;  %v2608_v59 = vmax.f32 %v2600_v48, 0.0  ;;  %v3430_v60 = vunpack.c.l.s8.bf16 %v3919_v18  ;;  %v3699_v52 = vld [vmem:[%s4680_s9 + $0x2a] ss:$2 sm:$0xf] }
 0x4fc   : > { %v3700_v54 = vld [vmem:[%s4680_s9 + $0x2b] ss:$2 sm:$0xf]  ;;  %v3339_v48 = vrot.slane %v3699_v52, %v4686_v17 }
 0x4fd   : > { %v2616_v53 = vpack.c.bf16 %v2608_v59, %v2608_v59  ;;  %v3368_v28 = vrot.slane %v3700_v54, %v4734_v0  ;;  %v3372_v59 = vrot.slane %v3700_v54, %v4700_v25 }
 0x4fe   : > { %3141 = vmatpush1.bf16.msra.mxu0 %v2967_v20  ;;  %3305 = vmatpush1.bf16.msra.mxu1 %v2969_v61  ;;  %v3907_v20 = vld [vmem:[%s4852_s11 + $0x80] sm:$0xff] }
 0x4ff   : > { %3142 = vmatprep.subr.bf16.mxu0 %v2972_v22  ;;  %3306 = vmatprep.subr.bf16.mxu1 %v2974_v62  ;;  %v3915_v61 = vld [vmem:[%s4852_s11 + $0xc0] sm:$0xff]  ;;  %v3406_v22 = vunpack.c.l.s8.bf16 %v3907_v20 }
 0x500   : > { %v3422_v62 = vunpack.c.l.s8.bf16 %v3915_v61  ;;  %v3423_v2 = vunpack.c.h.s8.bf16 %v3915_v61 }
 0x502   : > { %3143 = vmatpush1.bf16.msra.mxu0 %v2971_v63  ;;  %3307 = vmatpush1.bf16.msra.mxu1 %v2973_v1  ;;  %v3431_v63 = vunpack.c.h.s8.bf16 %v3919_v18  ;;  %v3912_v1 = vld [vmem:[%s4852_s11 + $0xa8] sm:$0xff] }
 0x503   : > { %3144 = vmatprep.subr.bf16.mxu0 %v2976_v27  ;;  %3308 = vmatprep.subr.bf16.mxu1 %v2978_v38  ;;  %v3920_v27 = vld [vmem:[%s4852_s11 + $0xe8] sm:$0xff]  ;;  %v3407_v38 = vunpack.c.h.s8.bf16 %v3907_v20  ;;  %v3416_v3 = vunpack.c.l.s8.bf16 %v3912_v1  ;;  %v3417_v19 = vunpack.c.h.s8.bf16 %v3912_v1 }
 0x506   : > { %3145 = vmatpush1.bf16.msra.mxu0 %v2975_v4  ;;  %3309 = vmatpush1.bf16.msra.mxu1 %v2977_v6  ;;  %v3432_v4 = vunpack.c.l.s8.bf16 %v3920_v27  ;;  %v3908_v6 = vld [vmem:[%s4852_s11 + $0x88] sm:$0xff] }
 0x507   : > { %3146 = vmatprep.subr.bf16.mxu0 %v2980_v8  ;;  %3310 = vmatprep.subr.bf16.mxu1 %v2982_v11  ;;  %v3916_v8 = vld [vmem:[%s4852_s11 + $0xc8] sm:$0xff]  ;;  %v3408_v11 = vunpack.c.l.s8.bf16 %v3908_v6 }
 0x508   : > { %v3424_v12 = vunpack.c.l.s8.bf16 %v3916_v8  ;;  %v3425_v30 = vunpack.c.h.s8.bf16 %v3916_v8 }
 0x50a   : > { %3147 = vmatpush1.bf16.msra.mxu0 %v2979_v21  ;;  %3311 = vmatpush1.bf16.msra.mxu1 %v2981_v24  ;;  %v3433_v21 = vunpack.c.h.s8.bf16 %v3920_v27  ;;  %v3913_v24 = vld [vmem:[%s4852_s11 + $0xb0] sm:$0xff] }
 0x50b   : > { %3148 = vmatprep.subr.bf16.mxu0 %v2984_v26  ;;  %3312 = vmatprep.subr.bf16.mxu1 %v2986_v29  ;;  %v3921_v26 = vld [vmem:[%s4852_s11 + $0xf0] sm:$0xff]  ;;  %v3409_v29 = vunpack.c.h.s8.bf16 %v3908_v6  ;;  %v3418_v39 = vunpack.c.l.s8.bf16 %v3913_v24  ;;  %v3419_v35 = vunpack.c.h.s8.bf16 %v3913_v24 }
 0x50e   : > { %3149 = vmatpush1.bf16.msra.mxu0 %v2983_v43  ;;  %3313 = vmatpush1.bf16.msra.mxu1 %v2985_v31  ;;  %v3434_v43 = vunpack.c.l.s8.bf16 %v3921_v26  ;;  %v3909_v31 = vld [vmem:[%s4852_s11 + $0x90] sm:$0xff] }
 0x50f   : > { %3150 = vmatprep.subr.bf16.mxu0 %v2988_v32  ;;  %3314 = vmatprep.subr.bf16.mxu1 %v2990_v33  ;;  %v3917_v32 = vld [vmem:[%s4852_s11 + $0xd0] sm:$0xff]  ;;  %v3410_v33 = vunpack.c.l.s8.bf16 %v3909_v31 }
 0x510   : > { %v3426_v34 = vunpack.c.l.s8.bf16 %v3917_v32  ;;  %v3427_v42 = vunpack.c.h.s8.bf16 %v3917_v32 }
 0x512   : > { %3151 = vmatpush1.bf16.msra.mxu0 %v2987_v40  ;;  %3315 = vmatpush1.bf16.msra.mxu1 %v2989_v41  ;;  %v3435_v40 = vunpack.c.h.s8.bf16 %v3921_v26  ;;  %v3411_v41 = vunpack.c.h.s8.bf16 %v3909_v31 }
 0x513   : > { %3152 = vmatprep.subr.bf16.mxu0 %v2992_v44  ;;  %3316 = vmatprep.subr.bf16.mxu1 %v2994_v45  ;;  %v3922_v44 = vld [vmem:[%s4852_s11 + $0xf8] sm:$0xff]  ;;  %v3420_v45 = vunpack.c.l.s8.bf16 %v3914_v37 }
 0x514   : > { %v3436_v15 = vunpack.c.l.s8.bf16 %v3922_v44  ;;  %v3437_v50 = vunpack.c.h.s8.bf16 %v3922_v44 }
 0x516   : > { %3153 = vmatpush1.bf16.msra.mxu0 %v2991_v55  ;;  %3317 = vmatpush1.bf16.msra.mxu1 %v2993_v49  ;;  %v3918_v55 = vld [vmem:[%s4852_s11 + $0xd8] sm:$0xff]  ;;  %v3412_v49 = vunpack.c.l.s8.bf16 %v3910_v47 }
 0x517   : > { %3154 = vmatprep.subr.bf16.mxu0 %v2996_v16  ;;  %3318 = vmatprep.subr.bf16.mxu1 %v2998_v51  ;;  %v3428_v46 = vunpack.c.l.s8.bf16 %v3918_v55  ;;  %v3413_v16 = vunpack.c.h.s8.bf16 %v3910_v47  ;;  %v3429_v51 = vunpack.c.h.s8.bf16 %v3918_v55  ;;  %v3695_v47 = vld [vmem:[%s4680_s9 + $0x19] ss:$0 sm:$0xff] }
 0x51a   : > { %3155 = vmatpush1.bf16.msra.mxu0 %v2995_v10  ;;  %3319 = vmatpush1.bf16.msra.mxu1 %v2997_v56  ;;  %v3335_v10 = vrot.slane %v3699_v52, %v4678_v14  ;;  %v3343_v56 = vrot.slane %v3699_v52, %v4734_v0 }
 0x51b   : > { %3156 = vmatprep.subr.bf16.mxu0 %v3000_v7  ;;  %3320 = vmatprep.subr.bf16.mxu1 %v3002_v57  ;;  %v3347_v7 = vrot.slane %v3699_v52, %v4700_v25  ;;  %v3360_v57 = vrot.slane %v3700_v54, %v4678_v14 }
 0x51e   : > { %3157 = vmatpush1.bf16.msra.mxu0 %v2999_v58  ;;  %3321 = vmatpush1.bf16.msra.mxu1 %v3001_v36  ;;  %v3364_v36 = vrot.slane %v3700_v54, %v4686_v17 }
 0x51f   : > { %3975 = vmatprep.subr.bf16.mxu0 %v3414_v5  ;;  %3997 = vmatprep.subr.bf16.mxu1 %v3430_v60 }
 0x521   : > { %3159 = vmatmul.mubr.bf16.vlgmr.msra.gmra.mrb[24].mxu0 %v2616_v53  ;;  %3323 = vmatmul.mubr.bf16.vlgmr.msra.gmra.mrb[24].mxu1 %v2616_v53 }
 0x522   : > { %3976 = vmatpush3.bf16.msra.mxu0 %v3406_v22  ;;  %3998 = vmatpush3.bf16.msra.mxu1 %v3422_v62 }
 0x523   : > { %3977 = vmatprep.subr.bf16.mxu0 %v3415_v23  ;;  %3999 = vmatprep.subr.bf16.mxu1 %v3431_v63 }
 0x526   : > { %3978 = vmatpush3.bf16.msra.mxu0 %v3407_v38  ;;  %4000 = vmatpush3.bf16.msra.mxu1 %v3423_v2 }
 0x527   : > { %3979 = vmatprep.subr.bf16.mxu0 %v3416_v3  ;;  %4001 = vmatprep.subr.bf16.mxu1 %v3432_v4 }
 0x52a   : > { %3980 = vmatpush3.bf16.msra.mxu0 %v3408_v11  ;;  %4002 = vmatpush3.bf16.msra.mxu1 %v3424_v12 }
 0x52b   : > { %3981 = vmatprep.subr.bf16.mxu0 %v3417_v19  ;;  %4003 = vmatprep.subr.bf16.mxu1 %v3433_v21 }
 0x52e   : > { %3982 = vmatpush3.bf16.msra.mxu0 %v3409_v29  ;;  %4004 = vmatpush3.bf16.msra.mxu1 %v3425_v30 }
 0x52f   : > { %3983 = vmatprep.subr.bf16.mxu0 %v3418_v39  ;;  %4005 = vmatprep.subr.bf16.mxu1 %v3434_v43  ;;  %v3923_v43 = vld [vmem:[%s4680_s9 + $0x32] ss:$0 sm:$0xff] }
 0x532   : > { %3984 = vmatpush3.bf16.msra.mxu0 %v3410_v33  ;;  %4006 = vmatpush3.bf16.msra.mxu1 %v3426_v34  ;;  %v3924_v34 = vld [vmem:[%s4680_s9 + $0x33] ss:$0 sm:$0xff] }
 0x533   : > { %3985 = vmatprep.subr.bf16.mxu0 %v3419_v35  ;;  %4007 = vmatprep.subr.bf16.mxu1 %v3435_v40 }
 0x536   : > { %3986 = vmatpush3.bf16.msra.mxu0 %v3411_v41  ;;  %4008 = vmatpush3.bf16.msra.mxu1 %v3427_v42 }
 0x537   : > { %3987 = vmatprep.subr.bf16.mxu0 %v3420_v45  ;;  %4009 = vmatprep.subr.bf16.mxu1 %v3436_v15  ;;  %v3694_v45 = vld [vmem:[%s4680_s9 + $0x18] ss:$0 sm:$0xff] }
 0x538   : > { %v1937_v15 = vmul.f32 %v3694_v45, %v5017_v13 }
 0x53a   : > { %3988 = vmatpush3.bf16.msra.mxu0 %v3412_v49  ;;  %4010 = vmatpush3.bf16.msra.mxu1 %v3428_v46  ;;  %v1942_v55 = vadd.f32 %v3695_v47, %v1937_v15 }
 0x53b   : > { %3989 = vmatprep.subr.bf16.mxu0 %v3421_v9  ;;  %4011 = vmatprep.subr.bf16.mxu1 %v3437_v50 }
 0x53c   : > { %v3696_v49 = vmul.f32 -1.442695, %v1942_v55 }
 0x53e   : > { %3990 = vmatpush3.bf16.msra.mxu0 %v3413_v16  ;;  %4012 = vmatpush3.bf16.msra.mxu1 %v3429_v51 }
 0x5f4   : > { %v3160_v18 = vpop.f32.mrb[24].mxu0  ;;  %v3324_v58 = vpop.f32.mrb[24].mxu1 }
 0x5f5   : > { %v3352_v5 = vmul.f32 %v3335_v10, %v3160_v18  ;;  %v3354_v60 = vmul.f32 %v3343_v56, %v3324_v58  ;;  %v3162_v20 = vpop.f32.mrb[25].mxu0  ;;  %v3326_v61 = vpop.f32.mrb[25].mxu1 }
 0x5f6   : > { %v3353_v22 = vmul.f32 %v3339_v48, %v3162_v20  ;;  %v3355_v62 = vmul.f32 %v3347_v7, %v3326_v61  ;;  %v3164_v53 = vpop.f32.mrb[26].mxu0  ;;  %v3328_v23 = vpop.f32.mrb[26].mxu1 }
 0x5f7   : > { %v3377_v63 = vadd.f32 %v3360_v57, %v3352_v5  ;;  %v3379_v1 = vadd.f32 %v3368_v28, %v3354_v60  ;;  %v3165_v27 = vpop.f32.mrb[27].mxu0  ;;  %v3329_v14 = vpop.f32.mrb[27].mxu1 }
 0x5f8   : > { %v3378_v38 = vadd.f32 %v3364_v36, %v3353_v22  ;;  %v3380_v0 = vadd.f32 %v3372_v59, %v3355_v62 }
 0x5f9   : > { %v3381_v2 = vmax.f32 %v3377_v63, 0.0  ;;  %v3383_v3 = vmax.f32 %v3379_v1, 0.0 }
 0x5fa   : > { %v3382_v4 = vmax.f32 %v3378_v38, 0.0  ;;  %v3384_v17 = vmax.f32 %v3380_v0, 0.0 }
 0x5fb   : > { %v3385_v8 = vpack.c.bf16 %v3381_v2, %v3381_v2  ;;  %v3387_v11 = vpack.c.bf16 %v3383_v3, %v3383_v3 }
 0x5fc   : > { %v3386_v6 = vpack.c.bf16 %v3382_v4, %v3382_v4  ;;  %v3388_v25 = vpack.c.bf16 %v3384_v17, %v3384_v17 }
 0x5fe   : > { %3470 = vmatprep.mubr.bf16.mxu0 %v3386_v6  ;;  %3510 = vmatprep.mubr.bf16.mxu1 %v3388_v25 }
 0x5ff   : > { %3471 = vmatmul.mubr.bf16.vlgmr.msra.gmra.mrb[28].mxu0 %v3385_v8  ;;  %3511 = vmatmul.mubr.bf16.vlgmr.msra.gmra.mrb[28].mxu1 %v3387_v11 }
 0x6d2   : > { %v3991_v12 = vpop.f32.mrb[28].mxu0  ;;  %v4013_v19 = vpop.f32.mrb[28].mxu1 }
 0x6d3   : > { %v3992_v21 = vpop.f32.mrb[29].mxu0  ;;  %v4014_v24 = vpop.f32.mrb[29].mxu1 }
 0x6d4   : > { %v3993_v26 = vadd.f32 %v3992_v21, %v3991_v12  ;;  %v4015_v29 = vadd.f32 %v4014_v24, %v4013_v19  ;;  %v3994_v30 = vpop.f32.mrb[30].mxu0  ;;  %v4016_v39 = vpop.f32.mrb[30].mxu1 }
 0x6d5   : > { %v3995_v31 = vpop.f32.mrb[31].mxu0  ;;  %v4017_v32 = vpop.f32.mrb[31].mxu1 }
 0x6d6   : > { %v3513_v33 = vadd.f32 %v4015_v29, %v3993_v26 }
 0x6d8   : > { %v3522_v35 = vmul.f32 %v3923_v43, %v3513_v33 }
 0x6da   : > { %v3527_v40 = vadd.f32 %v3924_v34, %v3522_v35 }
 0x6dc   : > { %v3925_v41 = vmul.f32 -1.442695, %v3527_v40 }
 0x6de   : > { %4165 = vpow2.f32 %v3925_v41 }
 0x6e8   : > { %v4166_v42 = vpop.eup %4165 }
 0x6e9   : > { %v3531_v37 = vadd.f32 1.0, %v4166_v42 }
 0x6eb   : > { %4167 = vrcp.f32 %v3531_v37 }
 0x6ec   : > { %4169 = vpow2.f32 %v3696_v49 }
 0x6f5   : > { %v4168_v44 = vpop.eup %4167 }
 0x6f6   : > { %3535 = vrot.lane.b32.xlu0 %v4168_v44, %s4318_s18  ;;  %v4170_v46 = vpop.eup %4169 }
 0x6f7   : > { %v1946_v9 = vadd.f32 1.0, %v4170_v46 }
 0x6f9   : > { %4171 = vrcp.f32 %v1946_v9 }
 0x703   : > { %v4172_v50 = vpop.eup %4171 }
 0x768   : > { %v3536_v16 = vpop.permute.xlu0 %3535 }
 0x769   : > { %v3539_v51 = vsel %vm3538_vm1, %v4172_v50, %v3536_v16 }
 0x76a   : > { %v3540_v13 = vsel %vm589_vm0, %v3539_v51, 0.0 }
 0x76b   : > { %3541 = vst [vmem:[%s350_s13] sm:$0xff] %v3540_v13 }
 0x76c PF: > { %p18_p12 = scmp.ge.s32.totalorder %s4371_s23, 6   ;;  %s5228_s18 = smov %s4298_s19 }
 0x76d   : > { %s5229_s19 = smov %s4302_s20  ;;  %s5230_s20 = smov %s4381_s26 }
 0x76e   : > { %s5231_s21 = smov %s4371_s23  ;;  %20 = sbr.rel (!%p18_p12) target bundleno = 5 (0x5), region = 117 }
 0x775   :  { %3561 = vsyncpa [#allocation3], 1 }
 0x776   :  { %3563 = vsyncpa [#allocation3 + $0x1], 1 }
 0x777   :  { %3564 = vsyncpa [#allocation5], 1 }
 0x778   :  { %3566 = vsyncpa [#allocation5 + $0x1], 1 }

</bundles_post_ra>
